<compile_context>
chip_gen: v7x
topology: tpu7x:2x2x1
jax: 0.10.0
libtpu: 0.0.40
codegen_flags: <defaults>
</compile_context>

<pallas_src>
import jax
import jax.numpy as jnp
from jax.experimental import pallas as pl
from jax.experimental.pallas import tpu as pltpu

# ----- config (consistent with IPABlock constructor args) -----
DIM = 32      # config.dim
EDIM = 16     # config.edim (pairwise_repr_dim)
HEADS = 4     # config.heads
DK = 8        # scalar_key_dim
DV = 8        # scalar_value_dim
DP = 4        # point_key_dim
DPV = 4       # point_value_dim
DEPTH = 2     # config.encoder_depth
EPS = 1e-8

assert DP == DPV, "fused point packing below assumes point_key_dim == point_value_dim"

DP3 = DP * 3
DPV3 = DPV * 3

NUM_LOGITS = 3.0                                  # scalar + point + pairwise
SCALAR_SCALE = (NUM_LOGITS * DK) ** -0.5
POINT_SCALE = (NUM_LOGITS * DP * (9.0 / 2.0)) ** -0.5
PAIR_SCALE = NUM_LOGITS ** -0.5

# fused QKV projection column layout: [qs | ks | vs | qp | kp | vp]
SC_W = HEADS * (DK + DK + DV)                     # 96  (scalar q/k/v)
PT_W = HEADS * (DP3 + DP3 + DPV3)                 # 144 (point q/k/v, (h d c) per head)
QKV_W = SC_W + PT_W                               # 240
SC_K_OFF = HEADS * DK
SC_V_OFF = 2 * HEADS * DK
PT_K_OFF = HEADS * DP3
PT_V_OFF = 2 * HEADS * DP3

# attention kernel output column layout: [scalar (h d) | points-global (h d c) | pairwise (h d)]
OUT_S = 0
OUT_P = HEADS * DV                                # 32
OUT_PW = HEADS * DV + HEADS * DPV3                # 80
OUT_W = HEADS * (DV + DPV3 + EDIM)                # 144

MASK_NEG = -1e30                                  # safe in f32 (dtype-aware if ever bf16)


# ----------------------------- Pallas kernels -----------------------------

def _matmul_kernel(x_ref, w_ref, o_ref):
    """Fused (bias-free) QKV projection: lane-dense 240-wide output."""
    o_ref[...] = jnp.dot(x_ref[...], w_ref[...], preferred_element_type=jnp.float32)


def _ipa_attn_kernel(sc_ref, pt_ref, pair_ref, maskb_ref, wpb_ref, bpb_ref, o_ref):
    """IPA attention for one batch element, all heads in one invocation.

    sc_ref   : (n, 96)   scalar [qs|ks|vs], heads-merged
    pt_ref   : (n, 144)  point  [qp|kp|vp], global frame, q/k already carry
                         sqrt(0.5 * softplus(point_weight) * point_scale)
    pair_ref : (n, n, EDIM) pairwise repr
    maskb_ref: (n, n)    additive mask bias (0 or MASK_NEG)
    wpb_ref  : (h, EDIM) pairwise-bias weight, pre-scaled by PAIR_SCALE
    bpb_ref  : (1, h)    pairwise-bias bias,   pre-scaled by PAIR_SCALE
    o_ref    : (n, 144)  [scalar | points-global | pairwise], heads-merged
    """
    pair = pair_ref[...]                          # resident once, reused by all heads
    maskb = maskb_ref[...]

    for hi in range(HEADS):                       # unrolled at trace time
        qs = sc_ref[:, hi * DK:(hi + 1) * DK]
        ks = sc_ref[:, SC_K_OFF + hi * DK:SC_K_OFF + (hi + 1) * DK]
        vs = sc_ref[:, SC_V_OFF + hi * DV:SC_V_OFF + (hi + 1) * DV]
        qp = pt_ref[:, hi * DP3:(hi + 1) * DP3]
        kp = pt_ref[:, PT_K_OFF + hi * DP3:PT_K_OFF + (hi + 1) * DP3]
        vp = pt_ref[:, PT_V_OFF + hi * DPV3:PT_V_OFF + (hi + 1) * DPV3]

        # scalar logits
        logits = jnp.dot(qs, ks.T, preferred_element_type=jnp.float32) * SCALAR_SCALE

        # point logits: -|q - k|^2 (scale already folded into coordinates)
        q_sq = jnp.sum(qp * qp, axis=-1, keepdims=True)          # (n, 1)
        k_sq = jnp.sum(kp * kp, axis=-1, keepdims=True)          # (n, 1)
        logits = logits - (q_sq + k_sq.T) + 2.0 * jnp.dot(
            qp, kp.T, preferred_element_type=jnp.float32)

        # pairwise bias, computed in-kernel from the resident pair block
        w_h = wpb_ref[hi:hi + 1, :]                              # (1, EDIM)
        bias = jnp.sum(pair * w_h, axis=-1) + bpb_ref[:, hi:hi + 1]
        logits = logits + bias + maskb                           # mask folded as add

        # softmax over keys (reciprocal on the EUP slot)
        m = jnp.max(logits, axis=-1, keepdims=True)
        e = jnp.exp(logits - m)
        attn = e * pl.reciprocal(jnp.sum(e, axis=-1, keepdims=True), approx=True)

        # aggregate scalar values, global-frame point values, pairwise repr.
        # (stores hit the VMEM output block; the HBM writeback is one dense
        #  144-wide DMA per batch.)
        o_ref[:, OUT_S + hi * DV:OUT_S + (hi + 1) * DV] = jnp.dot(
            attn, vs, preferred_element_type=jnp.float32)
        o_ref[:, OUT_P + hi * DPV3:OUT_P + (hi + 1) * DPV3] = jnp.dot(
            attn, vp, preferred_element_type=jnp.float32)
        o_ref[:, OUT_PW + hi * EDIM:OUT_PW + (hi + 1) * EDIM] = jnp.sum(
            attn[:, :, None] * pair, axis=1)


def _block_tail_kernel(x_ref, cat_ref, wo_ref, bo_ref,
                       g1_ref, be1_ref, w1_ref, b1_ref, w2_ref, b2_ref,
                       w3_ref, b3_ref, g2_ref, be2_ref, o_ref):
    """out-proj + residual + LN + FF(Lin-ReLU-Lin-ReLU-Lin) + residual + LN."""

    def _ln(v, g, b):
        mean = jnp.mean(v, axis=-1, keepdims=True)
        c = v - mean
        var = jnp.mean(c * c, axis=-1, keepdims=True)
        return c * jax.lax.rsqrt(var + 1e-5) * g + b

    attn_out = jnp.dot(cat_ref[...], wo_ref[...],
                       preferred_element_type=jnp.float32) + bo_ref[...]
    x = x_ref[...] + attn_out
    x = _ln(x, g1_ref[...], be1_ref[...])

    h = jnp.maximum(jnp.dot(x, w1_ref[...],
                            preferred_element_type=jnp.float32) + b1_ref[...], 0.0)
    h = jnp.maximum(jnp.dot(h, w2_ref[...],
                            preferred_element_type=jnp.float32) + b2_ref[...], 0.0)
    ff = jnp.dot(h, w3_ref[...], preferred_element_type=jnp.float32) + b3_ref[...]

    x = x + ff
    o_ref[...] = _ln(x, g2_ref[...], be2_ref[...])


# ------------------------------ model glue --------------------------------

def ipa_attention(nodes, pairwise, translations, rotations, maskb, p):
    b, n, d = nodes.shape
    h = HEADS
    x2 = nodes.reshape(b * n, d)

    # (1) single fused QKV projection (all six projections are bias-free)
    qkv = pl.pallas_call(
        _matmul_kernel,
        out_shape=jax.ShapeDtypeStruct((b * n, QKV_W), jnp.float32),
    )(x2, p['w_qkv'])

    scalars = qkv[:, :SC_W].reshape(b, n, SC_W)                 # [qs|ks|vs]

    # points: rotate q/k/v into the global frame in one einsum, then fold the
    # per-head softplus(point_weight) * point_scale factor into q and k coords.
    pts = qkv[:, SC_W:].reshape(b, n, 3, h, DP, 3)              # x in {q,k,v}
    t6 = translations[:, :, None, None, None, :]                # (b,n,1,1,1,3)
    pts_g = jnp.einsum('bnxhdc,bncr->bnxhdr', pts, rotations) + t6

    pw = jax.nn.softplus(p['point_weights'])                    # (h,)
    s = jnp.sqrt(0.5 * pw * POINT_SCALE)
    scale_x = jnp.stack([s, s, jnp.ones_like(s)], axis=0)       # q,k scaled; v not
    pts_g = pts_g * scale_x[None, None, :, :, None, None]
    points = pts_g.reshape(b, n, PT_W)                          # (b, n, 144)

    wpb_t = p['w_pb'].T * PAIR_SCALE                            # (h, EDIM)
    bpb = (p['b_pb'] * PAIR_SCALE).reshape(1, h)                # (1, h)

    # (2) per-batch attention, all heads in one kernel, lane-dense (n, 144) output
    out = pl.pallas_call(
        _ipa_attn_kernel,
        out_shape=jax.ShapeDtypeStruct((b, n, OUT_W), jnp.float32),
        grid=(b,),
        in_specs=[
            pl.BlockSpec((None, n, SC_W), lambda bi: (bi, 0, 0)),
            pl.BlockSpec((None, n, PT_W), lambda bi: (bi, 0, 0)),
            pl.BlockSpec((None, n, n, EDIM), lambda bi: (bi, 0, 0, 0)),
            pl.BlockSpec((None, n, n), lambda bi: (bi, 0, 0)),
            pl.BlockSpec((h, EDIM), lambda bi: (0, 0)),
            pl.BlockSpec((1, h), lambda bi: (0, 0)),
        ],
        out_specs=pl.BlockSpec((None, n, OUT_W), lambda bi: (bi, 0, 0)),
        compiler_params=pltpu.CompilerParams(
            dimension_semantics=("parallel",)),
    )(scalars, points, pairwise, maskb, wpb_t, bpb)

    # rotate aggregated points back into the local frame, compute norms
    rs = out[:, :, OUT_S:OUT_S + h * DV]                        # (b, n, h*DV)
    opg = out[:, :, OUT_P:OUT_P + h * DPV3].reshape(b, n, h, DPV, 3)
    rpw = out[:, :, OUT_PW:OUT_PW + h * EDIM]                   # (b, n, h*EDIM)

    t5 = translations[:, :, None, None, :]                      # (b,n,1,1,3)
    pts_local = jnp.einsum('bnhdc,bnrc->bnhdr', opg - t5, rotations)   # R^T applied
    norms = jnp.sqrt(jnp.sum(pts_local * pts_local, axis=-1) + EPS)    # (b,n,h,DPV)

    # torch.cat((scalar, points, norms, pairwise), dim=-1), heads-merged
    cat = jnp.concatenate(
        [rs,
         pts_local.reshape(b, n, h * DPV * 3),
         norms.reshape(b, n, h * DPV),
         rpw], axis=-1)                                         # (b, n, 160)
    return cat


def ipa_block(nodes, pairwise, translations, rotations, maskb, p):
    """IPABlock with post_norm=True: x = LN(attn(x)+x); x = LN(ff(x)+x)."""
    b, n, d = nodes.shape
    cat = ipa_attention(nodes, pairwise, translations, rotations, maskb, p)

    # (3) fused out-projection + residual + LN + FF + residual + LN
    out = pl.pallas_call(
        _block_tail_kernel,
        out_shape=jax.ShapeDtypeStruct((b * n, d), jnp.float32),
    )(nodes.reshape(b * n, d), cat.reshape(b * n, cat.shape[-1]),
      p['w_out'], p['b_out'].reshape(1, d),
      p['ln_attn_g'].reshape(1, d), p['ln_attn_b'].reshape(1, d),
      p['ff_w1'], p['ff_b1'].reshape(1, d),
      p['ff_w2'], p['ff_b2'].reshape(1, d),
      p['ff_w3'], p['ff_b3'].reshape(1, d),
      p['ln_ff_g'].reshape(1, d), p['ln_ff_b'].reshape(1, d))
    return out.reshape(b, n, d)


def encoder_forward(params, nodes, edges, translations, rotations,
                    internal_edge_mask):
    # pre-fold the pairwise mask into an additive bias, once for all layers
    maskb = jnp.where(internal_edge_mask, 0.0, MASK_NEG).astype(jnp.float32)
    edges = edges.astype(jnp.float32)
    nodes = nodes.astype(jnp.float32)
    for p in params:
        nodes = ipa_block(nodes, edges, translations, rotations, maskb, p)
    return nodes


# ------------------------------ parameters --------------------------------

def init_layer_params(key):
    ks = jax.random.split(key, 11)

    def w(k, shape, scale=0.02):
        return jax.random.normal(k, shape, jnp.float32) * scale

    # fused QKV weight: [qs | ks | vs | qp | kp | vp] along the output dim
    w_qkv = jnp.concatenate([
        w(ks[0], (DIM, HEADS * DK)),       # to_scalar_q
        w(ks[1], (DIM, HEADS * DK)),       # to_scalar_k
        w(ks[2], (DIM, HEADS * DV)),       # to_scalar_v
        w(ks[3], (DIM, HEADS * DP * 3)),   # to_point_q  (h d c)
        w(ks[4], (DIM, HEADS * DP * 3)),   # to_point_k
        w(ks[5], (DIM, HEADS * DPV * 3)),  # to_point_v
    ], axis=1)

    out_in = HEADS * (DV + EDIM + DPV * 4)
    return dict(
        w_qkv=w_qkv,
        point_weights=jnp.full((HEADS,), float(jnp.log(jnp.expm1(1.0))),
                               jnp.float32),
        w_pb=w(ks[6], (EDIM, HEADS)),
        b_pb=jnp.zeros((HEADS,), jnp.float32),
        w_out=w(ks[7], (out_in, DIM)),
        b_out=jnp.zeros((DIM,), jnp.float32),
        ln_attn_g=jnp.ones((DIM,), jnp.float32),
        ln_attn_b=jnp.zeros((DIM,), jnp.float32),
        ff_w1=w(ks[8], (DIM, DIM)),
        ff_b1=jnp.zeros((DIM,), jnp.float32),
        ff_w2=w(ks[9], (DIM, DIM)),
        ff_b2=jnp.zeros((DIM,), jnp.float32),
        ff_w3=w(ks[10], (DIM, DIM)),
        ff_b3=jnp.zeros((DIM,), jnp.float32),
        ln_ff_g=jnp.ones((DIM,), jnp.float32),
        ln_ff_b=jnp.zeros((DIM,), jnp.float32),
    )


if __name__ == "__main__":
    key = jax.random.PRNGKey(0)
    kn, ke, kt, kr, km, kp = jax.random.split(key, 6)
    B, N = 2, 8

    nodes = jax.random.normal(kn, (B, N, DIM), jnp.float32)
    edges = jax.random.normal(ke, (B, N, N, EDIM), jnp.float32)
    translations = jax.random.normal(kt, (B, N, 3), jnp.float32)

    raw = jax.random.normal(kr, (B, N, 3, 3), jnp.float32)
    rotations, _ = jnp.linalg.qr(raw)          # orthonormal local frames

    internal_edge_mask = jax.random.uniform(km, (B, N, N)) > 0.3
    internal_edge_mask = internal_edge_mask | jnp.eye(N, dtype=bool)[None]

    params = [init_layer_params(k) for k in jax.random.split(kp, DEPTH)]

    fwd = jax.jit(encoder_forward)
    out = fwd(params, nodes, edges, translations, rotations, internal_edge_mask)
    out = jax.block_until_ready(out)
    assert out.shape == (B, N, DIM)
    assert bool(jnp.all(jnp.isfinite(out)))
    print("KERNEL_OK")
</pallas_src>

<mosaic_0001>
module attributes {stable_mosaic.version = 11 : i64} {
  func.func @_matmul_kernel(%arg0: memref<16x32xf32, #tpu.memory_space<vmem>>, %arg1: memref<32x240xf32, #tpu.memory_space<vmem>>, %arg2: memref<16x240xf32, #tpu.memory_space<vmem>>) attributes {dimension_semantics = [], scalar_prefetch = 0 : i64, scratch_operands = 0 : i64, tpu.core_type = #tpu.core_type<tc>} {
    %c0 = arith.constant 0 : index
    %c0_0 = arith.constant 0 : index
    %0 = vector.load %arg0[%c0, %c0_0] : memref<16x32xf32, #tpu.memory_space<vmem>>, vector<16x32xf32>
    %c0_1 = arith.constant 0 : index
    %c0_2 = arith.constant 0 : index
    %1 = vector.load %arg1[%c0_1, %c0_2] : memref<32x240xf32, #tpu.memory_space<vmem>>, vector<32x240xf32>
    %cst = arith.constant dense<0.000000e+00> : vector<16x240xf32>
    %2 = tpu.matmul %0, %1, %cst {dimension_numbers = #tpu.dot_dimension_numbers<[1], [0], [0], [1], [0, 0, 1, 1], [], []>} : vector<16x32xf32>, vector<32x240xf32>, vector<16x240xf32> -> vector<16x240xf32>
    %c0_3 = arith.constant 0 : index
    %c0_4 = arith.constant 0 : index
    %3 = vector.load %arg2[%c0_3, %c0_4] : memref<16x240xf32, #tpu.memory_space<vmem>>, vector<16x240xf32>
    tpu.vector_store %arg2[%c0_3, %c0_4], %2 {strides = array<i32>} : memref<16x240xf32, #tpu.memory_space<vmem>>, vector<16x240xf32>,
    return
  }
}

module attributes {stable_mosaic.version = 11 : i64} {
  func.func @_ipa_attn_kernel(%arg0: i32, %arg1: memref<1x8x96xf32, #tpu.memory_space<vmem>>, %arg2: memref<1x8x144xf32, #tpu.memory_space<vmem>>, %arg3: memref<1x8x8x16xf32, #tpu.memory_space<vmem>>, %arg4: memref<1x8x8xf32, #tpu.memory_space<vmem>>, %arg5: memref<4x16xf32, #tpu.memory_space<vmem>>, %arg6: memref<1x4xf32, #tpu.memory_space<vmem>>, %arg7: memref<1x8x144xf32, #tpu.memory_space<vmem>>) attributes {dimension_semantics = [#tpu.dimension_semantics<parallel>], iteration_bounds = array<i64: 2>, scalar_prefetch = 0 : i64, scratch_operands = 0 : i64, tpu.core_type = #tpu.core_type<tc>, window_params = [{transform_indices = @transform_0, window_bounds = array<i64: 1, 8, 96>}, {transform_indices = @transform_1, window_bounds = array<i64: 1, 8, 144>}, {transform_indices = @transform_2, window_bounds = array<i64: 1, 8, 8, 16>}, {transform_indices = @transform_3, window_bounds = array<i64: 1, 8, 8>}, {pipeline_mode = #tpu.pipeline_mode<synchronous>, transform_indices = @transform_4, window_bounds = array<i64: 4, 16>}, {pipeline_mode = #tpu.pipeline_mode<synchronous>, transform_indices = @transform_5, window_bounds = array<i64: 1, 4>}, {transform_indices = @transform_6, window_bounds = array<i64: 1, 8, 144>}]} {
    %c0 = arith.constant 0 : index
    %c0_0 = arith.constant 0 : index
    %c0_1 = arith.constant 0 : index
    %c0_2 = arith.constant 0 : index
    %0 = vector.load %arg3[%c0, %c0_0, %c0_1, %c0_2] : memref<1x8x8x16xf32, #tpu.memory_space<vmem>>, vector<1x8x8x16xf32>
    %1 = vector.shape_cast %0 : vector<1x8x8x16xf32> to vector<8x8x16xf32>
    %c0_3 = arith.constant 0 : index
    %c0_4 = arith.constant 0 : index
    %c0_5 = arith.constant 0 : index
    %2 = vector.load %arg4[%c0_3, %c0_4, %c0_5] : memref<1x8x8xf32, #tpu.memory_space<vmem>>, vector<1x8x8xf32>
    %3 = vector.shape_cast %2 : vector<1x8x8xf32> to vector<8x8xf32>
    %c0_6 = arith.constant 0 : index
    %c0_7 = arith.constant 0 : index
    %c0_8 = arith.constant 0 : index
    %4 = vector.load %arg1[%c0_6, %c0_7, %c0_8] : memref<1x8x96xf32, #tpu.memory_space<vmem>>, vector<1x8x8xf32>
    %5 = vector.shape_cast %4 : vector<1x8x8xf32> to vector<8x8xf32>
    %c0_9 = arith.constant 0 : index
    %c0_10 = arith.constant 0 : index
    %c32 = arith.constant 32 : index
    %6 = vector.load %arg1[%c0_9, %c0_10, %c32] : memref<1x8x96xf32, #tpu.memory_space<vmem>>, vector<1x8x8xf32>
    %7 = vector.shape_cast %6 : vector<1x8x8xf32> to vector<8x8xf32>
    %c0_11 = arith.constant 0 : index
    %c0_12 = arith.constant 0 : index
    %c64 = arith.constant 64 : index
    %8 = vector.load %arg1[%c0_11, %c0_12, %c64] : memref<1x8x96xf32, #tpu.memory_space<vmem>>, vector<1x8x8xf32>
    %9 = vector.shape_cast %8 : vector<1x8x8xf32> to vector<8x8xf32>
    %c0_13 = arith.constant 0 : index
    %c0_14 = arith.constant 0 : index
    %c0_15 = arith.constant 0 : index
    %10 = vector.load %arg2[%c0_13, %c0_14, %c0_15] : memref<1x8x144xf32, #tpu.memory_space<vmem>>, vector<1x8x12xf32>
    %11 = vector.shape_cast %10 : vector<1x8x12xf32> to vector<8x12xf32>
    %c0_16 = arith.constant 0 : index
    %c0_17 = arith.constant 0 : index
    %c48 = arith.constant 48 : index
    %12 = vector.load %arg2[%c0_16, %c0_17, %c48] : memref<1x8x144xf32, #tpu.memory_space<vmem>>, vector<1x8x12xf32>
    %13 = vector.shape_cast %12 : vector<1x8x12xf32> to vector<8x12xf32>
    %c0_18 = arith.constant 0 : index
    %c0_19 = arith.constant 0 : index
    %c96 = arith.constant 96 : index
    %14 = vector.load %arg2[%c0_18, %c0_19, %c96] : memref<1x8x144xf32, #tpu.memory_space<vmem>>, vector<1x8x12xf32>
    %15 = vector.shape_cast %14 : vector<1x8x12xf32> to vector<8x12xf32>
    %16 = tpu.transpose %7, [1, 0] : vector<8x8xf32> -> vector<8x8xf32>
    %cst = arith.constant dense<0.000000e+00> : vector<8x8xf32>
    %17 = tpu.matmul %5, %16, %cst {dimension_numbers = #tpu.dot_dimension_numbers<[1], [0], [0], [1], [0, 0, 1, 1], [], []>} : vector<8x8xf32>, vector<8x8xf32>, vector<8x8xf32> -> vector<8x8xf32>
    %cst_20 = arith.constant 0.204124153 : f32
    %18 = vector.broadcast %cst_20 : f32 to vector<8x8xf32>
    %19 = arith.mulf %17, %18 : vector<8x8xf32>
    %20 = arith.mulf %11, %11 : vector<8x12xf32>
    %cst_21 = arith.constant dense<0.000000e+00> : vector<8xf32>
    %21 = vector.multi_reduction <add>, %20, %cst_21 [1] : vector<8x12xf32> to vector<8xf32>
    %22 = vector.shape_cast %21 : vector<8xf32> to vector<8x1xf32>
    %23 = arith.mulf %13, %13 : vector<8x12xf32>
    %cst_22 = arith.constant dense<0.000000e+00> : vector<8xf32>
    %24 = vector.multi_reduction <add>, %23, %cst_22 [1] : vector<8x12xf32> to vector<8xf32>
    %25 = vector.shape_cast %24 : vector<8xf32> to vector<8x1xf32>
    %26 = tpu.transpose %25, [1, 0] : vector<8x1xf32> -> vector<1x8xf32>
    %27 = vector.broadcast %22 : vector<8x1xf32> to vector<8x8xf32>
    %28 = vector.broadcast %26 : vector<1x8xf32> to vector<8x8xf32>
    %29 = arith.addf %27, %28 : vector<8x8xf32>
    %30 = arith.subf %19, %29 : vector<8x8xf32>
    %31 = tpu.transpose %13, [1, 0] : vector<8x12xf32> -> vector<12x8xf32>
    %cst_23 = arith.constant dense<0.000000e+00> : vector<8x8xf32>
    %32 = tpu.matmul %11, %31, %cst_23 {dimension_numbers = #tpu.dot_dimension_numbers<[1], [0], [0], [1], [0, 0, 1, 1], [], []>} : vector<8x12xf32>, vector<12x8xf32>, vector<8x8xf32> -> vector<8x8xf32>
    %cst_24 = arith.constant 2.000000e+00 : f32
    %33 = vector.broadcast %cst_24 : f32 to vector<8x8xf32>
    %34 = arith.mulf %33, %32 : vector<8x8xf32>
    %35 = arith.addf %30, %34 : vector<8x8xf32>
    %c0_25 = arith.constant 0 : index
    %c0_26 = arith.constant 0 : index
    %36 = vector.load %arg5[%c0_25, %c0_26] : memref<4x16xf32, #tpu.memory_space<vmem>>, vector<1x16xf32>
    %37 = vector.shape_cast %36 : vector<1x16xf32> to vector<1x1x16xf32>
    %38 = vector.broadcast %37 : vector<1x1x16xf32> to vector<8x8x16xf32>
    %39 = arith.mulf %1, %38 : vector<8x8x16xf32>
    %cst_27 = arith.constant dense<0.000000e+00> : vector<8x8xf32>
    %40 = vector.multi_reduction <add>, %39, %cst_27 [2] : vector<8x8x16xf32> to vector<8x8xf32>
    %c0_28 = arith.constant 0 : index
    %c0_29 = arith.constant 0 : index
    %41 = vector.load %arg6[%c0_28, %c0_29] : memref<1x4xf32, #tpu.memory_space<vmem>>, vector<1x1xf32>
    %42 = vector.broadcast %41 : vector<1x1xf32> to vector<8x8xf32>
    %43 = arith.addf %40, %42 : vector<8x8xf32>
    %44 = arith.addf %35, %43 : vector<8x8xf32>
    %45 = arith.addf %44, %3 : vector<8x8xf32>
    %cst_30 = arith.constant dense<0xFF800000> : vector<8xf32>
    %46 = vector.multi_reduction <maximumf>, %45, %cst_30 [1] : vector<8x8xf32> to vector<8xf32>
    %47 = vector.shape_cast %46 : vector<8xf32> to vector<8x1xf32>
    %48 = vector.broadcast %47 : vector<8x1xf32> to vector<8x8xf32>
    %49 = arith.subf %45, %48 : vector<8x8xf32>
    %50 = math.exp %49 : vector<8x8xf32>
    %cst_31 = arith.constant dense<0.000000e+00> : vector<8xf32>
    %51 = vector.multi_reduction <add>, %50, %cst_31 [1] : vector<8x8xf32> to vector<8xf32>
    %52 = vector.shape_cast %51 : vector<8xf32> to vector<8x1xf32>
    %53 = tpu.reciprocal %52 {approx = true} : vector<8x1xf32> -> vector<8x1xf32>
    %54 = vector.broadcast %53 : vector<8x1xf32> to vector<8x8xf32>
    %55 = arith.mulf %50, %54 : vector<8x8xf32>
    %cst_32 = arith.constant dense<0.000000e+00> : vector<8x8xf32>
    %56 = tpu.matmul %55, %9, %cst_32 {dimension_numbers = #tpu.dot_dimension_numbers<[1], [0], [0], [1], [0, 0, 1, 1], [], []>} : vector<8x8xf32>, vector<8x8xf32>, vector<8x8xf32> -> vector<8x8xf32>
    %c0_33 = arith.constant 0 : index
    %c0_34 = arith.constant 0 : index
    %c0_35 = arith.constant 0 : index
    %57 = vector.load %arg7[%c0_33, %c0_34, %c0_35] : memref<1x8x144xf32, #tpu.memory_space<vmem>>, vector<1x8x8xf32>
    %58 = vector.shape_cast %57 : vector<1x8x8xf32> to vector<8x8xf32>
    %59 = vector.shape_cast %56 : vector<8x8xf32> to vector<1x8x8xf32>
    tpu.vector_store %arg7[%c0_33, %c0_34, %c0_35], %59 {strides = array<i32>} : memref<1x8x144xf32, #tpu.memory_space<vmem>>, vector<1x8x8xf32>,
    %cst_36 = arith.constant dense<0.000000e+00> : vector<8x12xf32>
    %60 = tpu.matmul %55, %15, %cst_36 {dimension_numbers = #tpu.dot_dimension_numbers<[1], [0], [0], [1], [0, 0, 1, 1], [], []>} : vector<8x8xf32>, vector<8x12xf32>, vector<8x12xf32> -> vector<8x12xf32>
    %c0_37 = arith.constant 0 : index
    %c0_38 = arith.constant 0 : index
    %c32_39 = arith.constant 32 : index
    %61 = vector.load %arg7[%c0_37, %c0_38, %c32_39] : memref<1x8x144xf32, #tpu.memory_space<vmem>>, vector<1x8x12xf32>
    %62 = vector.shape_cast %61 : vector<1x8x12xf32> to vector<8x12xf32>
    %63 = vector.shape_cast %60 : vector<8x12xf32> to vector<1x8x12xf32>
    tpu.vector_store %arg7[%c0_37, %c0_38, %c32_39], %63 {strides = array<i32>} : memref<1x8x144xf32, #tpu.memory_space<vmem>>, vector<1x8x12xf32>,
    %64 = vector.shape_cast %55 : vector<8x8xf32> to vector<8x8x1xf32>
    %65 = vector.broadcast %64 : vector<8x8x1xf32> to vector<8x8x16xf32>
    %66 = arith.mulf %65, %1 : vector<8x8x16xf32>
    %cst_40 = arith.constant dense<0.000000e+00> : vector<8x16xf32>
    %67 = vector.multi_reduction <add>, %66, %cst_40 [1] : vector<8x8x16xf32> to vector<8x16xf32>
    %c0_41 = arith.constant 0 : index
    %c0_42 = arith.constant 0 : index
    %c80 = arith.constant 80 : index
    %68 = vector.load %arg7[%c0_41, %c0_42, %c80] : memref<1x8x144xf32, #tpu.memory_space<vmem>>, vector<1x8x16xf32>
    %69 = vector.shape_cast %68 : vector<1x8x16xf32> to vector<8x16xf32>
    %70 = vector.shape_cast %67 : vector<8x16xf32> to vector<1x8x16xf32>
    tpu.vector_store %arg7[%c0_41, %c0_42, %c80], %70 {strides = array<i32>} : memref<1x8x144xf32, #tpu.memory_space<vmem>>, vector<1x8x16xf32>,
    %c0_43 = arith.constant 0 : index
    %c0_44 = arith.constant 0 : index
    %c8 = arith.constant 8 : index
    %71 = vector.load %arg1[%c0_43, %c0_44, %c8] : memref<1x8x96xf32, #tpu.memory_space<vmem>>, vector<1x8x8xf32>
    %72 = vector.shape_cast %71 : vector<1x8x8xf32> to vector<8x8xf32>
    %c0_45 = arith.constant 0 : index
    %c0_46 = arith.constant 0 : index
    %c40 = arith.constant 40 : index
    %73 = vector.load %arg1[%c0_45, %c0_46, %c40] : memref<1x8x96xf32, #tpu.memory_space<vmem>>, vector<1x8x8xf32>
    %74 = vector.shape_cast %73 : vector<1x8x8xf32> to vector<8x8xf32>
    %c0_47 = arith.constant 0 : index
    %c0_48 = arith.constant 0 : index
    %c72 = arith.constant 72 : index
    %75 = vector.load %arg1[%c0_47, %c0_48, %c72] : memref<1x8x96xf32, #tpu.memory_space<vmem>>, vector<1x8x8xf32>
    %76 = vector.shape_cast %75 : vector<1x8x8xf32> to vector<8x8xf32>
    %c0_49 = arith.constant 0 : index
    %c0_50 = arith.constant 0 : index
    %c12 = arith.constant 12 : index
    %77 = vector.load %arg2[%c0_49, %c0_50, %c12] : memref<1x8x144xf32, #tpu.memory_space<vmem>>, vector<1x8x12xf32>
    %78 = vector.shape_cast %77 : vector<1x8x12xf32> to vector<8x12xf32>
    %c0_51 = arith.constant 0 : index
    %c0_52 = arith.constant 0 : index
    %c60 = arith.constant 60 : index
    %79 = vector.load %arg2[%c0_51, %c0_52, %c60] : memref<1x8x144xf32, #tpu.memory_space<vmem>>, vector<1x8x12xf32>
    %80 = vector.shape_cast %79 : vector<1x8x12xf32> to vector<8x12xf32>
    %c0_53 = arith.constant 0 : index
    %c0_54 = arith.constant 0 : index
    %c108 = arith.constant 108 : index
    %81 = vector.load %arg2[%c0_53, %c0_54, %c108] : memref<1x8x144xf32, #tpu.memory_space<vmem>>, vector<1x8x12xf32>
    %82 = vector.shape_cast %81 : vector<1x8x12xf32> to vector<8x12xf32>
    %83 = tpu.transpose %74, [1, 0] : vector<8x8xf32> -> vector<8x8xf32>
    %cst_55 = arith.constant dense<0.000000e+00> : vector<8x8xf32>
    %84 = tpu.matmul %72, %83, %cst_55 {dimension_numbers = #tpu.dot_dimension_numbers<[1], [0], [0], [1], [0, 0, 1, 1], [], []>} : vector<8x8xf32>, vector<8x8xf32>, vector<8x8xf32> -> vector<8x8xf32>
    %cst_56 = arith.constant 0.204124153 : f32
    %85 = vector.broadcast %cst_56 : f32 to vector<8x8xf32>
    %86 = arith.mulf %84, %85 : vector<8x8xf32>
    %87 = arith.mulf %78, %78 : vector<8x12xf32>
    %cst_57 = arith.constant dense<0.000000e+00> : vector<8xf32>
    %88 = vector.multi_reduction <add>, %87, %cst_57 [1] : vector<8x12xf32> to vector<8xf32>
    %89 = vector.shape_cast %88 : vector<8xf32> to vector<8x1xf32>
    %90 = arith.mulf %80, %80 : vector<8x12xf32>
    %cst_58 = arith.constant dense<0.000000e+00> : vector<8xf32>
    %91 = vector.multi_reduction <add>, %90, %cst_58 [1] : vector<8x12xf32> to vector<8xf32>
    %92 = vector.shape_cast %91 : vector<8xf32> to vector<8x1xf32>
    %93 = tpu.transpose %92, [1, 0] : vector<8x1xf32> -> vector<1x8xf32>
    %94 = vector.broadcast %89 : vector<8x1xf32> to vector<8x8xf32>
    %95 = vector.broadcast %93 : vector<1x8xf32> to vector<8x8xf32>
    %96 = arith.addf %94, %95 : vector<8x8xf32>
    %97 = arith.subf %86, %96 : vector<8x8xf32>
    %98 = tpu.transpose %80, [1, 0] : vector<8x12xf32> -> vector<12x8xf32>
    %cst_59 = arith.constant dense<0.000000e+00> : vector<8x8xf32>
    %99 = tpu.matmul %78, %98, %cst_59 {dimension_numbers = #tpu.dot_dimension_numbers<[1], [0], [0], [1], [0, 0, 1, 1], [], []>} : vector<8x12xf32>, vector<12x8xf32>, vector<8x8xf32> -> vector<8x8xf32>
    %cst_60 = arith.constant 2.000000e+00 : f32
    %100 = vector.broadcast %cst_60 : f32 to vector<8x8xf32>
    %101 = arith.mulf %100, %99 : vector<8x8xf32>
    %102 = arith.addf %97, %101 : vector<8x8xf32>
    %c1 = arith.constant 1 : index
    %c0_61 = arith.constant 0 : index
    %103 = vector.load %arg5[%c1, %c0_61] : memref<4x16xf32, #tpu.memory_space<vmem>>, vector<1x16xf32>
    %104 = vector.shape_cast %103 : vector<1x16xf32> to vector<1x1x16xf32>
    %105 = vector.broadcast %104 : vector<1x1x16xf32> to vector<8x8x16xf32>
    %106 = arith.mulf %1, %105 : vector<8x8x16xf32>
    %cst_62 = arith.constant dense<0.000000e+00> : vector<8x8xf32>
    %107 = vector.multi_reduction <add>, %106, %cst_62 [2] : vector<8x8x16xf32> to vector<8x8xf32>
    %c0_63 = arith.constant 0 : index
    %c1_64 = arith.constant 1 : index
    %108 = vector.load %arg6[%c0_63, %c1_64] : memref<1x4xf32, #tpu.memory_space<vmem>>, vector<1x1xf32>
    %109 = vector.broadcast %108 : vector<1x1xf32> to vector<8x8xf32>
    %110 = arith.addf %107, %109 : vector<8x8xf32>
    %111 = arith.addf %102, %110 : vector<8x8xf32>
    %112 = arith.addf %111, %3 : vector<8x8xf32>
    %cst_65 = arith.constant dense<0xFF800000> : vector<8xf32>
    %113 = vector.multi_reduction <maximumf>, %112, %cst_65 [1] : vector<8x8xf32> to vector<8xf32>
    %114 = vector.shape_cast %113 : vector<8xf32> to vector<8x1xf32>
    %115 = vector.broadcast %114 : vector<8x1xf32> to vector<8x8xf32>
    %116 = arith.subf %112, %115 : vector<8x8xf32>
    %117 = math.exp %116 : vector<8x8xf32>
    %cst_66 = arith.constant dense<0.000000e+00> : vector<8xf32>
    %118 = vector.multi_reduction <add>, %117, %cst_66 [1] : vector<8x8xf32> to vector<8xf32>
    %119 = vector.shape_cast %118 : vector<8xf32> to vector<8x1xf32>
    %120 = tpu.reciprocal %119 {approx = true} : vector<8x1xf32> -> vector<8x1xf32>
    %121 = vector.broadcast %120 : vector<8x1xf32> to vector<8x8xf32>
    %122 = arith.mulf %117, %121 : vector<8x8xf32>
    %cst_67 = arith.constant dense<0.000000e+00> : vector<8x8xf32>
    %123 = tpu.matmul %122, %76, %cst_67 {dimension_numbers = #tpu.dot_dimension_numbers<[1], [0], [0], [1], [0, 0, 1, 1], [], []>} : vector<8x8xf32>, vector<8x8xf32>, vector<8x8xf32> -> vector<8x8xf32>
    %c0_68 = arith.constant 0 : index
    %c0_69 = arith.constant 0 : index
    %c8_70 = arith.constant 8 : index
    %124 = vector.load %arg7[%c0_68, %c0_69, %c8_70] : memref<1x8x144xf32, #tpu.memory_space<vmem>>, vector<1x8x8xf32>
    %125 = vector.shape_cast %124 : vector<1x8x8xf32> to vector<8x8xf32>
    %126 = vector.shape_cast %123 : vector<8x8xf32> to vector<1x8x8xf32>
    tpu.vector_store %arg7[%c0_68, %c0_69, %c8_70], %126 {strides = array<i32>} : memref<1x8x144xf32, #tpu.memory_space<vmem>>, vector<1x8x8xf32>,
    %cst_71 = arith.constant dense<0.000000e+00> : vector<8x12xf32>
    %127 = tpu.matmul %122, %82, %cst_71 {dimension_numbers = #tpu.dot_dimension_numbers<[1], [0], [0], [1], [0, 0, 1, 1], [], []>} : vector<8x8xf32>, vector<8x12xf32>, vector<8x12xf32> -> vector<8x12xf32>
    %c0_72 = arith.constant 0 : index
    %c0_73 = arith.constant 0 : index
    %c44 = arith.constant 44 : index
    %128 = vector.load %arg7[%c0_72, %c0_73, %c44] : memref<1x8x144xf32, #tpu.memory_space<vmem>>, vector<1x8x12xf32>
    %129 = vector.shape_cast %128 : vector<1x8x12xf32> to vector<8x12xf32>
    %130 = vector.shape_cast %127 : vector<8x12xf32> to vector<1x8x12xf32>
    tpu.vector_store %arg7[%c0_72, %c0_73, %c44], %130 {strides = array<i32>} : memref<1x8x144xf32, #tpu.memory_space<vmem>>, vector<1x8x12xf32>,
    %131 = vector.shape_cast %122 : vector<8x8xf32> to vector<8x8x1xf32>
    %132 = vector.broadcast %131 : vector<8x8x1xf32> to vector<8x8x16xf32>
    %133 = arith.mulf %132, %1 : vector<8x8x16xf32>
    %cst_74 = arith.constant dense<0.000000e+00> : vector<8x16xf32>
    %134 = vector.multi_reduction <add>, %133, %cst_74 [1] : vector<8x8x16xf32> to vector<8x16xf32>
    %c0_75 = arith.constant 0 : index
    %c0_76 = arith.constant 0 : index
    %c96_77 = arith.constant 96 : index
    %135 = vector.load %arg7[%c0_75, %c0_76, %c96_77] : memref<1x8x144xf32, #tpu.memory_space<vmem>>, vector<1x8x16xf32>
    %136 = vector.shape_cast %135 : vector<1x8x16xf32> to vector<8x16xf32>
    %137 = vector.shape_cast %134 : vector<8x16xf32> to vector<1x8x16xf32>
    tpu.vector_store %arg7[%c0_75, %c0_76, %c96_77], %137 {strides = array<i32>} : memref<1x8x144xf32, #tpu.memory_space<vmem>>, vector<1x8x16xf32>,
    %c0_78 = arith.constant 0 : index
    %c0_79 = arith.constant 0 : index
    %c16 = arith.constant 16 : index
    %138 = vector.load %arg1[%c0_78, %c0_79, %c16] : memref<1x8x96xf32, #tpu.memory_space<vmem>>, vector<1x8x8xf32>
    %139 = vector.shape_cast %138 : vector<1x8x8xf32> to vector<8x8xf32>
    %c0_80 = arith.constant 0 : index
    %c0_81 = arith.constant 0 : index
    %c48_82 = arith.constant 48 : index
    %140 = vector.load %arg1[%c0_80, %c0_81, %c48_82] : memref<1x8x96xf32, #tpu.memory_space<vmem>>, vector<1x8x8xf32>
    %141 = vector.shape_cast %140 : vector<1x8x8xf32> to vector<8x8xf32>
    %c0_83 = arith.constant 0 : index
    %c0_84 = arith.constant 0 : index
    %c80_85 = arith.constant 80 : index
    %142 = vector.load %arg1[%c0_83, %c0_84, %c80_85] : memref<1x8x96xf32, #tpu.memory_space<vmem>>, vector<1x8x8xf32>
    %143 = vector.shape_cast %142 : vector<1x8x8xf32> to vector<8x8xf32>
    %c0_86 = arith.constant 0 : index
    %c0_87 = arith.constant 0 : index
    %c24 = arith.constant 24 : index
    %144 = vector.load %arg2[%c0_86, %c0_87, %c24] : memref<1x8x144xf32, #tpu.memory_space<vmem>>, vector<1x8x12xf32>
    %145 = vector.shape_cast %144 : vector<1x8x12xf32> to vector<8x12xf32>
    %c0_88 = arith.constant 0 : index
    %c0_89 = arith.constant 0 : index
    %c72_90 = arith.constant 72 : index
    %146 = vector.load %arg2[%c0_88, %c0_89, %c72_90] : memref<1x8x144xf32, #tpu.memory_space<vmem>>, vector<1x8x12xf32>
    %147 = vector.shape_cast %146 : vector<1x8x12xf32> to vector<8x12xf32>
    %c0_91 = arith.constant 0 : index
    %c0_92 = arith.constant 0 : index
    %c120 = arith.constant 120 : index
    %148 = vector.load %arg2[%c0_91, %c0_92, %c120] : memref<1x8x144xf32, #tpu.memory_space<vmem>>, vector<1x8x12xf32>
    %149 = vector.shape_cast %148 : vector<1x8x12xf32> to vector<8x12xf32>
    %150 = tpu.transpose %141, [1, 0] : vector<8x8xf32> -> vector<8x8xf32>
    %cst_93 = arith.constant dense<0.000000e+00> : vector<8x8xf32>
    %151 = tpu.matmul %139, %150, %cst_93 {dimension_numbers = #tpu.dot_dimension_numbers<[1], [0], [0], [1], [0, 0, 1, 1], [], []>} : vector<8x8xf32>, vector<8x8xf32>, vector<8x8xf32> -> vector<8x8xf32>
    %cst_94 = arith.constant 0.204124153 : f32
    %152 = vector.broadcast %cst_94 : f32 to vector<8x8xf32>
    %153 = arith.mulf %151, %152 : vector<8x8xf32>
    %154 = arith.mulf %145, %145 : vector<8x12xf32>
    %cst_95 = arith.constant dense<0.000000e+00> : vector<8xf32>
    %155 = vector.multi_reduction <add>, %154, %cst_95 [1] : vector<8x12xf32> to vector<8xf32>
    %156 = vector.shape_cast %155 : vector<8xf32> to vector<8x1xf32>
    %157 = arith.mulf %147, %147 : vector<8x12xf32>
    %cst_96 = arith.constant dense<0.000000e+00> : vector<8xf32>
    %158 = vector.multi_reduction <add>, %157, %cst_96 [1] : vector<8x12xf32> to vector<8xf32>
    %159 = vector.shape_cast %158 : vector<8xf32> to vector<8x1xf32>
    %160 = tpu.transpose %159, [1, 0] : vector<8x1xf32> -> vector<1x8xf32>
    %161 = vector.broadcast %156 : vector<8x1xf32> to vector<8x8xf32>
    %162 = vector.broadcast %160 : vector<1x8xf32> to vector<8x8xf32>
    %163 = arith.addf %161, %162 : vector<8x8xf32>
    %164 = arith.subf %153, %163 : vector<8x8xf32>
    %165 = tpu.transpose %147, [1, 0] : vector<8x12xf32> -> vector<12x8xf32>
    %cst_97 = arith.constant dense<0.000000e+00> : vector<8x8xf32>
    %166 = tpu.matmul %145, %165, %cst_97 {dimension_numbers = #tpu.dot_dimension_numbers<[1], [0], [0], [1], [0, 0, 1, 1], [], []>} : vector<8x12xf32>, vector<12x8xf32>, vector<8x8xf32> -> vector<8x8xf32>
    %cst_98 = arith.constant 2.000000e+00 : f32
    %167 = vector.broadcast %cst_98 : f32 to vector<8x8xf32>
    %168 = arith.mulf %167, %166 : vector<8x8xf32>
    %169 = arith.addf %164, %168 : vector<8x8xf32>
    %c2 = arith.constant 2 : index
    %c0_99 = arith.constant 0 : index
    %170 = vector.load %arg5[%c2, %c0_99] : memref<4x16xf32, #tpu.memory_space<vmem>>, vector<1x16xf32>
    %171 = vector.shape_cast %170 : vector<1x16xf32> to vector<1x1x16xf32>
    %172 = vector.broadcast %171 : vector<1x1x16xf32> to vector<8x8x16xf32>
    %173 = arith.mulf %1, %172 : vector<8x8x16xf32>
    %cst_100 = arith.constant dense<0.000000e+00> : vector<8x8xf32>
    %174 = vector.multi_reduction <add>, %173, %cst_100 [2] : vector<8x8x16xf32> to vector<8x8xf32>
    %c0_101 = arith.constant 0 : index
    %c2_102 = arith.constant 2 : index
    %175 = vector.load %arg6[%c0_101, %c2_102] : memref<1x4xf32, #tpu.memory_space<vmem>>, vector<1x1xf32>
    %176 = vector.broadcast %175 : vector<1x1xf32> to vector<8x8xf32>
    %177 = arith.addf %174, %176 : vector<8x8xf32>
    %178 = arith.addf %169, %177 : vector<8x8xf32>
    %179 = arith.addf %178, %3 : vector<8x8xf32>
    %cst_103 = arith.constant dense<0xFF800000> : vector<8xf32>
    %180 = vector.multi_reduction <maximumf>, %179, %cst_103 [1] : vector<8x8xf32> to vector<8xf32>
    %181 = vector.shape_cast %180 : vector<8xf32> to vector<8x1xf32>
    %182 = vector.broadcast %181 : vector<8x1xf32> to vector<8x8xf32>
    %183 = arith.subf %179, %182 : vector<8x8xf32>
    %184 = math.exp %183 : vector<8x8xf32>
    %cst_104 = arith.constant dense<0.000000e+00> : vector<8xf32>
    %185 = vector.multi_reduction <add>, %184, %cst_104 [1] : vector<8x8xf32> to vector<8xf32>
    %186 = vector.shape_cast %185 : vector<8xf32> to vector<8x1xf32>
    %187 = tpu.reciprocal %186 {approx = true} : vector<8x1xf32> -> vector<8x1xf32>
    %188 = vector.broadcast %187 : vector<8x1xf32> to vector<8x8xf32>
    %189 = arith.mulf %184, %188 : vector<8x8xf32>
    %cst_105 = arith.constant dense<0.000000e+00> : vector<8x8xf32>
    %190 = tpu.matmul %189, %143, %cst_105 {dimension_numbers = #tpu.dot_dimension_numbers<[1], [0], [0], [1], [0, 0, 1, 1], [], []>} : vector<8x8xf32>, vector<8x8xf32>, vector<8x8xf32> -> vector<8x8xf32>
    %c0_106 = arith.constant 0 : index
    %c0_107 = arith.constant 0 : index
    %c16_108 = arith.constant 16 : index
    %191 = vector.load %arg7[%c0_106, %c0_107, %c16_108] : memref<1x8x144xf32, #tpu.memory_space<vmem>>, vector<1x8x8xf32>
    %192 = vector.shape_cast %191 : vector<1x8x8xf32> to vector<8x8xf32>
    %193 = vector.shape_cast %190 : vector<8x8xf32> to vector<1x8x8xf32>
    tpu.vector_store %arg7[%c0_106, %c0_107, %c16_108], %193 {strides = array<i32>} : memref<1x8x144xf32, #tpu.memory_space<vmem>>, vector<1x8x8xf32>,
    %cst_109 = arith.constant dense<0.000000e+00> : vector<8x12xf32>
    %194 = tpu.matmul %189, %149, %cst_109 {dimension_numbers = #tpu.dot_dimension_numbers<[1], [0], [0], [1], [0, 0, 1, 1], [], []>} : vector<8x8xf32>, vector<8x12xf32>, vector<8x12xf32> -> vector<8x12xf32>
    %c0_110 = arith.constant 0 : index
    %c0_111 = arith.constant 0 : index
    %c56 = arith.constant 56 : index
    %195 = vector.load %arg7[%c0_110, %c0_111, %c56] : memref<1x8x144xf32, #tpu.memory_space<vmem>>, vector<1x8x12xf32>
    %196 = vector.shape_cast %195 : vector<1x8x12xf32> to vector<8x12xf32>
    %197 = vector.shape_cast %194 : vector<8x12xf32> to vector<1x8x12xf32>
    tpu.vector_store %arg7[%c0_110, %c0_111, %c56], %197 {strides = array<i32>} : memref<1x8x144xf32, #tpu.memory_space<vmem>>, vector<1x8x12xf32>,
    %198 = vector.shape_cast %189 : vector<8x8xf32> to vector<8x8x1xf32>
    %199 = vector.broadcast %198 : vector<8x8x1xf32> to vector<8x8x16xf32>
    %200 = arith.mulf %199, %1 : vector<8x8x16xf32>
    %cst_112 = arith.constant dense<0.000000e+00> : vector<8x16xf32>
    %201 = vector.multi_reduction <add>, %200, %cst_112 [1] : vector<8x8x16xf32> to vector<8x16xf32>
    %c0_113 = arith.constant 0 : index
    %c0_114 = arith.constant 0 : index
    %c112 = arith.constant 112 : index
    %202 = vector.load %arg7[%c0_113, %c0_114, %c112] : memref<1x8x144xf32, #tpu.memory_space<vmem>>, vector<1x8x16xf32>
    %203 = vector.shape_cast %202 : vector<1x8x16xf32> to vector<8x16xf32>
    %204 = vector.shape_cast %201 : vector<8x16xf32> to vector<1x8x16xf32>
    tpu.vector_store %arg7[%c0_113, %c0_114, %c112], %204 {strides = array<i32>} : memref<1x8x144xf32, #tpu.memory_space<vmem>>, vector<1x8x16xf32>,
    %c0_115 = arith.constant 0 : index
    %c0_116 = arith.constant 0 : index
    %c24_117 = arith.constant 24 : index
    %205 = vector.load %arg1[%c0_115, %c0_116, %c24_117] : memref<1x8x96xf32, #tpu.memory_space<vmem>>, vector<1x8x8xf32>
    %206 = vector.shape_cast %205 : vector<1x8x8xf32> to vector<8x8xf32>
    %c0_118 = arith.constant 0 : index
    %c0_119 = arith.constant 0 : index
    %c56_120 = arith.constant 56 : index
    %207 = vector.load %arg1[%c0_118, %c0_119, %c56_120] : memref<1x8x96xf32, #tpu.memory_space<vmem>>, vector<1x8x8xf32>
    %208 = vector.shape_cast %207 : vector<1x8x8xf32> to vector<8x8xf32>
    %c0_121 = arith.constant 0 : index
    %c0_122 = arith.constant 0 : index
    %c88 = arith.constant 88 : index
    %209 = vector.load %arg1[%c0_121, %c0_122, %c88] : memref<1x8x96xf32, #tpu.memory_space<vmem>>, vector<1x8x8xf32>
    %210 = vector.shape_cast %209 : vector<1x8x8xf32> to vector<8x8xf32>
    %c0_123 = arith.constant 0 : index
    %c0_124 = arith.constant 0 : index
    %c36 = arith.constant 36 : index
    %211 = vector.load %arg2[%c0_123, %c0_124, %c36] : memref<1x8x144xf32, #tpu.memory_space<vmem>>, vector<1x8x12xf32>
    %212 = vector.shape_cast %211 : vector<1x8x12xf32> to vector<8x12xf32>
    %c0_125 = arith.constant 0 : index
    %c0_126 = arith.constant 0 : index
    %c84 = arith.constant 84 : index
    %213 = vector.load %arg2[%c0_125, %c0_126, %c84] : memref<1x8x144xf32, #tpu.memory_space<vmem>>, vector<1x8x12xf32>
    %214 = vector.shape_cast %213 : vector<1x8x12xf32> to vector<8x12xf32>
    %c0_127 = arith.constant 0 : index
    %c0_128 = arith.constant 0 : index
    %c132 = arith.constant 132 : index
    %215 = vector.load %arg2[%c0_127, %c0_128, %c132] : memref<1x8x144xf32, #tpu.memory_space<vmem>>, vector<1x8x12xf32>
    %216 = vector.shape_cast %215 : vector<1x8x12xf32> to vector<8x12xf32>
    %217 = tpu.transpose %208, [1, 0] : vector<8x8xf32> -> vector<8x8xf32>
    %cst_129 = arith.constant dense<0.000000e+00> : vector<8x8xf32>
    %218 = tpu.matmul %206, %217, %cst_129 {dimension_numbers = #tpu.dot_dimension_numbers<[1], [0], [0], [1], [0, 0, 1, 1], [], []>} : vector<8x8xf32>, vector<8x8xf32>, vector<8x8xf32> -> vector<8x8xf32>
    %cst_130 = arith.constant 0.204124153 : f32
    %219 = vector.broadcast %cst_130 : f32 to vector<8x8xf32>
    %220 = arith.mulf %218, %219 : vector<8x8xf32>
    %221 = arith.mulf %212, %212 : vector<8x12xf32>
    %cst_131 = arith.constant dense<0.000000e+00> : vector<8xf32>
    %222 = vector.multi_reduction <add>, %221, %cst_131 [1] : vector<8x12xf32> to vector<8xf32>
    %223 = vector.shape_cast %222 : vector<8xf32> to vector<8x1xf32>
    %224 = arith.mulf %214, %214 : vector<8x12xf32>
    %cst_132 = arith.constant dense<0.000000e+00> : vector<8xf32>
    %225 = vector.multi_reduction <add>, %224, %cst_132 [1] : vector<8x12xf32> to vector<8xf32>
    %226 = vector.shape_cast %225 : vector<8xf32> to vector<8x1xf32>
    %227 = tpu.transpose %226, [1, 0] : vector<8x1xf32> -> vector<1x8xf32>
    %228 = vector.broadcast %223 : vector<8x1xf32> to vector<8x8xf32>
    %229 = vector.broadcast %227 : vector<1x8xf32> to vector<8x8xf32>
    %230 = arith.addf %228, %229 : vector<8x8xf32>
    %231 = arith.subf %220, %230 : vector<8x8xf32>
    %232 = tpu.transpose %214, [1, 0] : vector<8x12xf32> -> vector<12x8xf32>
    %cst_133 = arith.constant dense<0.000000e+00> : vector<8x8xf32>
    %233 = tpu.matmul %212, %232, %cst_133 {dimension_numbers = #tpu.dot_dimension_numbers<[1], [0], [0], [1], [0, 0, 1, 1], [], []>} : vector<8x12xf32>, vector<12x8xf32>, vector<8x8xf32> -> vector<8x8xf32>
    %cst_134 = arith.constant 2.000000e+00 : f32
    %234 = vector.broadcast %cst_134 : f32 to vector<8x8xf32>
    %235 = arith.mulf %234, %233 : vector<8x8xf32>
    %236 = arith.addf %231, %235 : vector<8x8xf32>
    %c3 = arith.constant 3 : index
    %c0_135 = arith.constant 0 : index
    %237 = vector.load %arg5[%c3, %c0_135] : memref<4x16xf32, #tpu.memory_space<vmem>>, vector<1x16xf32>
    %238 = vector.shape_cast %237 : vector<1x16xf32> to vector<1x1x16xf32>
    %239 = vector.broadcast %238 : vector<1x1x16xf32> to vector<8x8x16xf32>
    %240 = arith.mulf %1, %239 : vector<8x8x16xf32>
    %cst_136 = arith.constant dense<0.000000e+00> : vector<8x8xf32>
    %241 = vector.multi_reduction <add>, %240, %cst_136 [2] : vector<8x8x16xf32> to vector<8x8xf32>
    %c0_137 = arith.constant 0 : index
    %c3_138 = arith.constant 3 : index
    %242 = vector.load %arg6[%c0_137, %c3_138] : memref<1x4xf32, #tpu.memory_space<vmem>>, vector<1x1xf32>
    %243 = vector.broadcast %242 : vector<1x1xf32> to vector<8x8xf32>
    %244 = arith.addf %241, %243 : vector<8x8xf32>
    %245 = arith.addf %236, %244 : vector<8x8xf32>
    %246 = arith.addf %245, %3 : vector<8x8xf32>
    %cst_139 = arith.constant dense<0xFF800000> : vector<8xf32>
    %247 = vector.multi_reduction <maximumf>, %246, %cst_139 [1] : vector<8x8xf32> to vector<8xf32>
    %248 = vector.shape_cast %247 : vector<8xf32> to vector<8x1xf32>
    %249 = vector.broadcast %248 : vector<8x1xf32> to vector<8x8xf32>
    %250 = arith.subf %246, %249 : vector<8x8xf32>
    %251 = math.exp %250 : vector<8x8xf32>
    %cst_140 = arith.constant dense<0.000000e+00> : vector<8xf32>
    %252 = vector.multi_reduction <add>, %251, %cst_140 [1] : vector<8x8xf32> to vector<8xf32>
    %253 = vector.shape_cast %252 : vector<8xf32> to vector<8x1xf32>
    %254 = tpu.reciprocal %253 {approx = true} : vector<8x1xf32> -> vector<8x1xf32>
    %255 = vector.broadcast %254 : vector<8x1xf32> to vector<8x8xf32>
    %256 = arith.mulf %251, %255 : vector<8x8xf32>
    %cst_141 = arith.constant dense<0.000000e+00> : vector<8x8xf32>
    %257 = tpu.matmul %256, %210, %cst_141 {dimension_numbers = #tpu.dot_dimension_numbers<[1], [0], [0], [1], [0, 0, 1, 1], [], []>} : vector<8x8xf32>, vector<8x8xf32>, vector<8x8xf32> -> vector<8x8xf32>
    %c0_142 = arith.constant 0 : index
    %c0_143 = arith.constant 0 : index
    %c24_144 = arith.constant 24 : index
    %258 = vector.load %arg7[%c0_142, %c0_143, %c24_144] : memref<1x8x144xf32, #tpu.memory_space<vmem>>, vector<1x8x8xf32>
    %259 = vector.shape_cast %258 : vector<1x8x8xf32> to vector<8x8xf32>
    %260 = vector.shape_cast %257 : vector<8x8xf32> to vector<1x8x8xf32>
    tpu.vector_store %arg7[%c0_142, %c0_143, %c24_144], %260 {strides = array<i32>} : memref<1x8x144xf32, #tpu.memory_space<vmem>>, vector<1x8x8xf32>,
    %cst_145 = arith.constant dense<0.000000e+00> : vector<8x12xf32>
    %261 = tpu.matmul %256, %216, %cst_145 {dimension_numbers = #tpu.dot_dimension_numbers<[1], [0], [0], [1], [0, 0, 1, 1], [], []>} : vector<8x8xf32>, vector<8x12xf32>, vector<8x12xf32> -> vector<8x12xf32>
    %c0_146 = arith.constant 0 : index
    %c0_147 = arith.constant 0 : index
    %c68 = arith.constant 68 : index
    %262 = vector.load %arg7[%c0_146, %c0_147, %c68] : memref<1x8x144xf32, #tpu.memory_space<vmem>>, vector<1x8x12xf32>
    %263 = vector.shape_cast %262 : vector<1x8x12xf32> to vector<8x12xf32>
    %264 = vector.shape_cast %261 : vector<8x12xf32> to vector<1x8x12xf32>
    tpu.vector_store %arg7[%c0_146, %c0_147, %c68], %264 {strides = array<i32>} : memref<1x8x144xf32, #tpu.memory_space<vmem>>, vector<1x8x12xf32>,
    %265 = vector.shape_cast %256 : vector<8x8xf32> to vector<8x8x1xf32>
    %266 = vector.broadcast %265 : vector<8x8x1xf32> to vector<8x8x16xf32>
    %267 = arith.mulf %266, %1 : vector<8x8x16xf32>
    %cst_148 = arith.constant dense<0.000000e+00> : vector<8x16xf32>
    %268 = vector.multi_reduction <add>, %267, %cst_148 [1] : vector<8x8x16xf32> to vector<8x16xf32>
    %c0_149 = arith.constant 0 : index
    %c0_150 = arith.constant 0 : index
    %c128 = arith.constant 128 : index
    %269 = vector.load %arg7[%c0_149, %c0_150, %c128] : memref<1x8x144xf32, #tpu.memory_space<vmem>>, vector<1x8x16xf32>
    %270 = vector.shape_cast %269 : vector<1x8x16xf32> to vector<8x16xf32>
    %271 = vector.shape_cast %268 : vector<8x16xf32> to vector<1x8x16xf32>
    tpu.vector_store %arg7[%c0_149, %c0_150, %c128], %271 {strides = array<i32>} : memref<1x8x144xf32, #tpu.memory_space<vmem>>, vector<1x8x16xf32>,
    return
  }
  func.func @transform_0(%arg0: i32) -> (i32, i32, i32) {
    %c0_i32 = arith.constant 0 : i32
    %c0_i32_0 = arith.constant 0 : i32
    %c0_i32_1 = arith.constant 0 : i32
    return %arg0, %c0_i32, %c0_i32_0 : i32, i32, i32
  }
  func.func @transform_1(%arg0: i32) -> (i32, i32, i32) {
    %c0_i32 = arith.constant 0 : i32
    %c0_i32_0 = arith.constant 0 : i32
    %c0_i32_1 = arith.constant 0 : i32
    return %arg0, %c0_i32, %c0_i32_0 : i32, i32, i32
  }
  func.func @transform_2(%arg0: i32) -> (i32, i32, i32, i32) {
    %c0_i32 = arith.constant 0 : i32
    %c0_i32_0 = arith.constant 0 : i32
    %c0_i32_1 = arith.constant 0 : i32
    %c0_i32_2 = arith.constant 0 : i32
    return %arg0, %c0_i32, %c0_i32_0, %c0_i32_1 : i32, i32, i32, i32
  }
  func.func @transform_3(%arg0: i32) -> (i32, i32, i32) {
    %c0_i32 = arith.constant 0 : i32
    %c0_i32_0 = arith.constant 0 : i32
    %c0_i32_1 = arith.constant 0 : i32
    return %arg0, %c0_i32, %c0_i32_0 : i32, i32, i32
  }
  func.func @transform_4(%arg0: i32) -> (i32, i32) {
    %c0_i32 = arith.constant 0 : i32
    %c0_i32_0 = arith.constant 0 : i32
    %c0_i32_1 = arith.constant 0 : i32
    return %c0_i32, %c0_i32_0 : i32, i32
  }
  func.func @transform_5(%arg0: i32) -> (i32, i32) {
    %c0_i32 = arith.constant 0 : i32
    %c0_i32_0 = arith.constant 0 : i32
    %c0_i32_1 = arith.constant 0 : i32
    return %c0_i32, %c0_i32_0 : i32, i32
  }
  func.func @transform_6(%arg0: i32) -> (i32, i32, i32) {
    %c0_i32 = arith.constant 0 : i32
    %c0_i32_0 = arith.constant 0 : i32
    %c0_i32_1 = arith.constant 0 : i32
    return %arg0, %c0_i32, %c0_i32_0 : i32, i32, i32
  }
}

module attributes {stable_mosaic.version = 11 : i64} {
  func.func @_block_tail_kernel(%arg0: memref<16x32xf32, #tpu.memory_space<vmem>>, %arg1: memref<16x160xf32, #tpu.memory_space<vmem>>, %arg2: memref<160x32xf32, #tpu.memory_space<vmem>>, %arg3: memref<1x32xf32, #tpu.memory_space<vmem>>, %arg4: memref<1x32xf32, #tpu.memory_space<vmem>>, %arg5: memref<1x32xf32, #tpu.memory_space<vmem>>, %arg6: memref<32x32xf32, #tpu.memory_space<vmem>>, %arg7: memref<1x32xf32, #tpu.memory_space<vmem>>, %arg8: memref<32x32xf32, #tpu.memory_space<vmem>>, %arg9: memref<1x32xf32, #tpu.memory_space<vmem>>, %arg10: memref<32x32xf32, #tpu.memory_space<vmem>>, %arg11: memref<1x32xf32, #tpu.memory_space<vmem>>, %arg12: memref<1x32xf32, #tpu.memory_space<vmem>>, %arg13: memref<1x32xf32, #tpu.memory_space<vmem>>, %arg14: memref<16x32xf32, #tpu.memory_space<vmem>>) attributes {dimension_semantics = [], scalar_prefetch = 0 : i64, scratch_operands = 0 : i64, tpu.core_type = #tpu.core_type<tc>} {
    %c0 = arith.constant 0 : index
    %c0_0 = arith.constant 0 : index
    %0 = vector.load %arg1[%c0, %c0_0] : memref<16x160xf32, #tpu.memory_space<vmem>>, vector<16x160xf32>
    %c0_1 = arith.constant 0 : index
    %c0_2 = arith.constant 0 : index
    %1 = vector.load %arg2[%c0_1, %c0_2] : memref<160x32xf32, #tpu.memory_space<vmem>>, vector<160x32xf32>
    %cst = arith.constant dense<0.000000e+00> : vector<16x32xf32>
    %2 = tpu.matmul %0, %1, %cst {dimension_numbers = #tpu.dot_dimension_numbers<[1], [0], [0], [1], [0, 0, 1, 1], [], []>} : vector<16x160xf32>, vector<160x32xf32>, vector<16x32xf32> -> vector<16x32xf32>
    %c0_3 = arith.constant 0 : index
    %c0_4 = arith.constant 0 : index
    %3 = vector.load %arg3[%c0_3, %c0_4] : memref<1x32xf32, #tpu.memory_space<vmem>>, vector<1x32xf32>
    %4 = vector.broadcast %3 : vector<1x32xf32> to vector<16x32xf32>
    %5 = arith.addf %2, %4 : vector<16x32xf32>
    %c0_5 = arith.constant 0 : index
    %c0_6 = arith.constant 0 : index
    %6 = vector.load %arg0[%c0_5, %c0_6] : memref<16x32xf32, #tpu.memory_space<vmem>>, vector<16x32xf32>
    %7 = arith.addf %6, %5 : vector<16x32xf32>
    %c0_7 = arith.constant 0 : index
    %c0_8 = arith.constant 0 : index
    %8 = vector.load %arg4[%c0_7, %c0_8] : memref<1x32xf32, #tpu.memory_space<vmem>>, vector<1x32xf32>
    %c0_9 = arith.constant 0 : index
    %c0_10 = arith.constant 0 : index
    %9 = vector.load %arg5[%c0_9, %c0_10] : memref<1x32xf32, #tpu.memory_space<vmem>>, vector<1x32xf32>
    %cst_11 = arith.constant dense<0.000000e+00> : vector<16xf32>
    %10 = vector.multi_reduction <add>, %7, %cst_11 [1] : vector<16x32xf32> to vector<16xf32>
    %11 = vector.shape_cast %10 : vector<16xf32> to vector<16x1xf32>
    %cst_12 = arith.constant 3.200000e+01 : f32
    %12 = vector.broadcast %cst_12 : f32 to vector<16x1xf32>
    %13 = arith.divf %11, %12 : vector<16x1xf32>
    %14 = vector.broadcast %13 : vector<16x1xf32> to vector<16x32xf32>
    %15 = arith.subf %7, %14 : vector<16x32xf32>
    %16 = arith.mulf %15, %15 : vector<16x32xf32>
    %cst_13 = arith.constant dense<0.000000e+00> : vector<16xf32>
    %17 = vector.multi_reduction <add>, %16, %cst_13 [1] : vector<16x32xf32> to vector<16xf32>
    %18 = vector.shape_cast %17 : vector<16xf32> to vector<16x1xf32>
    %cst_14 = arith.constant 3.200000e+01 : f32
    %19 = vector.broadcast %cst_14 : f32 to vector<16x1xf32>
    %20 = arith.divf %18, %19 : vector<16x1xf32>
    %cst_15 = arith.constant 9.99999974E-6 : f32
    %21 = vector.broadcast %cst_15 : f32 to vector<16x1xf32>
    %22 = arith.addf %20, %21 : vector<16x1xf32>
    %23 = math.rsqrt %22 : vector<16x1xf32>
    %24 = vector.broadcast %23 : vector<16x1xf32> to vector<16x32xf32>
    %25 = arith.mulf %15, %24 : vector<16x32xf32>
    %26 = vector.broadcast %8 : vector<1x32xf32> to vector<16x32xf32>
    %27 = arith.mulf %25, %26 : vector<16x32xf32>
    %28 = vector.broadcast %9 : vector<1x32xf32> to vector<16x32xf32>
    %29 = arith.addf %27, %28 : vector<16x32xf32>
    %c0_16 = arith.constant 0 : index
    %c0_17 = arith.constant 0 : index
    %30 = vector.load %arg6[%c0_16, %c0_17] : memref<32x32xf32, #tpu.memory_space<vmem>>, vector<32x32xf32>
    %cst_18 = arith.constant dense<0.000000e+00> : vector<16x32xf32>
    %31 = tpu.matmul %29, %30, %cst_18 {dimension_numbers = #tpu.dot_dimension_numbers<[1], [0], [0], [1], [0, 0, 1, 1], [], []>} : vector<16x32xf32>, vector<32x32xf32>, vector<16x32xf32> -> vector<16x32xf32>
    %c0_19 = arith.constant 0 : index
    %c0_20 = arith.constant 0 : index
    %32 = vector.load %arg7[%c0_19, %c0_20] : memref<1x32xf32, #tpu.memory_space<vmem>>, vector<1x32xf32>
    %33 = vector.broadcast %32 : vector<1x32xf32> to vector<16x32xf32>
    %34 = arith.addf %31, %33 : vector<16x32xf32>
    %cst_21 = arith.constant 0.000000e+00 : f32
    %35 = vector.broadcast %cst_21 : f32 to vector<16x32xf32>
    %36 = arith.maximumf %34, %35 : vector<16x32xf32>
    %c0_22 = arith.constant 0 : index
    %c0_23 = arith.constant 0 : index
    %37 = vector.load %arg8[%c0_22, %c0_23] : memref<32x32xf32, #tpu.memory_space<vmem>>, vector<32x32xf32>
    %cst_24 = arith.constant dense<0.000000e+00> : vector<16x32xf32>
    %38 = tpu.matmul %36, %37, %cst_24 {dimension_numbers = #tpu.dot_dimension_numbers<[1], [0], [0], [1], [0, 0, 1, 1], [], []>} : vector<16x32xf32>, vector<32x32xf32>, vector<16x32xf32> -> vector<16x32xf32>
    %c0_25 = arith.constant 0 : index
    %c0_26 = arith.constant 0 : index
    %39 = vector.load %arg9[%c0_25, %c0_26] : memref<1x32xf32, #tpu.memory_space<vmem>>, vector<1x32xf32>
    %40 = vector.broadcast %39 : vector<1x32xf32> to vector<16x32xf32>
    %41 = arith.addf %38, %40 : vector<16x32xf32>
    %cst_27 = arith.constant 0.000000e+00 : f32
    %42 = vector.broadcast %cst_27 : f32 to vector<16x32xf32>
    %43 = arith.maximumf %41, %42 : vector<16x32xf32>
    %c0_28 = arith.constant 0 : index
    %c0_29 = arith.constant 0 : index
    %44 = vector.load %arg10[%c0_28, %c0_29] : memref<32x32xf32, #tpu.memory_space<vmem>>, vector<32x32xf32>
    %cst_30 = arith.constant dense<0.000000e+00> : vector<16x32xf32>
    %45 = tpu.matmul %43, %44, %cst_30 {dimension_numbers = #tpu.dot_dimension_numbers<[1], [0], [0], [1], [0, 0, 1, 1], [], []>} : vector<16x32xf32>, vector<32x32xf32>, vector<16x32xf32> -> vector<16x32xf32>
    %c0_31 = arith.constant 0 : index
    %c0_32 = arith.constant 0 : index
    %46 = vector.load %arg11[%c0_31, %c0_32] : memref<1x32xf32, #tpu.memory_space<vmem>>, vector<1x32xf32>
    %47 = vector.broadcast %46 : vector<1x32xf32> to vector<16x32xf32>
    %48 = arith.addf %45, %47 : vector<16x32xf32>
    %49 = arith.addf %29, %48 : vector<16x32xf32>
    %c0_33 = arith.constant 0 : index
    %c0_34 = arith.constant 0 : index
    %50 = vector.load %arg12[%c0_33, %c0_34] : memref<1x32xf32, #tpu.memory_space<vmem>>, vector<1x32xf32>
    %c0_35 = arith.constant 0 : index
    %c0_36 = arith.constant 0 : index
    %51 = vector.load %arg13[%c0_35, %c0_36] : memref<1x32xf32, #tpu.memory_space<vmem>>, vector<1x32xf32>
    %cst_37 = arith.constant dense<0.000000e+00> : vector<16xf32>
    %52 = vector.multi_reduction <add>, %49, %cst_37 [1] : vector<16x32xf32> to vector<16xf32>
    %53 = vector.shape_cast %52 : vector<16xf32> to vector<16x1xf32>
    %cst_38 = arith.constant 3.200000e+01 : f32
    %54 = vector.broadcast %cst_38 : f32 to vector<16x1xf32>
    %55 = arith.divf %53, %54 : vector<16x1xf32>
    %56 = vector.broadcast %55 : vector<16x1xf32> to vector<16x32xf32>
    %57 = arith.subf %49, %56 : vector<16x32xf32>
    %58 = arith.mulf %57, %57 : vector<16x32xf32>
    %cst_39 = arith.constant dense<0.000000e+00> : vector<16xf32>
    %59 = vector.multi_reduction <add>, %58, %cst_39 [1] : vector<16x32xf32> to vector<16xf32>
    %60 = vector.shape_cast %59 : vector<16xf32> to vector<16x1xf32>
    %cst_40 = arith.constant 3.200000e+01 : f32
    %61 = vector.broadcast %cst_40 : f32 to vector<16x1xf32>
    %62 = arith.divf %60, %61 : vector<16x1xf32>
    %cst_41 = arith.constant 9.99999974E-6 : f32
    %63 = vector.broadcast %cst_41 : f32 to vector<16x1xf32>
    %64 = arith.addf %62, %63 : vector<16x1xf32>
    %65 = math.rsqrt %64 : vector<16x1xf32>
    %66 = vector.broadcast %65 : vector<16x1xf32> to vector<16x32xf32>
    %67 = arith.mulf %57, %66 : vector<16x32xf32>
    %68 = vector.broadcast %50 : vector<1x32xf32> to vector<16x32xf32>
    %69 = arith.mulf %67, %68 : vector<16x32xf32>
    %70 = vector.broadcast %51 : vector<1x32xf32> to vector<16x32xf32>
    %71 = arith.addf %69, %70 : vector<16x32xf32>
    %c0_42 = arith.constant 0 : index
    %c0_43 = arith.constant 0 : index
    %72 = vector.load %arg14[%c0_42, %c0_43] : memref<16x32xf32, #tpu.memory_space<vmem>>, vector<16x32xf32>
    tpu.vector_store %arg14[%c0_42, %c0_43], %71 {strides = array<i32>} : memref<16x32xf32, #tpu.memory_space<vmem>>, vector<16x32xf32>,
    return
  }
}

module attributes {stable_mosaic.version = 11 : i64} {
  func.func @_block_tail_kernel(%arg0: memref<16x32xf32, #tpu.memory_space<vmem>>, %arg1: memref<16x160xf32, #tpu.memory_space<vmem>>, %arg2: memref<160x32xf32, #tpu.memory_space<vmem>>, %arg3: memref<1x32xf32, #tpu.memory_space<vmem>>, %arg4: memref<1x32xf32, #tpu.memory_space<vmem>>, %arg5: memref<1x32xf32, #tpu.memory_space<vmem>>, %arg6: memref<32x32xf32, #tpu.memory_space<vmem>>, %arg7: memref<1x32xf32, #tpu.memory_space<vmem>>, %arg8: memref<32x32xf32, #tpu.memory_space<vmem>>, %arg9: memref<1x32xf32, #tpu.memory_space<vmem>>, %arg10: memref<32x32xf32, #tpu.memory_space<vmem>>, %arg11: memref<1x32xf32, #tpu.memory_space<vmem>>, %arg12: memref<1x32xf32, #tpu.memory_space<vmem>>, %arg13: memref<1x32xf32, #tpu.memory_space<vmem>>, %arg14: memref<16x32xf32, #tpu.memory_space<vmem>>) attributes {dimension_semantics = [], scalar_prefetch = 0 : i64, scratch_operands = 0 : i64, tpu.core_type = #tpu.core_type<tc>} {
    %c0 = arith.constant 0 : index
    %c0_0 = arith.constant 0 : index
    %0 = vector.load %arg1[%c0, %c0_0] : memref<16x160xf32, #tpu.memory_space<vmem>>, vector<16x160xf32>
    %c0_1 = arith.constant 0 : index
    %c0_2 = arith.constant 0 : index
    %1 = vector.load %arg2[%c0_1, %c0_2] : memref<160x32xf32, #tpu.memory_space<vmem>>, vector<160x32xf32>
    %cst = arith.constant dense<0.000000e+00> : vector<16x32xf32>
    %2 = tpu.matmul %0, %1, %cst {dimension_numbers = #tpu.dot_dimension_numbers<[1], [0], [0], [1], [0, 0, 1, 1], [], []>} : vector<16x160xf32>, vector<160x32xf32>, vector<16x32xf32> -> vector<16x32xf32>
    %c0_3 = arith.constant 0 : index
    %c0_4 = arith.constant 0 : index
    %3 = vector.load %arg3[%c0_3, %c0_4] : memref<1x32xf32, #tpu.memory_space<vmem>>, vector<1x32xf32>
    %4 = vector.broadcast %3 : vector<1x32xf32> to vector<16x32xf32>
    %5 = arith.addf %2, %4 : vector<16x32xf32>
    %c0_5 = arith.constant 0 : index
    %c0_6 = arith.constant 0 : index
    %6 = vector.load %arg0[%c0_5, %c0_6] : memref<16x32xf32, #tpu.memory_space<vmem>>, vector<16x32xf32>
    %7 = arith.addf %6, %5 : vector<16x32xf32>
    %c0_7 = arith.constant 0 : index
    %c0_8 = arith.constant 0 : index
    %8 = vector.load %arg4[%c0_7, %c0_8] : memref<1x32xf32, #tpu.memory_space<vmem>>, vector<1x32xf32>
    %c0_9 = arith.constant 0 : index
    %c0_10 = arith.constant 0 : index
    %9 = vector.load %arg5[%c0_9, %c0_10] : memref<1x32xf32, #tpu.memory_space<vmem>>, vector<1x32xf32>
    %cst_11 = arith.constant dense<0.000000e+00> : vector<16xf32>
    %10 = vector.multi_reduction <add>, %7, %cst_11 [1] : vector<16x32xf32> to vector<16xf32>
    %11 = vector.shape_cast %10 : vector<16xf32> to vector<16x1xf32>
    %cst_12 = arith.constant 3.200000e+01 : f32
    %12 = vector.broadcast %cst_12 : f32 to vector<16x1xf32>
    %13 = arith.divf %11, %12 : vector<16x1xf32>
    %14 = vector.broadcast %13 : vector<16x1xf32> to vector<16x32xf32>
    %15 = arith.subf %7, %14 : vector<16x32xf32>
    %16 = arith.mulf %15, %15 : vector<16x32xf32>
    %cst_13 = arith.constant dense<0.000000e+00> : vector<16xf32>
    %17 = vector.multi_reduction <add>, %16, %cst_13 [1] : vector<16x32xf32> to vector<16xf32>
    %18 = vector.shape_cast %17 : vector<16xf32> to vector<16x1xf32>
    %cst_14 = arith.constant 3.200000e+01 : f32
    %19 = vector.broadcast %cst_14 : f32 to vector<16x1xf32>
    %20 = arith.divf %18, %19 : vector<16x1xf32>
    %cst_15 = arith.constant 9.99999974E-6 : f32
    %21 = vector.broadcast %cst_15 : f32 to vector<16x1xf32>
    %22 = arith.addf %20, %21 : vector<16x1xf32>
    %23 = math.rsqrt %22 : vector<16x1xf32>
    %24 = vector.broadcast %23 : vector<16x1xf32> to vector<16x32xf32>
    %25 = arith.mulf %15, %24 : vector<16x32xf32>
    %26 = vector.broadcast %8 : vector<1x32xf32> to vector<16x32xf32>
    %27 = arith.mulf %25, %26 : vector<16x32xf32>
    %28 = vector.broadcast %9 : vector<1x32xf32> to vector<16x32xf32>
    %29 = arith.addf %27, %28 : vector<16x32xf32>
    %c0_16 = arith.constant 0 : index
    %c0_17 = arith.constant 0 : index
    %30 = vector.load %arg6[%c0_16, %c0_17] : memref<32x32xf32, #tpu.memory_space<vmem>>, vector<32x32xf32>
    %cst_18 = arith.constant dense<0.000000e+00> : vector<16x32xf32>
    %31 = tpu.matmul %29, %30, %cst_18 {dimension_numbers = #tpu.dot_dimension_numbers<[1], [0], [0], [1], [0, 0, 1, 1], [], []>} : vector<16x32xf32>, vector<32x32xf32>, vector<16x32xf32> -> vector<16x32xf32>
    %c0_19 = arith.constant 0 : index
    %c0_20 = arith.constant 0 : index
    %32 = vector.load %arg7[%c0_19, %c0_20] : memref<1x32xf32, #tpu.memory_space<vmem>>, vector<1x32xf32>
    %33 = vector.broadcast %32 : vector<1x32xf32> to vector<16x32xf32>
    %34 = arith.addf %31, %33 : vector<16x32xf32>
    %cst_21 = arith.constant 0.000000e+00 : f32
    %35 = vector.broadcast %cst_21 : f32 to vector<16x32xf32>
    %36 = arith.maximumf %34, %35 : vector<16x32xf32>
    %c0_22 = arith.constant 0 : index
    %c0_23 = arith.constant 0 : index
    %37 = vector.load %arg8[%c0_22, %c0_23] : memref<32x32xf32, #tpu.memory_space<vmem>>, vector<32x32xf32>
    %cst_24 = arith.constant dense<0.000000e+00> : vector<16x32xf32>
    %38 = tpu.matmul %36, %37, %cst_24 {dimension_numbers = #tpu.dot_dimension_numbers<[1], [0], [0], [1], [0, 0, 1, 1], [], []>} : vector<16x32xf32>, vector<32x32xf32>, vector<16x32xf32> -> vector<16x32xf32>
    %c0_25 = arith.constant 0 : index
    %c0_26 = arith.constant 0 : index
    %39 = vector.load %arg9[%c0_25, %c0_26] : memref<1x32xf32, #tpu.memory_space<vmem>>, vector<1x32xf32>
    %40 = vector.broadcast %39 : vector<1x32xf32> to vector<16x32xf32>
    %41 = arith.addf %38, %40 : vector<16x32xf32>
    %cst_27 = arith.constant 0.000000e+00 : f32
    %42 = vector.broadcast %cst_27 : f32 to vector<16x32xf32>
    %43 = arith.maximumf %41, %42 : vector<16x32xf32>
    %c0_28 = arith.constant 0 : index
    %c0_29 = arith.constant 0 : index
    %44 = vector.load %arg10[%c0_28, %c0_29] : memref<32x32xf32, #tpu.memory_space<vmem>>, vector<32x32xf32>
    %cst_30 = arith.constant dense<0.000000e+00> : vector<16x32xf32>
    %45 = tpu.matmul %43, %44, %cst_30 {dimension_numbers = #tpu.dot_dimension_numbers<[1], [0], [0], [1], [0, 0, 1, 1], [], []>} : vector<16x32xf32>, vector<32x32xf32>, vector<16x32xf32> -> vector<16x32xf32>
    %c0_31 = arith.constant 0 : index
    %c0_32 = arith.constant 0 : index
    %46 = vector.load %arg11[%c0_31, %c0_32] : memref<1x32xf32, #tpu.memory_space<vmem>>, vector<1x32xf32>
    %47 = vector.broadcast %46 : vector<1x32xf32> to vector<16x32xf32>
    %48 = arith.addf %45, %47 : vector<16x32xf32>
    %49 = arith.addf %29, %48 : vector<16x32xf32>
    %c0_33 = arith.constant 0 : index
    %c0_34 = arith.constant 0 : index
    %50 = vector.load %arg12[%c0_33, %c0_34] : memref<1x32xf32, #tpu.memory_space<vmem>>, vector<1x32xf32>
    %c0_35 = arith.constant 0 : index
    %c0_36 = arith.constant 0 : index
    %51 = vector.load %arg13[%c0_35, %c0_36] : memref<1x32xf32, #tpu.memory_space<vmem>>, vector<1x32xf32>
    %cst_37 = arith.constant dense<0.000000e+00> : vector<16xf32>
    %52 = vector.multi_reduction <add>, %49, %cst_37 [1] : vector<16x32xf32> to vector<16xf32>
    %53 = vector.shape_cast %52 : vector<16xf32> to vector<16x1xf32>
    %cst_38 = arith.constant 3.200000e+01 : f32
    %54 = vector.broadcast %cst_38 : f32 to vector<16x1xf32>
    %55 = arith.divf %53, %54 : vector<16x1xf32>
    %56 = vector.broadcast %55 : vector<16x1xf32> to vector<16x32xf32>
    %57 = arith.subf %49, %56 : vector<16x32xf32>
    %58 = arith.mulf %57, %57 : vector<16x32xf32>
    %cst_39 = arith.constant dense<0.000000e+00> : vector<16xf32>
    %59 = vector.multi_reduction <add>, %58, %cst_39 [1] : vector<16x32xf32> to vector<16xf32>
    %60 = vector.shape_cast %59 : vector<16xf32> to vector<16x1xf32>
    %cst_40 = arith.constant 3.200000e+01 : f32
    %61 = vector.broadcast %cst_40 : f32 to vector<16x1xf32>
    %62 = arith.divf %60, %61 : vector<16x1xf32>
    %cst_41 = arith.constant 9.99999974E-6 : f32
    %63 = vector.broadcast %cst_41 : f32 to vector<16x1xf32>
    %64 = arith.addf %62, %63 : vector<16x1xf32>
    %65 = math.rsqrt %64 : vector<16x1xf32>
    %66 = vector.broadcast %65 : vector<16x1xf32> to vector<16x32xf32>
    %67 = arith.mulf %57, %66 : vector<16x32xf32>
    %68 = vector.broadcast %50 : vector<1x32xf32> to vector<16x32xf32>
    %69 = arith.mulf %67, %68 : vector<16x32xf32>
    %70 = vector.broadcast %51 : vector<1x32xf32> to vector<16x32xf32>
    %71 = arith.addf %69, %70 : vector<16x32xf32>
    %c0_42 = arith.constant 0 : index
    %c0_43 = arith.constant 0 : index
    %72 = vector.load %arg14[%c0_42, %c0_43] : memref<16x32xf32, #tpu.memory_space<vmem>>, vector<16x32xf32>
    tpu.vector_store %arg14[%c0_42, %c0_43], %71 {strides = array<i32>} : memref<16x32xf32, #tpu.memory_space<vmem>>, vector<16x32xf32>,
    return
  }
}

</mosaic_0001>

<bundles_post_ra>
// kernel: encoder_forward.6
= control target key start
LH: loop header
LB: loop body
LE: loop exit
PB: predicated region body
PF: predicated region fallthrough
CT: control target
= control target key end

     0   :  { %v129_v3 = vmov 0.0   ;;  %vm21_vm0 = vcmask 261120   ;;  %vm106_vm1 = vcmask 916480   ;;  %s187_s1 = inlined_call_operand.vmem [shape: f32[32,240], index: 1, kind: input, shape index: {}]   ;;  %s188_s0 = inlined_call_operand.vmem [shape: f32[16,32], index: 0, kind: input, shape index: {}]   ;;  %s189_s2 = inlined_call_operand.vmem [shape: f32[16,240], index: 2, kind: output, shape index: {}]  }
   0x1   :  { %v14_v0 = vld [vmem:[%s187_s1 + $0x8] sm:$0xff]  ;;  %v16_v1 = vld [vmem:[%s187_s1 + $0x18] sm:$0xff]  ;;  %v13_v2 = vld [vmem:[%s187_s1] sm:$0xff]  ;;  %92 = vmatprep.mubr.f32.mxu0 %v129_v3  ;;  %98 = vmatprep.mubr.f32.mxu1 %v129_v3 }
   0x2   :  { %v116_v4 = vpack.c.bf16 %v16_v1, %v14_v0  ;;  %v15_v5 = vld [vmem:[%s187_s1 + $0x10] sm:$0xff]  ;;  %v18_v6 = vld [vmem:[%s187_s1 + $0x28] sm:$0xff]  ;;  %v20_v7 = vld [vmem:[%s187_s1 + $0x38] sm:$0xff] }
   0x3   :  { %v118_v8 = vpack.c.bf16 %v15_v5, %v13_v2  ;;  %v120_v9 = vpack.c.bf16 %v20_v7, %v18_v6  ;;  %v17_v10 = vld [vmem:[%s187_s1 + $0x20] sm:$0xff]  ;;  %v19_v11 = vld [vmem:[%s187_s1 + $0x30] sm:$0xff]  ;;  %v12_v14 = vld [vmem:[%s188_s0 + $0x8] sm:$0xff] }
   0x4   :  { %117 = vmatprep.subr.bf16.mxu0 %v116_v4  ;;  %124 = vmatprep.subr.bf16.mxu1 %v116_v4  ;;  %v122_v12 = vpack.c.bf16 %v19_v11, %v17_v10  ;;  %v11_v13 = vld [vmem:[%s188_s0] sm:$0xff] }
   0x5   :  { %119 = vmatpush1.bf16.msra.mxu0 %v118_v8  ;;  %126 = vmatpush1.bf16.msra.mxu1 %v118_v8 }
   0x6   :  { %121 = vmatprep.subr.bf16.mxu0 %v120_v9  ;;  %125 = vmatprep.subr.bf16.mxu1 %v120_v9 }
   0x9   :  { %123 = vmatpush1.bf16.msra.mxu0 %v122_v12  ;;  %127 = vmatpush1.bf16.msra.mxu1 %v122_v12 }
   0xc   :  { %114 = vmatmul.mubr.msk.f32.vlgmr.msra.gmra.mrb[0].mxu0 %vm21_vm0, %v11_v13  ;;  %115 = vmatmul.mubr.msk.f32.vlgmr.msra.gmra.mrb[0].mxu1 %vm21_vm0, %v12_v14 }
  0xdf   :  { %v94_v15 = vpop.f32.mrb[0].mxu0  ;;  %v100_v16 = vpop.f32.mrb[0].mxu1 }
  0xe0   :  { %105 = vst [vmem:[%s189_s2] sm:$0xff] %v94_v15  ;;  %108 = vst [vmem:[%s189_s2 + $0x10] sm:$0xff] %v100_v16  ;;  %v96_v17 = vpop.f32.mrb[1].mxu0  ;;  %v102_v18 = vpop.f32.mrb[1].mxu1 }
  0xe1   :  { %107 = vst.msk [vmem:[%s189_s2 + $0x8] sm:$0xff] %vm106_vm1, %v96_v17  ;;  %109 = vst.msk [vmem:[%s189_s2 + $0x18] sm:$0xff] %vm106_vm1, %v102_v18 }

// kernel: encoder_forward.7
= control target key start
LH: loop header
LB: loop body
LE: loop exit
PB: predicated region body
PF: predicated region fallthrough
CT: control target
= control target key end

     0   :  { %s3235_s21 = smov 0   ;;  %s3883_s0 = inlined_call_operand.vmem [shape: f32[2,8,96], index: 0, kind: input, shape index: {}]   ;;  %s3884_s1 = inlined_call_operand.vmem [shape: f32[2,8,144], index: 1, kind: input, shape index: {}]   ;;  %s3885_s2 = inlined_call_operand.vmem [shape: f32[2,8,8,16], index: 2, kind: input, shape index: {}]   ;;  %s3886_s3 = inlined_call_operand.vmem [shape: f32[2,8,8], index: 3, kind: input, shape index: {}]   ;;  %s3887_s4 = inlined_call_operand.vmem [shape: f32[4,16], index: 4, kind: input, shape index: {}]   ;;  %s3888_s5 = inlined_call_operand.vmem [shape: f32[1,4], index: 5, kind: input, shape index: {}]   ;;  %s3889_s6 = inlined_call_operand.vmem [shape: f32[2,8,144], index: 6, kind: output, shape index: {}]  }
   0x1 LB: > { %s2938_s22 = sadd.s32 4294967295, %s3171_s21   ;;  %p2942_p0 = scmp.ge.s32.totalorder %s3171_s21, 1  ;;  %s3171_s21 = sphi %s3235_s21, %s16_s21  }
   0x2   : > { %p240_p1 = scmp.lt.s32.totalorder %s3171_s21, 3 }
   0x4   : > { %p241_p2 = pnand %p2942_p0, %p240_p1 }
   0x5   : > { %p283_p3 = scmp.lt.s32.totalorder (!%p241_p2), %s2938_s22, 1  ;;  %v3173_v0 = vmov (!%p241_p2), 0.0   ;;  %vm3174_vm0 = vmmov (!%p241_p2), 0   ;;  %s3175_s7 = smov (!%p241_p2), 80   ;;  %v3177_v4 = vmov (!%p241_p2), 0   ;;  %vm538_vm1 = vcmask (!%p241_p2), 130048  }
   0x6   : > { %244 = sbr.rel (%p241_p2) target bundleno = 2867 (0xb33), region = 44  ;;  %3020 = vmatprep.subr.mxu0 (!%p241_p2), %v3173_v0  ;;  %3025 = vmatprep.subr.mxu1 (!%p241_p2), %v3173_v0  ;;  %s3176_s8 = smov (!%p241_p2), 96   ;;  %v2955_v6 = vld [vmem:[%s3887_s4] ss:$0 sm:$0xff] (!%p241_p2)  ;;  %vm397_vm2 = vcmask (!%p241_p2), 97280   ;;  %vm320_vm3 = vcmask (!%p241_p2), 64512   ;;  %v440_v46 = vlaneseq (!%p241_p2) }
   0x7   : > { %3022 = vmatprep.mubr.msk.f32.mxu0 (!%p241_p2), %vm3174_vm0, %v3173_v0  ;;  %3027 = vmatprep.mubr.msk.f32.mxu1 (!%p241_p2), %vm3174_vm0, %v3173_v0  ;;  %v3320_v21 = vld [vmem:[%s3888_s5] ss:$0 sm:$0xff] (!%p241_p2)  ;;  %s3178_s17 = smov (!%p241_p2), 32   ;;  %vm623_vm4 = vcmask (!%p241_p2), 1041409   ;;  %vm625_vm5 = vcmask (!%p241_p2), 1042434   ;;  %vm627_vm6 = vcmask (!%p241_p2), 1043459  }
   0x8   : > { %3135 = vset.pattern.permute.xlu0 (!%p241_p2), %v3177_v4  ;;  %v3355_v48 = vshrl.u32 (!%p241_p2), %v440_v46, 7  ;;  %v590_v49 = vand.u32 (!%p241_p2), 127, %v440_v46  ;;  %vm629_vm7 = vcmask (!%p241_p2), 1044484   ;;  %vm631_vm8 = vcmask (!%p241_p2), 1045509   ;;  %s3179_s24 = smov (!%p241_p2), 64   ;;  %s3180_s25 = smov (!%p241_p2), 88  }
   0x9   : > { %vm633_vm9 = vcmask (!%p241_p2), 1046534   ;;  %vm635_vm10 = vcmask (!%p241_p2), 1047559   ;;  %s3182_s28 = smov (!%p241_p2), 120   ;;  %s3183_s29 = smov (!%p241_p2), 116   ;;  %vm805_vm11 = vcmask (!%p241_p2), 359680   ;;  %vm945_vm12 = vcmask (!%p241_p2), 786048  }
   0xa   : > { %v3358_v53 = vsub.s32 (!%p241_p2), %v590_v49, %v3355_v48  ;;  %s3185_s11 = smov (!%p241_p2), 20   ;;  %s3188_s19 = smov (!%p241_p2), 104   ;;  %vm1358_vm13 = vcmask (!%p241_p2), 130112   ;;  %vm1437_vm14 = vcmask (!%p241_p2), 458080   ;;  %vm1577_vm15 = vcmask (!%p241_p2), 917248  }
   0xb   : > { %s3196_s10 = smov (!%p241_p2), 40  }
   0xd   : > { %s3891_s22 = smov (!%p283_p3, %s2938_s22), 1 }
   0xe   : > { %s2985_s23 = sshll.u32 %s3891_s22, 4  ;;  %s2943_s27 = sshll.u32 %s3891_s22, 3 }
   0xf   : > { %s3257_s26 = scalar_lea.vmem %s3884_s1, %s2985_s23  ;;  %s3272_s30 = scalar_lea.vmem %s3883_s0, %s2943_s27 }
  0x10   : > { %v3260_v1 = vld [vmem:[%s3257_s26] sm:$0xff]  ;;  %s2986_s9 = sshll.u32 %s3891_s22, 6  ;;  %s300_s20 = scalar_lea.vmem %s3886_s3, %s2943_s27 }
  0x11   : > { %v3265_v2 = vmul.f32 %v3260_v1, %v3260_v1  ;;  %v3275_v3 = vld [vmem:[%s3272_s30] sm:$0xff]  ;;  %s3287_s12 = scalar_lea.vmem %s3885_s2, %s2986_s9  ;;  %s3181_s27 = smov 68  }
  0x12   : > { %318 = vrot.lane.b32.xlu0 %v3275_v3, %s3176_s8  ;;  %v3290_v5 = vld [vmem:[%s3287_s12] sm:$0xff]  ;;  %v3297_v8 = vld [vmem:[%s3287_s12 + $0x8] sm:$0xff]  ;;  %v3302_v11 = vld [vmem:[%s3287_s12 + $0x18] sm:$0xff]  ;;  %s3455_s15 = scalar_lea.vmem %s3889_s6, %s2985_s23  ;;  %s3186_s22 = smov 56  }
  0x13   : > { %402 = vrot.lane.b32.xlu1 %v3265_v2, %s3175_s7  ;;  %v530_v7 = vmul.f32 %v2955_v6, %v3290_v5  ;;  %v531_v10 = vmul.f32 %v2955_v6, %v3297_v8  ;;  %v533_v13 = vmul.f32 %v2955_v6, %v3302_v11  ;;  %v3307_v14 = vld [vmem:[%s3287_s12 + $0x28] sm:$0xff]  ;;  %v3312_v17 = vld [vmem:[%s3287_s12 + $0x30] sm:$0xff]  ;;  %v3328_v26 = vld [vmem:[%s3287_s12 + $0x20] sm:$0xff]  ;;  %v398_v33 = vsel %vm397_vm2, %v3265_v2, 0.0  ;;  %s3187_s23 = smov 112  }
  0x14   : > { %v535_v16 = vmul.f32 %v2955_v6, %v3307_v14  ;;  %v536_v19 = vmul.f32 %v2955_v6, %v3312_v17  ;;  %v3324_v22 = vld [vmem:[%s3287_s12 + $0x10] sm:$0xff]  ;;  %v534_v29 = vmul.f32 %v2955_v6, %v3328_v26  ;;  %v3345_v32 = vld [vmem:[%s3287_s12 + $0x38] sm:$0xff] }
  0x15   : > { %v539_v9 = vsel %vm538_vm1, %v530_v7, 0.0  ;;  %v542_v12 = vsel %vm538_vm1, %v531_v10, 0.0  ;;  %v548_v15 = vsel %vm538_vm1, %v533_v13, 0.0  ;;  %v532_v23 = vmul.f32 %v2955_v6, %v3324_v22 }
  0x16   : > { %447 = vrot.lane.b32.xlu0 %v3260_v1, %s3175_s7  ;;  %v554_v18 = vsel %vm538_vm1, %v535_v16, 0.0  ;;  %v557_v20 = vsel %vm538_vm1, %v536_v19, 0.0  ;;  %v551_v31 = vsel %vm538_vm1, %v534_v29, 0.0  ;;  %v537_v34 = vmul.f32 %v2955_v6, %v3345_v32 }
  0x17   : > { %v545_v28 = vsel %vm538_vm1, %v532_v23, 0.0 }
  0x18   : > { %v560_v35 = vsel %vm538_vm1, %v537_v34, 0.0  ;;  %v3383_v34 = vld [vmem:[%s300_s20] sm:$0xff]  ;;  %s3190_s20 = smov 48  }
  0x35   : > { %540 = vadd.xlane.f32.xlu0 %v539_v9 }
  0x39   : > { %543 = vadd.xlane.f32.xlu0 %v542_v12  ;;  %v3369_v12 = vsub.s32 0, %v3355_v48 }
  0x3d   : > { %549 = vadd.xlane.f32.xlu0 %v548_v15 }
  0x41   : > { %555 = vadd.xlane.f32.xlu0 %v554_v18 }
  0x45   : > { %558 = vadd.xlane.f32.xlu0 %v557_v20 }
  0x5b   : > { %570 = vperm.xlu0 %3135, %v3320_v21  }
  0x84   : > { %v319_v25 = vpop.permute.xlu0 %318 }
  0x85   : > { %v403_v24 = vpop.permute.xlu1 %402  ;;  %3021 = vmatpush3.xpose.msk.msra.mxu0 %vm320_vm3, %v319_v25 }
  0x86   : > { %v405_v27 = vsel %vm397_vm2, %v403_v24, 0.0  ;;  %3030 = vmatprep.subr.mxu0 %v3173_v0 }
  0x87   : > { %406 = vadd.xlane.f32.xlu1 %v405_v27 }
  0x88   : > { %v448_v30 = vpop.permute.xlu0 %447  ;;  %3023 = vmatmul.mubr.msk.f32.vlgmr.msra.gmra.mrb[0].mxu0 %vm320_vm3, %v3275_v3 }
  0x89   : > { %3026 = vmatpush3.xpose.msk.msra.mxu1 %vm397_vm2, %v448_v30  ;;  %3032 = vmatprep.mubr.msk.f32.mxu0 %vm3174_vm0, %v3173_v0 }
  0x8a   : > { %3035 = vmatprep.subr.mxu1 %v3173_v0 }
  0x8b   : > { %546 = vadd.xlane.f32.xlu1 %v545_v28 }
  0x8c   : > { %3028 = vmatmul.mubr.msk.f32.vlgmr.msra.gmra.mrb[0].mxu1 %vm397_vm2, %v3260_v1 }
  0x8d   : > { %3037 = vmatprep.mubr.msk.f32.mxu1 %vm3174_vm0, %v3173_v0 }
  0x8f   : > { %552 = vadd.xlane.f32.xlu1 %v551_v31 }
  0x93   : > { %399 = vadd.xlane.f32.xlu1 %v398_v33 }
  0x97   : > { %561 = vadd.xlane.f32.xlu1 %v560_v35 }
  0xc2   : > { %v541_v41 = vpop.xlane.xlu0 %540 }
  0xc6   : > { %v544_v42 = vpop.xlane.xlu0 %543 }
  0xca   : > { %v550_v43 = vpop.xlane.xlu0 %549 }
  0xce   : > { %v556_v44 = vpop.xlane.xlu0 %555 }
  0xd2   : > { %v559_v45 = vpop.xlane.xlu0 %558 }
  0xda   : > { %v571_v50 = vpop.permute.xlu0 %570 }
  0xdb   : > { %v573_v51 = vadd.f32 %v571_v50, %v541_v41  ;;  %v574_v52 = vadd.f32 %v571_v50, %v544_v42  ;;  %v576_v58 = vadd.f32 %v571_v50, %v550_v43  ;;  %v578_v6 = vadd.f32 %v571_v50, %v556_v44 }
  0xdc   : > { %v579_v13 = vadd.f32 %v571_v50, %v559_v45 }
  0xdd   : > { %v594_v56 = vrot.slane %v573_v51, %v3358_v53  ;;  %v598_v57 = vrot.slane %v574_v52, %v3358_v53  ;;  %v606_v63 = vrot.slane %v576_v58, %v3358_v53  ;;  %v614_v15 = vrot.slane %v578_v6, %v3358_v53  ;;  %v2963_v52 = vld [vmem:[%s3887_s4 + $0x1] ss:$0 sm:$0xff] }
  0xde   : > { %v618_v24 = vrot.slane %v579_v13, %v3358_v53  ;;  %v1170_v58 = vmul.f32 %v2963_v52, %v3302_v11  ;;  %v1167_v6 = vmul.f32 %v2963_v52, %v3290_v5 }
  0xdf   : > { %v624_v61 = vsel %vm623_vm4, %v598_v57, %v594_v56  ;;  %v1169_v56 = vmul.f32 %v2963_v52, %v3324_v22 }
  0xe1   : > { %v1181_v57 = vsel %vm538_vm1, %v1169_v56, 0.0 }
 0x114   : > { %v407_v36 = vpop.xlane.xlu1 %406 }
 0x115   : > { %408 = vxpose.xlu1.b32.start.end [1/1] (short) (narrow) %v407_v36, 8 }
 0x118   : > { %v547_v47 = vpop.xlane.xlu1 %546 }
 0x119   : > { %v575_v55 = vadd.f32 %v571_v50, %v547_v47 }
 0x11b   : > { %v602_v59 = vrot.slane %v575_v55, %v3358_v53 }
 0x11c   : > { %v553_v54 = vpop.xlane.xlu1 %552 }
 0x11d   : > { %v577_v62 = vadd.f32 %v571_v50, %v553_v54  ;;  %v626_v4 = vsel %vm625_vm5, %v602_v59, %v624_v61  ;;  %v1168_v54 = vmul.f32 %v2963_v52, %v3297_v8  ;;  %v1172_v59 = vmul.f32 %v2963_v52, %v3307_v14 }
 0x11e   : > { %v628_v10 = vsel %vm627_vm6, %v606_v63, %v626_v4  ;;  %v1184_v61 = vsel %vm538_vm1, %v1170_v58, 0.0  ;;  %v1173_v63 = vmul.f32 %v2963_v52, %v3312_v17 }
 0x11f   : > { %v610_v7 = vrot.slane %v577_v62, %v3358_v53  ;;  %v1178_v55 = vsel %vm538_vm1, %v1168_v54, 0.0  ;;  %v1190_v62 = vsel %vm538_vm1, %v1172_v59, 0.0 }
 0x120   : > { %v400_v60 = vpop.xlane.xlu1 %399  ;;  %v1193_v4 = vsel %vm538_vm1, %v1173_v63, 0.0 }
 0x121   : > { %v630_v16 = vsel %vm629_vm7, %v610_v7, %v628_v10  ;;  %v1175_v7 = vsel %vm538_vm1, %v1167_v6, 0.0 }
 0x122   : > { %v632_v25 = vsel %vm631_vm8, %v614_v15, %v630_v16  ;;  %v1174_v16 = vmul.f32 %v2963_v52, %v3345_v32 }
 0x123   : > { %v634_v31 = vsel %vm633_vm9, %v618_v24, %v632_v25 }
 0x124   : > { %v562_v9 = vpop.xlane.xlu1 %561 }
 0x125   : > { %v580_v18 = vadd.f32 %v571_v50, %v562_v9  ;;  %v1171_v9 = vmul.f32 %v2963_v52, %v3328_v26 }
 0x127   : > { %v622_v29 = vrot.slane %v580_v18, %v3358_v53  ;;  %v1187_v10 = vsel %vm538_vm1, %v1171_v9, 0.0 }
 0x129   : > { %v636_v35 = vsel %vm635_vm10, %v622_v29, %v634_v31 }
 0x133   : > { %728 = vrot.lane.b32.xlu1 %v3260_v1, %s3178_s17 }
 0x15b   : > { %v391_v37 = vpop.f32.mrb[0].mxu0 }
 0x15c   : > { %v3024_v38 = vpop.f32.mrb[1].mxu0  ;;  %v395_v23 = vmul.f32 0.20412415, %v391_v37 }
 0x15f   : > { %v519_v39 = vpop.f32.mrb[0].mxu1 }
 0x160   : > { %v3029_v40 = vpop.f32.mrb[1].mxu1  ;;  %v523_v28 = vmul.f32 2.0, %v519_v39 }
 0x195   : > { %v424_v19 = vpop.trf.xlu1 }
 0x196   : > { %v443_v20 = vrot.slane %v424_v19, %v3369_v12 }
 0x198   : > { %v444_v27 = vadd.f32 %v443_v20, %v400_v60  ;;  %v3184_v60 = vmov 1  }
 0x199   : > { %3136 = vset.pattern.permute.xlu0 %v3184_v60 }
 0x19a   : > { %v445_v30 = vsub.f32 %v395_v23, %v444_v27  ;;  %v1196_v23 = vsel %vm538_vm1, %v1174_v16, 0.0 }
 0x19c   : > { %v524_v33 = vadd.f32 %v523_v28, %v445_v30 }
 0x19e   : > { %v638_v36 = vadd.f32 %v636_v35, %v524_v33 }
 0x1a0   : > { %v639_v37 = vadd.f32 %v638_v36, %v3383_v34 }
 0x1a2   : > { %v640_v38 = vsel %vm320_vm3, %v639_v37, -inf }
 0x1a3   : > { %641 = vmax.xlane.f32.xlu0 %v640_v38 }
 0x1a5   : > { %v729_v39 = vpop.permute.xlu1 %728 }
 0x1a6   : > { %3036 = vmatpush3.msra.mxu1 %v729_v39 }
 0x1a7   : > { %3045 = vmatprep.subr.mxu1 %v3173_v0 }
 0x1b9   : > { %651 = vrot.lane.b32.xlu0 %v3275_v3, %s3179_s24  ;;  %s3191_s24 = smov 8  }
 0x1bd   : > { %952 = vrot.lane.b32.xlu0 %v3275_v3, %s3180_s25  ;;  %s3192_s25 = smov 72  }
 0x1c1   : > { %1084 = vrot.lane.b32.xlu0 %v3260_v1, %s3181_s27 }
 0x1c5   : > { %950 = vrot.lane.b32.xlu0 %v3275_v3, %s3182_s28  ;;  %s3193_s28 = smov 44  }
 0x1c9   : > { %1037 = vrot.lane.b32.xlu0 %v3265_v2, %s3181_s27 }
 0x230   : > { %v642_v40 = vpop.xlane.xlu0 %641 }
 0x231   : > { %v643_v41 = vsub.f32 %v639_v37, %v642_v40 }
 0x233   : > { %v644_v42 = vmul.f32 1.442695, %v643_v41 }
 0x234   : > { %v652_v43 = vpop.permute.xlu0 %651 }
 0x235   : > { %3140 = vpow2.f32 %v644_v42  ;;  %3031 = vmatpush3.msra.mxu0 %v652_v43 }
 0x236   : > { %3040 = vmatprep.subr.mxu0 %v3173_v0 }
 0x238   : > { %v953_v44 = vpop.permute.xlu0 %952 }
 0x23c   : > { %v1085_v45 = vpop.permute.xlu0 %1084 }
 0x23f   : > { %v3141_v46 = vpop.eup %3140 }
 0x240   : > { %v646_v47 = vsel %vm320_vm3, %v3141_v46, 0.0  ;;  %v951_v49 = vpop.permute.xlu0 %950 }
 0x241   : > { %647 = vadd.xlane.f32.xlu1 %v646_v47 }
 0x244   : > { %v1038_v50 = vpop.permute.xlu0 %1037 }
 0x245   : > { %v1040_v51 = vsel %vm397_vm2, %v1038_v50, 0.0 }
 0x246   : > { %1041 = vadd.xlane.f32.xlu0 %v1040_v51 }
 0x24a   : > { %1179 = vadd.xlane.f32.xlu0 %v1178_v55 }
 0x24e   : > { %1182 = vadd.xlane.f32.xlu0 %v1181_v57 }
 0x252   : > { %1082 = vrot.lane.b32.xlu1 %v3260_v1, %s3183_s29  ;;  %1185 = vadd.xlane.f32.xlu0 %v1184_v61 }
 0x256   : > { %1031 = vrot.lane.b32.xlu1 %v3265_v2, %s3183_s29  ;;  %1191 = vadd.xlane.f32.xlu0 %v1190_v62  ;;  %s3194_s29 = smov 92  }
 0x25a   : > { %1194 = vadd.xlane.f32.xlu0 %v1193_v4 }
 0x270   : > { %1206 = vperm.xlu0 %3136, %v3320_v21  }
 0x27a   : > { %1176 = vadd.xlane.f32.xlu1 %v1175_v7 }
 0x27e   : > { %1188 = vadd.xlane.f32.xlu1 %v1187_v10 }
 0x2ce   : > { %v648_v13 = vpop.xlane.xlu1 %647 }
 0x2cf   : > { %3142 = vrcp.f32 %v648_v13 }
 0x2d2   : > { %v1083_v15 = vpop.permute.xlu1 %1082 }
 0x2d3   : > { %v1042_v25 = vpop.xlane.xlu0 %1041 }
 0x2d6   : > { %v1032_v18 = vpop.permute.xlu1 %1031 }
 0x2d7   : > { %v1034_v19 = vsel %vm397_vm2, %v1032_v18, 0.0  ;;  %v1180_v27 = vpop.xlane.xlu0 %1179 }
 0x2d8   : > { %1035 = vadd.xlane.f32.xlu1 %v1034_v19 }
 0x2d9   : > { %v3143_v20 = vpop.eup %3142 }
 0x2da   : > { %v3422_v24 = vmul.f32 %v3143_v20, %v3141_v46 }
 0x2db   : > { %v1183_v28 = vpop.xlane.xlu0 %1182 }
 0x2dc   : > { %3038 = vmatmul.mubr.msk.f32.vlgmr.msra.gmra.mrb[2].mxu1 %vm320_vm3, %v3422_v24  ;;  %1197 = vadd.xlane.f32.xlu1 %v1196_v23 }
 0x2dd   : > { %3033 = vmatmul.mubr.msk.f32.vlgmr.msra.gmra.mrb[2].mxu0 %vm320_vm3, %v3422_v24  ;;  %3046 = vmatpush3.xpose.msk.msra.mxu1 %vm397_vm2, %v1085_v45 }
 0x2de   : > { %3041 = vmatpush3.xpose.msk.msra.mxu0 %vm320_vm3, %v953_v44  ;;  %3042 = vmatprep.mubr.msk.f32.mxu0 %vm3174_vm0, %v3173_v0 }
 0x2df   : > { %3047 = vmatprep.mubr.msk.f32.mxu1 %vm3174_vm0, %v3173_v0  ;;  %3055 = vmatprep.subr.mxu1 %v3173_v0  ;;  %v1186_v29 = vpop.xlane.xlu0 %1185 }
 0x2e0   : > { %3048 = vmatmul.mubr.msk.f32.vlgmr.msra.gmra.mrb[4].mxu1 %vm397_vm2, %v1083_v15  ;;  %3050 = vmatprep.subr.mxu0 %v3173_v0 }
 0x2e1   : > { %3043 = vmatmul.mubr.msk.f32.vlgmr.msra.gmra.mrb[4].mxu0 %vm320_vm3, %v951_v49  ;;  %3057 = vmatprep.mubr.msk.f32.mxu1 %vm3174_vm0, %v3173_v0 }
 0x2e2   : > { %3052 = vmatprep.mubr.msk.f32.mxu0 %vm3174_vm0, %v3173_v0 }
 0x2e3   : > { %v1192_v30 = vpop.xlane.xlu0 %1191 }
 0x2e7   : > { %v1195_v31 = vpop.xlane.xlu0 %1194 }
 0x2ef   : > { %v1207_v35 = vpop.permute.xlu0 %1206 }
 0x2f0   : > { %v1210_v38 = vadd.f32 %v1207_v35, %v1180_v27  ;;  %v1211_v39 = vadd.f32 %v1207_v35, %v1183_v28  ;;  %v1212_v43 = vadd.f32 %v1207_v35, %v1186_v29  ;;  %v1214_v51 = vadd.f32 %v1207_v35, %v1192_v30 }
 0x2f1   : > { %v1215_v57 = vadd.f32 %v1207_v35, %v1195_v31 }
 0x2f2   : > { %v1232_v41 = vrot.slane %v1210_v38, %v3358_v53  ;;  %v1236_v44 = vrot.slane %v1211_v39, %v3358_v53  ;;  %v1240_v49 = vrot.slane %v1212_v43, %v3358_v53  ;;  %v1248_v60 = vrot.slane %v1214_v51, %v3358_v53 }
 0x2f3   : > { %v1252_v7 = vrot.slane %v1215_v57, %v3358_v53 }
 0x307   : > { %v1177_v33 = vpop.xlane.xlu1 %1176 }
 0x308   : > { %v1209_v37 = vadd.f32 %v1207_v35, %v1177_v33 }
 0x30a   : > { %v1228_v40 = vrot.slane %v1209_v37, %v3358_v53 }
 0x30b   : > { %v1189_v36 = vpop.xlane.xlu1 %1188 }
 0x30c   : > { %v1257_v45 = vsel %vm623_vm4, %v1232_v41, %v1228_v40  ;;  %v1213_v46 = vadd.f32 %v1207_v35, %v1189_v36 }
 0x30d   : > { %v1258_v50 = vsel %vm625_vm5, %v1236_v44, %v1257_v45 }
 0x30e   : > { %v1244_v52 = vrot.slane %v1213_v46, %v3358_v53  ;;  %v1259_v55 = vsel %vm627_vm6, %v1240_v49, %v1258_v50  ;;  %v2971_v46 = vld [vmem:[%s3887_s4 + $0x2] ss:$0 sm:$0xff] }
 0x30f   : > { %1043 = vxpose.xlu1.b32.start.end [1/1] (short) (narrow) %v1042_v25, 8  ;;  %v1802_v50 = vmul.f32 %v2971_v46, %v3324_v22  ;;  %v1800_v57 = vmul.f32 %v2971_v46, %v3290_v5 }
 0x310   : > { %v1260_v63 = vsel %vm629_vm7, %v1244_v52, %v1259_v55  ;;  %v1804_v52 = vmul.f32 %v2971_v46, %v3328_v26  ;;  %v3189_v55 = vmov 2  }
 0x311   : > { %v1261_v13 = vsel %vm631_vm8, %v1248_v60, %v1260_v63  ;;  %v1814_v51 = vsel %vm538_vm1, %v1802_v50, 0.0  ;;  %v1806_v63 = vmul.f32 %v2971_v46, %v3312_v17 }
 0x312   : > { %v1262_v25 = vsel %vm633_vm9, %v1252_v7, %v1261_v13  ;;  %v1807_v13 = vmul.f32 %v2971_v46, %v3345_v32 }
 0x32d   : > { %1360 = vrot.lane.b32.xlu1 %v3260_v1, %s3185_s11  ;;  %s3197_s11 = smov 124  }
 0x32e   : > { %3137 = vset.pattern.permute.xlu1 %v3189_v55 }
 0x365   : > { %v1036_v42 = vpop.xlane.xlu1 %1035 }
 0x369   : > { %v1198_v47 = vpop.xlane.xlu1 %1197 }
 0x36a   : > { %v1216_v4 = vadd.f32 %v1207_v35, %v1198_v47  ;;  %v1801_v47 = vmul.f32 %v2971_v46, %v3297_v8 }
 0x36c   : > { %v1256_v20 = vrot.slane %v1216_v4, %v3358_v53  ;;  %v1811_v49 = vsel %vm538_vm1, %v1801_v47, 0.0  ;;  %v1826_v4 = vsel %vm538_vm1, %v1806_v63, 0.0 }
 0x36e   : > { %v1263_v28 = vsel %vm635_vm10, %v1256_v20, %v1262_v25 }
 0x38f   : > { %v1059_v54 = vpop.trf.xlu1 }
 0x390   : > { %v1078_v61 = vrot.slane %v1059_v54, %v3369_v12  ;;  %v1820_v54 = vsel %vm538_vm1, %v1804_v52, 0.0 }
 0x392   : > { %v1079_v15 = vadd.f32 %v1078_v61, %v1036_v42  ;;  %v1805_v61 = vmul.f32 %v2971_v46, %v3307_v14 }
 0x39f   : > { %v1361_v33 = vpop.permute.xlu1 %1360 }
 0x3a0   : > { %3056 = vmatpush3.msra.mxu1 %v1361_v33 }
 0x3a1   : > { %3065 = vmatprep.subr.mxu1 %v3173_v0 }
 0x3af   : > { %v3458_v56 = vpop.f32.mrb[2].mxu1 }
 0x3b0   : > { %v723_v58 = vpop.f32.mrb[2].mxu0  ;;  %v3039_v59 = vpop.f32.mrb[3].mxu1 }
 0x3b1   : > { %727 = vst.msk [vmem:[%s3455_s15] sm:$0xff] %vm320_vm3, %v723_v58  ;;  %v3034_v62 = vpop.f32.mrb[3].mxu0  ;;  %v1808_v58 = vsel %vm538_vm1, %v1800_v57, 0.0  ;;  %v1803_v59 = vmul.f32 %v2971_v46, %v3302_v11 }
 0x3b2   : > { %v1823_v62 = vsel %vm538_vm1, %v1805_v61, 0.0 }
 0x3b3   : > { %v1156_v6 = vpop.f32.mrb[4].mxu1  ;;  %v1817_v60 = vsel %vm538_vm1, %v1803_v59, 0.0 }
 0x3b4   : > { %v1024_v9 = vpop.f32.mrb[4].mxu0  ;;  %v3049_v10 = vpop.f32.mrb[5].mxu1  ;;  %v1160_v19 = vmul.f32 2.0, %v1156_v6 }
 0x3b5   : > { %v1028_v16 = vmul.f32 0.20412415, %v1024_v9  ;;  %v3044_v18 = vpop.f32.mrb[5].mxu0 }
 0x3b6   : > { %v1829_v18 = vsel %vm538_vm1, %v1807_v13, 0.0 }
 0x3b7   : > { %v1080_v23 = vsub.f32 %v1028_v16, %v1079_v15 }
 0x3b9   : > { %v1161_v27 = vadd.f32 %v1160_v19, %v1080_v23 }
 0x3bb   : > { %v1265_v29 = vadd.f32 %v1263_v28, %v1161_v27 }
 0x3bd   : > { %v1266_v30 = vadd.f32 %v1265_v29, %v3383_v34 }
 0x3bf   : > { %v1267_v31 = vsel %vm320_vm3, %v1266_v30, -inf }
 0x3c0   : > { %1268 = vmax.xlane.f32.xlu0 %v1267_v31 }
 0x3d6   : > { %1278 = vrot.lane.b32.xlu0 %v3275_v3, %s3186_s22 }
 0x3da   : > { %1585 = vrot.lane.b32.xlu0 %v3275_v3, %s3175_s7 }
 0x3de   : > { %1717 = vrot.lane.b32.xlu0 %v3260_v1, %s3186_s22 }
 0x3e2   : > { %1583 = vrot.lane.b32.xlu0 %v3275_v3, %s3187_s23 }
 0x3e6   : > { %1670 = vrot.lane.b32.xlu0 %v3265_v2, %s3186_s22 }
 0x44d   : > { %v1269_v35 = vpop.xlane.xlu0 %1268 }
 0x44e   : > { %v1270_v36 = vsub.f32 %v1266_v30, %v1269_v35 }
 0x450   : > { %v1271_v37 = vmul.f32 1.442695, %v1270_v36 }
 0x451   : > { %v1279_v38 = vpop.permute.xlu0 %1278 }
 0x452   : > { %3144 = vpow2.f32 %v1271_v37  ;;  %3051 = vmatpush3.msra.mxu0 %v1279_v38 }
 0x453   : > { %3060 = vmatprep.subr.mxu0 %v3173_v0 }
 0x455   : > { %v1586_v39 = vpop.permute.xlu0 %1585 }
 0x459   : > { %v1718_v40 = vpop.permute.xlu0 %1717 }
 0x45c   : > { %v3145_v41 = vpop.eup %3144 }
 0x45d   : > { %v1273_v42 = vsel %vm320_vm3, %v3145_v41, 0.0  ;;  %v1584_v43 = vpop.permute.xlu0 %1583 }
 0x45e   : > { %1274 = vadd.xlane.f32.xlu1 %v1273_v42 }
 0x461   : > { %v1671_v44 = vpop.permute.xlu0 %1670 }
 0x462   : > { %v1673_v45 = vsel %vm397_vm2, %v1671_v44, 0.0 }
 0x463   : > { %1674 = vadd.xlane.f32.xlu0 %v1673_v45 }
 0x467   : > { %1812 = vadd.xlane.f32.xlu0 %v1811_v49 }
 0x46b   : > { %1815 = vadd.xlane.f32.xlu0 %v1814_v51 }
 0x46f   : > { %1715 = vrot.lane.b32.xlu1 %v3260_v1, %s3188_s19  ;;  %1821 = vadd.xlane.f32.xlu0 %v1820_v54 }
 0x473   : > { %1664 = vrot.lane.b32.xlu1 %v3265_v2, %s3188_s19 }
 0x497   : > { %1809 = vadd.xlane.f32.xlu1 %v1808_v58 }
 0x49b   : > { %1818 = vadd.xlane.f32.xlu1 %v1817_v60 }
 0x49f   : > { %1824 = vadd.xlane.f32.xlu1 %v1823_v62 }
 0x4a3   : > { %1827 = vadd.xlane.f32.xlu1 %v1826_v4 }
 0x4b4   : > { %1839 = vperm.xlu1 %3137, %v3320_v21  }
 0x4eb   : > { %v1275_v6 = vpop.xlane.xlu1 %1274 }
 0x4ec   : > { %3146 = vrcp.f32 %v1275_v6 }
 0x4ef   : > { %v1716_v7 = vpop.permute.xlu1 %1715 }
 0x4f0   : > { %v1675_v19 = vpop.xlane.xlu0 %1674 }
 0x4f3   : > { %v1665_v9 = vpop.permute.xlu1 %1664 }
 0x4f4   : > { %v1667_v10 = vsel %vm397_vm2, %v1665_v9, 0.0  ;;  %v1813_v25 = vpop.xlane.xlu0 %1812 }
 0x4f5   : > { %1668 = vadd.xlane.f32.xlu0 %v1667_v10 }
 0x4f6   : > { %v3147_v15 = vpop.eup %3146 }
 0x4f7   : > { %v3510_v16 = vmul.f32 %v3147_v15, %v3145_v41 }
 0x4f8   : > { %v1816_v28 = vpop.xlane.xlu0 %1815 }
 0x4f9   : > { %3053 = vmatmul.mubr.msk.f32.vlgmr.msra.gmra.mrb[6].mxu0 %vm320_vm3, %v3510_v16  ;;  %3058 = vmatmul.mubr.msk.f32.vlgmr.msra.gmra.mrb[6].mxu1 %vm320_vm3, %v3510_v16 }
 0x4fa   : > { %3061 = vmatpush3.xpose.msk.msra.mxu0 %vm320_vm3, %v1586_v39  ;;  %3066 = vmatpush3.xpose.msk.msra.mxu1 %vm397_vm2, %v1718_v40 }
 0x4fb   : > { %1830 = vadd.xlane.f32.xlu0 %v1829_v18  ;;  %3062 = vmatprep.mubr.msk.f32.mxu0 %vm3174_vm0, %v3173_v0 }
 0x4fc   : > { %3067 = vmatprep.mubr.msk.f32.mxu1 %vm3174_vm0, %v3173_v0  ;;  %3070 = vmatprep.subr.mxu0 %v3173_v0  ;;  %v1822_v30 = vpop.xlane.xlu0 %1821 }
 0x4fd   : > { %3063 = vmatmul.mubr.msk.f32.vlgmr.msra.gmra.mrb[8].mxu0 %vm320_vm3, %v1584_v43  ;;  %3068 = vmatmul.mubr.msk.f32.vlgmr.msra.gmra.mrb[8].mxu1 %vm397_vm2, %v1716_v7 }
 0x4fe   : > { %3075 = vmatprep.subr.mxu1 %v3173_v0  ;;  %3072 = vmatprep.mubr.msk.f32.mxu0 %vm3174_vm0, %v3173_v0 }
 0x4ff   : > { %3077 = vmatprep.mubr.msk.f32.mxu1 %vm3174_vm0, %v3173_v0 }
 0x524   : > { %v1810_v20 = vpop.xlane.xlu1 %1809 }
 0x528   : > { %1676 = vxpose.xlu0.b32.start.end [1/1] (short) (narrow) %v1675_v19, 8  ;;  %v1819_v23 = vpop.xlane.xlu1 %1818 }
 0x52c   : > { %v1825_v27 = vpop.xlane.xlu1 %1824 }
 0x530   : > { %v1828_v29 = vpop.xlane.xlu1 %1827 }
 0x534   : > { %v1840_v31 = vpop.permute.xlu1 %1839 }
 0x535   : > { %v1842_v33 = vadd.f32 %v1840_v31, %v1810_v20  ;;  %v1843_v35 = vadd.f32 %v1840_v31, %v1813_v25  ;;  %v1844_v37 = vadd.f32 %v1840_v31, %v1816_v28  ;;  %v1845_v40 = vadd.f32 %v1840_v31, %v1819_v23 }
 0x536   : > { %v1846_v44 = vadd.f32 %v1840_v31, %v1822_v30  ;;  %v1847_v47 = vadd.f32 %v1840_v31, %v1825_v27  ;;  %v1848_v52 = vadd.f32 %v1840_v31, %v1828_v29 }
 0x537   : > { %v1861_v38 = vrot.slane %v1842_v33, %v3358_v53  ;;  %v1865_v39 = vrot.slane %v1843_v35, %v3358_v53  ;;  %v1869_v41 = vrot.slane %v1844_v37, %v3358_v53  ;;  %v1873_v45 = vrot.slane %v1845_v40, %v3358_v53 }
 0x538   : > { %v1877_v49 = vrot.slane %v1846_v44, %v3358_v53  ;;  %v1881_v57 = vrot.slane %v1847_v47, %v3358_v53  ;;  %v1885_v63 = vrot.slane %v1848_v52, %v3358_v53 }
 0x539   : > { %v1890_v43 = vsel %vm623_vm4, %v1865_v39, %v1861_v38 }
 0x53a   : > { %v1891_v46 = vsel %vm625_vm5, %v1869_v41, %v1890_v43  ;;  %v3195_v43 = vmov 3  }
 0x53b   : > { %v1892_v51 = vsel %vm627_vm6, %v1873_v45, %v1891_v46  ;;  %3138 = vset.pattern.permute.xlu1 %v3195_v43  ;;  %v2979_v45 = vld [vmem:[%s3887_s4 + $0x3] ss:$0 sm:$0xff] }
 0x53c   : > { %v1893_v61 = vsel %vm629_vm7, %v1877_v49, %v1892_v51  ;;  %v2437_v46 = vmul.f32 %v2979_v45, %v3290_v5  ;;  %v2438_v5 = vmul.f32 %v2979_v45, %v3297_v8 }
 0x53d   : > { %v1894_v7 = vsel %vm631_vm8, %v1881_v57, %v1893_v61  ;;  %v2444_v57 = vmul.f32 %v2979_v45, %v3345_v32  ;;  %v2440_v32 = vmul.f32 %v2979_v45, %v3302_v11  ;;  %v2442_v11 = vmul.f32 %v2979_v45, %v3307_v14 }
 0x53e   : > { %v1895_v23 = vsel %vm633_vm9, %v1885_v63, %v1894_v7  ;;  %v2445_v47 = vsel %vm538_vm1, %v2437_v46, 0.0  ;;  %v2448_v61 = vsel %vm538_vm1, %v2438_v5, 0.0  ;;  %v2443_v7 = vmul.f32 %v2979_v45, %v3312_v17 }
 0x582   : > { %v1669_v36 = vpop.xlane.xlu0 %1668 }
 0x588   : > { %v1831_v42 = vpop.xlane.xlu0 %1830 }
 0x589   : > { %v1849_v62 = vadd.f32 %v1840_v31, %v1831_v42  ;;  %v3557_v31 = vld [vmem:[%s3257_s26 + $0x8] sm:$0xff] }
 0x58b   : > { %v1889_v19 = vrot.slane %v1849_v62, %v3358_v53  ;;  %v2439_v62 = vmul.f32 %v2979_v45, %v3324_v22  ;;  %v2454_v22 = vsel %vm538_vm1, %v2440_v32, 0.0 }
 0x58d   : > { %v1896_v27 = vsel %vm635_vm10, %v1889_v19, %v1895_v23  ;;  %v2451_v8 = vsel %vm538_vm1, %v2439_v62, 0.0 }
 0x5a8   : > { %v1692_v50 = vpop.trf.xlu0 }
 0x5a9   : > { %v1711_v58 = vrot.slane %v1692_v50, %v3369_v12 }
 0x5ab   : > { %v1712_v9 = vadd.f32 %v1711_v58, %v1669_v36  ;;  %v2466_v58 = vsel %vm538_vm1, %v2444_v57, 0.0 }
 0x5cc   : > { %v3539_v54 = vpop.f32.mrb[6].mxu0  ;;  %v3541_v55 = vpop.f32.mrb[6].mxu1 }
 0x5cd   : > { %v3054_v59 = vpop.f32.mrb[7].mxu0  ;;  %v3059_v60 = vpop.f32.mrb[7].mxu1 }
 0x5d0   : > { %v1657_v4 = vpop.f32.mrb[8].mxu0  ;;  %v1789_v6 = vpop.f32.mrb[8].mxu1 }
 0x5d1   : > { %v1661_v10 = vmul.f32 0.20412415, %v1657_v4  ;;  %v3064_v13 = vpop.f32.mrb[9].mxu0  ;;  %v1793_v15 = vmul.f32 2.0, %v1789_v6  ;;  %v3069_v18 = vpop.f32.mrb[9].mxu1  ;;  %v2460_v6 = vsel %vm538_vm1, %v2442_v11, 0.0 }
 0x5d3   : > { %v1713_v20 = vsub.f32 %v1661_v10, %v1712_v9  ;;  %v2463_v9 = vsel %vm538_vm1, %v2443_v7, 0.0 }
 0x5d5   : > { %v1794_v25 = vadd.f32 %v1793_v15, %v1713_v20 }
 0x5d7   : > { %v1898_v28 = vadd.f32 %v1896_v27, %v1794_v25 }
 0x5d9   : > { %v1899_v29 = vadd.f32 %v1898_v28, %v3383_v34 }
 0x5db   : > { %v1900_v30 = vsel %vm320_vm3, %v1899_v29, -inf }
 0x5dc   : > { %1901 = vmax.xlane.f32.xlu1 %v1900_v30 }
 0x5ed   : > { %1911 = vrot.lane.b32.xlu1 %v3275_v3, %s3190_s20 }
 0x5f1   : > { %1994 = vrot.lane.b32.xlu1 %v3260_v1, %s3191_s24 }
 0x5f5   : > { %1996 = vrot.lane.b32.xlu1 %v3557_v31, %s3191_s24 }
 0x5f9   : > { %2222 = vrot.lane.b32.xlu1 %v3275_v3, %s3192_s25 }
 0x5fd   : > { %2354 = vrot.lane.b32.xlu1 %v3260_v1, %s3193_s28 }
 0x601   : > { %2220 = vrot.lane.b32.xlu1 %v3275_v3, %s3188_s19 }
 0x605   : > { %2352 = vrot.lane.b32.xlu1 %v3260_v1, %s3194_s29 }
 0x609   : > { %2301 = vrot.lane.b32.xlu1 %v3265_v2, %s3194_s29 }
 0x669   : > { %v1902_v33 = vpop.xlane.xlu1 %1901 }
 0x66a   : > { %v1903_v35 = vsub.f32 %v1899_v29, %v1902_v33 }
 0x66c   : > { %v1904_v36 = vmul.f32 1.442695, %v1903_v35 }
 0x66d   : > { %v1912_v39 = vpop.permute.xlu1 %1911 }
 0x66e   : > { %3148 = vpow2.f32 %v1904_v36  ;;  %3071 = vmatpush3.msra.mxu0 %v1912_v39 }
 0x66f   : > { %3080 = vmatprep.subr.mxu0 %v3173_v0 }
 0x671   : > { %v1995_v40 = vpop.permute.xlu1 %1994 }
 0x675   : > { %v1997_v3 = vpop.permute.xlu1 %1996 }
 0x676   : > { %v1998_v1 = vsel %vm320_vm3, %v1995_v40, %v1997_v3 }
 0x677   : > { %3076 = vmatpush3.msra.mxu1 %v1998_v1 }
 0x678   : > { %v3149_v37 = vpop.eup %3148  ;;  %3085 = vmatprep.subr.mxu1 %v3173_v0 }
 0x679   : > { %v1906_v38 = vsel %vm320_vm3, %v3149_v37, 0.0  ;;  %v2223_v41 = vpop.permute.xlu1 %2222 }
 0x67a   : > { %1907 = vadd.xlane.f32.xlu0 %v1906_v38 }
 0x67d   : > { %v2355_v42 = vpop.permute.xlu1 %2354 }
 0x681   : > { %v2221_v44 = vpop.permute.xlu1 %2220 }
 0x685   : > { %v2353_v49 = vpop.permute.xlu1 %2352 }
 0x689   : > { %v2302_v51 = vpop.permute.xlu1 %2301 }
 0x68a   : > { %v2304_v52 = vsel %vm397_vm2, %v2302_v51, 0.0 }
 0x690   : > { %2307 = vrot.lane.b32.xlu0 %v3265_v2, %s3193_s28  ;;  %v2441_v2 = vmul.f32 %v2979_v45, %v3328_v26 }
 0x692   : > { %v2457_v50 = vsel %vm538_vm1, %v2441_v2, 0.0 }
 0x6af   : > { %2446 = vadd.xlane.f32.xlu0 %v2445_v47 }
 0x6b3   : > { %2458 = vadd.xlane.f32.xlu0 %v2457_v50 }
 0x6b7   : > { %2305 = vadd.xlane.f32.xlu0 %v2304_v52 }
 0x6bb   : > { %2467 = vadd.xlane.f32.xlu0 %v2466_v58 }
 0x707   : > { %v1908_v59 = vpop.xlane.xlu0 %1907 }
 0x708   : > { %3150 = vrcp.f32 %v1908_v59 }
 0x70b   : > { %v2308_v60 = vpop.permute.xlu0 %2307 }
 0x70c   : > { %v2310_v26 = vsel %vm397_vm2, %v2308_v60, 0.0 }
 0x70d   : > { %2311 = vadd.xlane.f32.xlu1 %v2310_v26 }
 0x711   : > { %2449 = vadd.xlane.f32.xlu1 %v2448_v61 }
 0x712   : > { %v3151_v63 = vpop.eup %3150 }
 0x713   : > { %v3588_v4 = vmul.f32 %v3151_v63, %v3149_v37 }
 0x715   : > { %3073 = vmatmul.mubr.msk.f32.vlgmr.msra.gmra.mrb[10].mxu0 %vm320_vm3, %v3588_v4  ;;  %3078 = vmatmul.mubr.msk.f32.vlgmr.msra.gmra.mrb[10].mxu1 %vm320_vm3, %v3588_v4 }
 0x716   : > { %3081 = vmatpush3.xpose.msk.msra.mxu0 %vm320_vm3, %v2223_v41  ;;  %3086 = vmatpush3.xpose.msk.msra.mxu1 %vm397_vm2, %v2355_v42 }
 0x717   : > { %3082 = vmatprep.mubr.msk.f32.mxu0 %vm3174_vm0, %v3173_v0  ;;  %3087 = vmatprep.mubr.msk.f32.mxu1 %vm3174_vm0, %v3173_v0 }
 0x718   : > { %2452 = vadd.xlane.f32.xlu1 %v2451_v8  ;;  %3090 = vmatprep.subr.mxu0 %v3173_v0 }
 0x719   : > { %3083 = vmatmul.mubr.msk.f32.vlgmr.msra.gmra.mrb[12].mxu0 %vm320_vm3, %v2221_v44  ;;  %3088 = vmatmul.mubr.msk.f32.vlgmr.msra.gmra.mrb[12].mxu1 %vm397_vm2, %v2353_v49  ;;  %vm2074_vm2 = vcmask 556480  }
 0x71a   : > { %3095 = vmatprep.subr.mxu1 %v3173_v0  ;;  %3092 = vmatprep.mubr.msk.f32.mxu0 %vm3174_vm0, %v3173_v0 }
 0x71b   : > { %3097 = vmatprep.mubr.msk.f32.mxu1 %vm3174_vm0, %v3173_v0  ;;  %vm1991_vm0 = vcmask 195712  }
 0x71c   : > { %2455 = vadd.xlane.f32.xlu1 %v2454_v22 }
 0x720   : > { %2461 = vadd.xlane.f32.xlu1 %v2460_v6 }
 0x724   : > { %2464 = vadd.xlane.f32.xlu1 %v2463_v9  ;;  %v3156_v9 = vld [vmem:[%s3272_s30] sm:$0xff]  ;;  %s3198_s30 = smov 16  }
 0x735   : > { %2476 = vperm.xlu1 %3138, %v3320_v21  }
 0x73c   : > { %v2447_v21 = vpop.xlane.xlu0 %2446 }
 0x740   : > { %v2459_v37 = vpop.xlane.xlu0 %2458 }
 0x744   : > { %v2306_v42 = vpop.xlane.xlu0 %2305 }
 0x748   : > { %v2468_v47 = vpop.xlane.xlu0 %2467 }
 0x79a   : > { %v2312_v14 = vpop.xlane.xlu1 %2311 }
 0x79b   : > { %2313 = vxpose.xlu0.b32.start.end [1/1] (short) (narrow) %v2312_v14, 8  ;;  %v3645_v14 = vsub.s32 1, %v3355_v48 }
 0x79e   : > { %v2450_v10 = vpop.xlane.xlu1 %2449 }
 0x7a5   : > { %v2453_v25 = vpop.xlane.xlu1 %2452 }
 0x7a9   : > { %v2456_v27 = vpop.xlane.xlu1 %2455 }
 0x7ad   : > { %v2462_v28 = vpop.xlane.xlu1 %2461 }
 0x7b1   : > { %v2465_v29 = vpop.xlane.xlu1 %2464 }
 0x7b5   : > { %v2477_v30 = vpop.permute.xlu1 %2476 }
 0x7b6   : > { %v2479_v33 = vadd.f32 %v2477_v30, %v2447_v21  ;;  %v2480_v35 = vadd.f32 %v2477_v30, %v2450_v10  ;;  %v2481_v36 = vadd.f32 %v2477_v30, %v2453_v25  ;;  %v2482_v40 = vadd.f32 %v2477_v30, %v2456_v27 }
 0x7b7   : > { %v2483_v41 = vadd.f32 %v2477_v30, %v2459_v37  ;;  %v2484_v45 = vadd.f32 %v2477_v30, %v2462_v28  ;;  %v2485_v49 = vadd.f32 %v2477_v30, %v2465_v29  ;;  %v2486_v52 = vadd.f32 %v2477_v30, %v2468_v47  ;;  %v3704_v47 = vld [vmem:[%s3287_s12 + $0x8] sm:$0xff] }
 0x7b8   : > { %v2498_v38 = vrot.slane %v2479_v33, %v3358_v53  ;;  %v2502_v39 = vrot.slane %v2480_v35, %v3358_v53  ;;  %v2506_v3 = vrot.slane %v2481_v36, %v3358_v53  ;;  %v3650_v10 = vsub.s32 2, %v3355_v48 }
 0x7b9   : > { %v2514_v46 = vrot.slane %v2483_v41, %v3358_v53  ;;  %v2518_v50 = vrot.slane %v2484_v45, %v3358_v53  ;;  %v2522_v59 = vrot.slane %v2485_v49, %v3358_v53  ;;  %v2526_v62 = vrot.slane %v2486_v52, %v3358_v53  ;;  %v3708_v49 = vld [vmem:[%s3287_s12 + $0x10] sm:$0xff] }
 0x7ba   : > { %v2527_v1 = vsel %vm623_vm4, %v2502_v39, %v2498_v38  ;;  %v3680_v37 = vsub.s32 4, %v3355_v48  ;;  %v1449_v39 = vrot.slane %v3510_v16, %v3645_v14 }
 0x7bb   : > { %v2528_v44 = vsel %vm625_vm5, %v2506_v3, %v2527_v1 }
 0x7bc   : > { %v838_v38 = vrot.slane %v3422_v24, %v3680_v37  ;;  %v2107_v1 = vrot.slane %v3588_v4, %v3680_v37 }
 0x7c4   : > { %3139 = vset.pattern.permute.xlu0 %v3195_v43  ;;  %v2510_v43 = vrot.slane %v2482_v40, %v3358_v53  ;;  %v810_v53 = vrot.slane %v3422_v24, %v3369_v12 }
 0x7c6   : > { %v2529_v2 = vsel %vm627_vm6, %v2510_v43, %v2528_v44 }
 0x7c7   : > { %v2530_v51 = vsel %vm629_vm7, %v2514_v46, %v2529_v2 }
 0x7c8   : > { %v2531_v5 = vsel %vm631_vm8, %v2518_v50, %v2530_v51  ;;  %v3712_v51 = vld [vmem:[%s3287_s12] sm:$0xff] }
 0x7c9   : > { %v2532_v8 = vsel %vm633_vm9, %v2522_v59, %v2531_v5 }
 0x7ca   : > { %v2533_v22 = vsel %vm635_vm10, %v2526_v62, %v2532_v8  ;;  %v3724_v62 = vld [vmem:[%s3287_s12 + $0x28] sm:$0xff] }
 0x7e8   : > { %v3616_v13 = vpop.f32.mrb[10].mxu0  ;;  %v3618_v15 = vpop.f32.mrb[10].mxu1 }
 0x7e9   : > { %v3074_v0 = vpop.f32.mrb[11].mxu0  ;;  %v3079_v18 = vpop.f32.mrb[11].mxu1 }
 0x7ea   : > { %v3655_v0 = vsub.s32 3, %v3355_v48  ;;  %v3660_v18 = vsub.s32 5, %v3355_v48 }
 0x7ec   : > { %v2294_v19 = vpop.f32.mrb[12].mxu0  ;;  %v2426_v20 = vpop.f32.mrb[12].mxu1  ;;  %v1463_v40 = vrot.slane %v3510_v16, %v3655_v0  ;;  %v1477_v3 = vrot.slane %v3510_v16, %v3660_v18 }
 0x7ed   : > { %v3084_v23 = vpop.f32.mrb[13].mxu0  ;;  %v3089_v17 = vpop.f32.mrb[13].mxu1  ;;  %v2298_v60 = vmul.f32 0.20412415, %v2294_v19  ;;  %v2430_v61 = vmul.f32 2.0, %v2426_v20  ;;  %v845_v19 = vrot.slane %v3422_v24, %v3660_v18  ;;  %v3665_v20 = vsub.s32 6, %v3355_v48 }
 0x7ee   : > { %v3670_v17 = vsub.s32 7, %v3355_v48 }
 0x7ef   : > { %v852_v23 = vrot.slane %v3422_v24, %v3665_v20  ;;  %v2121_v41 = vrot.slane %v3588_v4, %v3665_v20 }
 0x7f0   : > { %v859_v25 = vrot.slane %v3422_v24, %v3670_v17  ;;  %v1491_v48 = vrot.slane %v3510_v16, %v3670_v17 }
 0x81b   : > { %v2329_v57 = vpop.trf.xlu0 }
 0x81c   : > { %v2348_v58 = vrot.slane %v2329_v57, %v3369_v12  ;;  %v3716_v57 = vld [vmem:[%s3287_s12 + $0x18] sm:$0xff] }
 0x81e   : > { %v2349_v26 = vadd.f32 %v2348_v58, %v2306_v42 }
 0x820   : > { %v2350_v63 = vsub.f32 %v2298_v60, %v2349_v26 }
 0x822   : > { %v2431_v32 = vadd.f32 %v2430_v61, %v2350_v63 }
 0x824   : > { %v2535_v11 = vadd.f32 %v2533_v22, %v2431_v32  ;;  %v3728_v32 = vld [vmem:[%s3287_s12 + $0x30] sm:$0xff] }
 0x826   : > { %v2536_v6 = vadd.f32 %v2535_v11, %v3383_v34  ;;  %v817_v34 = vrot.slane %v3422_v24, %v3645_v14 }
 0x828   : > { %v2537_v7 = vsel %vm320_vm3, %v2536_v6, -inf }
 0x829   : > { %2538 = vmax.xlane.f32.xlu1 %v2537_v7 }
 0x83a   : > { %2548 = vrot.lane.b32.xlu1 %v3156_v9, %s3196_s10 }
 0x83e   : > { %2631 = vrot.lane.b32.xlu1 %v3557_v31, %s3197_s11  ;;  %v824_v31 = vrot.slane %v3422_v24, %v3650_v10 }
 0x842   : > { %802 = vrot.lane.b32.xlu1 %v3458_v56, %s3178_s17  ;;  %v831_v56 = vrot.slane %v3422_v24, %v3655_v0  ;;  %v2079_v24 = vrot.slane %v3588_v4, %v3369_v12 }
 0x846   : > { %812 = vbcast.lane.b32.xlu1 %v810_v53, 256 }
 0x84a   : > { %819 = vbcast.lane.b32.xlu1 %v817_v34, 256 }
 0x84e   : > { %826 = vbcast.lane.b32.xlu1 %v824_v31, 256 }
 0x852   : > { %833 = vbcast.lane.b32.xlu1 %v831_v56, 256 }
 0x856   : > { %847 = vbcast.lane.b32.xlu1 %v845_v19, 256 }
 0x85a   : > { %854 = vbcast.lane.b32.xlu1 %v852_v23, 256 }
 0x85e   : > { %861 = vbcast.lane.b32.xlu1 %v859_v25, 256 }
 0x8b6   : > { %v2539_v27 = vpop.xlane.xlu1 %2538 }
 0x8b7   : > { %v2540_v28 = vsub.f32 %v2536_v6, %v2539_v27  ;;  %v3732_v6 = vld [vmem:[%s3287_s12 + $0x38] sm:$0xff] }
 0x8b9   : > { %v2541_v29 = vmul.f32 1.442695, %v2540_v28 }
 0x8ba   : > { %v2549_v30 = vpop.permute.xlu1 %2548 }
 0x8bb   : > { %3152 = vpow2.f32 %v2541_v29  ;;  %3091 = vmatpush3.msra.mxu0 %v2549_v30 }
 0x8be   : > { %v2632_v21 = vpop.permute.xlu1 %2631 }
 0x8bf   : > { %3096 = vmatpush3.msra.mxu1 %v2632_v21 }
 0x8c2   : > { %v803_v33 = vpop.permute.xlu1 %802 }
 0x8c3   : > { %806 = vst.msk [vmem:[%s3455_s15] sm:$0xff] %vm805_vm11, %v803_v33  ;;  %vm2628_vm11 = vcmask 261312  }
 0x8c5   : > { %v3675_v35 = vpop.eup %3152 }
 0x8c6   : > { %v2543_v36 = vsel %vm320_vm3, %v3675_v35, 0.0 }
 0x8c7   : > { %2544 = vadd.xlane.f32.xlu0 %v2543_v36 }
 0x8dd   : > { %840 = vbcast.lane.b32.xlu0 %v838_v38, 256 }
 0x8e1   : > { %1434 = vrot.lane.b32.xlu0 %v3541_v55, %s3193_s28  ;;  %v2093_v55 = vrot.slane %v3588_v4, %v3650_v10 }
 0x8e5   : > { %1451 = vbcast.lane.b32.xlu0 %v1449_v39, 256 }
 0x8e9   : > { %1465 = vbcast.lane.b32.xlu0 %v1463_v40, 256 }
 0x8ed   : > { %1479 = vbcast.lane.b32.xlu0 %v1477_v3, 256 }
 0x8f1   : > { %1493 = vbcast.lane.b32.xlu0 %v1491_v48, 256 }
 0x8f5   : > { %1988 = vrot.lane.b32.xlu0 %v3616_v13, %s3198_s30  ;;  %v813_v13 = vpop.permute.xlu1 %812 }
 0x8f6   : > { %v863_v52 = vmul.f32 %v3712_v51, %v813_v13 }
 0x8f8   : > { %v871_v26 = vsel %vm538_vm1, %v863_v52, 0.0 }
 0x8f9   : > { %2081 = vbcast.lane.b32.xlu0 %v2079_v24, 256  ;;  %v820_v42 = vpop.permute.xlu1 %819  ;;  %v872_v9 = vrot.slane %v871_v26, 4 }
 0x8fa   : > { %v864_v2 = vmul.f32 %v3704_v47, %v820_v42 }
 0x8fb   : > { %v873_v25 = vadd.f32 %v872_v9, %v871_v26 }
 0x8fc   : > { %v878_v59 = vsel %vm538_vm1, %v864_v2, 0.0 }
 0x8fd   : > { %2095 = vbcast.lane.b32.xlu0 %v2093_v55, 256  ;;  %v827_v43 = vpop.permute.xlu1 %826  ;;  %v879_v8 = vrot.slane %v878_v59, 4  ;;  %v874_v38 = vrot.slane %v873_v25, 2 }
 0x8fe   : > { %v865_v50 = vmul.f32 %v3708_v49, %v827_v43 }
 0x8ff   : > { %v880_v31 = vadd.f32 %v879_v8, %v878_v59  ;;  %v875_v42 = vadd.f32 %v874_v38, %v873_v25 }
 0x900   : > { %v885_v5 = vsel %vm538_vm1, %v865_v50, 0.0 }
 0x901   : > { %2109 = vbcast.lane.b32.xlu0 %v2107_v1, 256  ;;  %v834_v44 = vpop.permute.xlu1 %833  ;;  %v886_v11 = vrot.slane %v885_v5, 4  ;;  %v881_v21 = vrot.slane %v880_v31, 2  ;;  %v3739_v1 = vld [vmem:[%s3287_s12 + $0x20] sm:$0xff] }
 0x902   : > { %v866_v58 = vmul.f32 %v3716_v57, %v834_v44 }
 0x903   : > { %v887_v19 = vadd.f32 %v886_v11, %v885_v5  ;;  %v882_v24 = vadd.f32 %v881_v21, %v880_v31 }
 0x904   : > { %v892_v61 = vsel %vm538_vm1, %v866_v58, 0.0 }
 0x905   : > { %2123 = vbcast.lane.b32.xlu0 %v2121_v41, 256  ;;  %v848_v45 = vpop.permute.xlu1 %847  ;;  %v893_v53 = vrot.slane %v892_v61, 4  ;;  %v888_v36 = vrot.slane %v887_v19, 2  ;;  %v883_v50 = vrot.slane %v882_v24, 1 }
 0x906   : > { %v868_v63 = vmul.f32 %v3724_v62, %v848_v45 }
 0x907   : > { %v894_v27 = vadd.f32 %v893_v53, %v892_v61  ;;  %v889_v13 = vadd.f32 %v888_v36, %v887_v19  ;;  %v884_v11 = vadd.f32 %v883_v50, %v882_v24  ;;  %v1470_v24 = vrot.slane %v3510_v16, %v3680_v37 }
 0x908   : > { %v906_v34 = vsel %vm538_vm1, %v868_v63, 0.0 }
 0x909   : > { %v855_v46 = vpop.permute.xlu1 %854  ;;  %v907_v28 = vrot.slane %v906_v34, 4  ;;  %v895_v39 = vrot.slane %v894_v27, 2  ;;  %v890_v58 = vrot.slane %v889_v13, 1 }
 0x90a   : > { %v869_v22 = vmul.f32 %v3728_v32, %v855_v46 }
 0x90b   : > { %v908_v40 = vadd.f32 %v907_v28, %v906_v34  ;;  %v896_v43 = vadd.f32 %v895_v39, %v894_v27  ;;  %v891_v9 = vadd.f32 %v890_v58, %v889_v13 }
 0x90c   : > { %v913_v56 = vsel %vm538_vm1, %v869_v22, 0.0 }
 0x90d   : > { %v862_v60 = vpop.permute.xlu1 %861  ;;  %v914_v29 = vrot.slane %v913_v56, 4  ;;  %v909_v44 = vrot.slane %v908_v40, 2  ;;  %v897_v26 = vrot.slane %v896_v43, 1 }
 0x90e   : > { %v870_v7 = vmul.f32 %v3732_v6, %v862_v60  ;;  %v876_v60 = vrot.slane %v875_v42, 1 }
 0x90f   : > { %v915_v3 = vadd.f32 %v914_v29, %v913_v56  ;;  %v910_v61 = vadd.f32 %v909_v44, %v908_v40  ;;  %v898_v31 = vadd.f32 %v897_v26, %v896_v43 }
 0x910   : > { %v920_v23 = vsel %vm538_vm1, %v870_v7, 0.0  ;;  %v877_v34 = vadd.f32 %v876_v60, %v875_v42 }
 0x911   : > { %v921_v33 = vrot.slane %v920_v23, 4  ;;  %v916_v46 = vrot.slane %v915_v3, 2  ;;  %v911_v56 = vrot.slane %v910_v61, 1 }
 0x912   : > { %v935_v25 = vsel %vm623_vm4, %v884_v11, %v877_v34 }
 0x913   : > { %v922_v55 = vadd.f32 %v921_v33, %v920_v23  ;;  %v917_v63 = vadd.f32 %v916_v46, %v915_v3  ;;  %v936_v27 = vsel %vm625_vm5, %v891_v9, %v935_v25  ;;  %v1442_v3 = vrot.slane %v3510_v16, %v3369_v12 }
 0x914   : > { %v937_v29 = vsel %vm627_vm6, %v898_v31, %v936_v27 }
 0x915   : > { %v923_v52 = vrot.slane %v922_v55, 2  ;;  %v918_v19 = vrot.slane %v917_v63, 1 }
 0x917   : > { %v924_v7 = vadd.f32 %v923_v52, %v922_v55  ;;  %v919_v21 = vadd.f32 %v918_v19, %v917_v63  ;;  %v1484_v55 = vrot.slane %v3510_v16, %v3665_v20 }
 0x954   : > { %v2545_v30 = vpop.xlane.xlu0 %2544 }
 0x955   : > { %3154 = vrcp.f32 %v2545_v30  ;;  %v912_v30 = vadd.f32 %v911_v56, %v910_v61 }
 0x958   : > { %v841_v48 = vpop.permute.xlu0 %840 }
 0x959   : > { %v867_v41 = vmul.f32 %v3739_v1, %v841_v48  ;;  %v1456_v48 = vrot.slane %v3510_v16, %v3650_v10 }
 0x95b   : > { %v899_v45 = vsel %vm538_vm1, %v867_v41, 0.0 }
 0x95c   : > { %v900_v2 = vrot.slane %v899_v45, 4  ;;  %v1435_v41 = vpop.permute.xlu0 %1434 }
 0x95e   : > { %v901_v59 = vadd.f32 %v900_v2, %v899_v45 }
 0x95f   : > { %v3155_v5 = vpop.eup %3154 }
 0x960   : > { %v3744_v8 = vmul.f32 %v3155_v5, %v3675_v35  ;;  %v902_v22 = vrot.slane %v901_v59, 2  ;;  %v925_v35 = vrot.slane %v924_v7, 1 }
 0x962   : > { %v903_v53 = vadd.f32 %v902_v22, %v901_v59  ;;  %3093 = vmatmul.mubr.msk.f32.vlgmr.msra.gmra.mrb[14].mxu0 %vm320_vm3, %v3744_v8  ;;  %3098 = vmatmul.mubr.msk.f32.vlgmr.msra.gmra.mrb[14].mxu1 %vm320_vm3, %v3744_v8  ;;  %v926_v36 = vadd.f32 %v925_v35, %v924_v7  ;;  %vm2214_vm3 = vcmask 1048448  }
 0x964   : > { %v904_v23 = vrot.slane %v903_v53, 1 }
 0x966   : > { %v905_v28 = vadd.f32 %v904_v23, %v903_v53 }
 0x968   : > { %v938_v33 = vsel %vm629_vm7, %v905_v28, %v937_v29 }
 0x969   : > { %v939_v38 = vsel %vm631_vm8, %v912_v30, %v938_v33 }
 0x96a   : > { %v940_v39 = vsel %vm633_vm9, %v919_v21, %v939_v38 }
 0x96b   : > { %v941_v40 = vsel %vm635_vm10, %v926_v36, %v940_v39 }
 0x96c   : > { %942 = vrot.lane.b32.xlu1 %v941_v40, %s3175_s7  ;;  %s3199_s7 = smov 24  }
 0x970   : > { %1355 = vrot.lane.b32.xlu1 %v3539_v54, %s3191_s24  ;;  %v1452_v54 = vpop.permute.xlu0 %1451 }
 0x971   : > { %v1496_v42 = vmul.f32 %v3704_v47, %v1452_v54 }
 0x973   : > { %v1510_v45 = vsel %vm538_vm1, %v1496_v42, 0.0 }
 0x974   : > { %1444 = vbcast.lane.b32.xlu1 %v1442_v3, 256  ;;  %v1466_v13 = vpop.permute.xlu0 %1465  ;;  %v1511_v16 = vrot.slane %v1510_v45, 4 }
 0x975   : > { %v1498_v46 = vmul.f32 %v3716_v57, %v1466_v13 }
 0x976   : > { %v1512_v60 = vadd.f32 %v1511_v16, %v1510_v45 }
 0x977   : > { %v1524_v52 = vsel %vm538_vm1, %v1498_v46, 0.0 }
 0x978   : > { %1458 = vbcast.lane.b32.xlu1 %v1456_v48, 256  ;;  %v1480_v43 = vpop.permute.xlu0 %1479  ;;  %v1525_v26 = vrot.slane %v1524_v52, 4  ;;  %v1513_v53 = vrot.slane %v1512_v60, 2 }
 0x979   : > { %v1500_v58 = vmul.f32 %v3724_v62, %v1480_v43 }
 0x97a   : > { %v1526_v34 = vadd.f32 %v1525_v26, %v1524_v52  ;;  %v1514_v29 = vadd.f32 %v1513_v53, %v1512_v60 }
 0x97b   : > { %v1538_v63 = vsel %vm538_vm1, %v1500_v58, 0.0 }
 0x97c   : > { %1472 = vbcast.lane.b32.xlu1 %v1470_v24, 256  ;;  %v1494_v50 = vpop.permute.xlu0 %1493  ;;  %v1539_v31 = vrot.slane %v1538_v63, 4  ;;  %v1527_v30 = vrot.slane %v1526_v34, 2 }
 0x97d   : > { %v1502_v59 = vmul.f32 %v3732_v6, %v1494_v50 }
 0x97e   : > { %v1540_v21 = vadd.f32 %v1539_v31, %v1538_v63  ;;  %v1528_v54 = vadd.f32 %v1527_v30, %v1526_v34 }
 0x97f   : > { %v1552_v11 = vsel %vm538_vm1, %v1502_v59, 0.0 }
 0x980   : > { %1486 = vbcast.lane.b32.xlu1 %v1484_v55, 256  ;;  %v1553_v23 = vrot.slane %v1552_v11, 4  ;;  %v1541_v13 = vrot.slane %v1540_v21, 2  ;;  %v1529_v59 = vrot.slane %v1528_v54, 1 }
 0x982   : > { %v1554_v39 = vadd.f32 %v1553_v23, %v1552_v11  ;;  %v1530_v53 = vadd.f32 %v1529_v59, %v1528_v54 }
 0x984   : > { %v1555_v45 = vrot.slane %v1554_v39, 2 }
 0x986   : > { %v1556_v63 = vadd.f32 %v1555_v45, %v1554_v39  ;;  %v2114_v39 = vrot.slane %v3588_v4, %v3660_v18 }
 0x9de   : > { %v943_v44 = vpop.permute.xlu1 %942 }
 0x9df   : > { %946 = vst.msk [vmem:[%s3455_s15] sm:$0xff] %vm945_vm12, %v943_v44  ;;  %vm2708_vm12 = vcmask 654880  }
 0x9e2   : > { %v1356_v2 = vpop.permute.xlu1 %1355 }
 0x9e3   : > { %1359 = vst.msk [vmem:[%s3455_s15] sm:$0xff] %vm1358_vm13, %v1356_v2 }
 0x9e4   : > { %1438 = vst.msk [vmem:[%s3455_s15] sm:$0xff] %vm1437_vm14, %v1435_v41  ;;  %v1515_v41 = vrot.slane %v1514_v29, 1 }
 0x9e6   : > { %v1445_v5 = vpop.permute.xlu1 %1444  ;;  %v1516_v58 = vadd.f32 %v1515_v41, %v1514_v29 }
 0x9e7   : > { %v1495_v61 = vmul.f32 %v3712_v51, %v1445_v5  ;;  %v1542_v5 = vadd.f32 %v1541_v13, %v1540_v21 }
 0x9e9   : > { %v1503_v22 = vsel %vm538_vm1, %v1495_v61, 0.0  ;;  %v1543_v34 = vrot.slane %v1542_v5, 1 }
 0x9ea   : > { %v1504_v7 = vrot.slane %v1503_v22, 4  ;;  %v1459_v9 = vpop.permute.xlu1 %1458 }
 0x9eb   : > { %v1497_v56 = vmul.f32 %v3708_v49, %v1459_v9 }
 0x9ec   : > { %v1505_v19 = vadd.f32 %v1504_v7, %v1503_v22 }
 0x9ed   : > { %v1517_v25 = vsel %vm538_vm1, %v1497_v56, 0.0 }
 0x9ee   : > { %v1506_v35 = vrot.slane %v1505_v19, 2  ;;  %v1518_v27 = vrot.slane %v1517_v25, 4  ;;  %v1473_v28 = vpop.permute.xlu1 %1472 }
 0x9ef   : > { %v1499_v33 = vmul.f32 %v3739_v1, %v1473_v28 }
 0x9f0   : > { %v1507_v36 = vadd.f32 %v1506_v35, %v1505_v19  ;;  %v1519_v38 = vadd.f32 %v1518_v27, %v1517_v25  ;;  %v1557_v19 = vrot.slane %v1556_v63, 1  ;;  %v1544_v27 = vadd.f32 %v1543_v34, %v1542_v5 }
 0x9f1   : > { %v1531_v40 = vsel %vm538_vm1, %v1499_v33, 0.0 }
 0x9f2   : > { %v1508_v3 = vrot.slane %v1507_v36, 1  ;;  %v1520_v48 = vrot.slane %v1519_v38, 2  ;;  %v1532_v24 = vrot.slane %v1531_v40, 4  ;;  %v1487_v55 = vpop.permute.xlu1 %1486  ;;  %v1558_v29 = vadd.f32 %v1557_v19, %v1556_v63 }
 0x9f3   : > { %v1501_v42 = vmul.f32 %v3728_v32, %v1487_v55 }
 0x9f4   : > { %v1521_v43 = vadd.f32 %v1520_v48, %v1519_v38  ;;  %v1533_v44 = vadd.f32 %v1532_v24, %v1531_v40  ;;  %v1509_v46 = vadd.f32 %v1508_v3, %v1507_v36  ;;  %v2086_v36 = vrot.slane %v3588_v4, %v3645_v14 }
 0x9f5   : > { %v1545_v2 = vsel %vm538_vm1, %v1501_v42, 0.0  ;;  %v2100_v38 = vrot.slane %v3588_v4, %v3655_v0  ;;  %v2128_v40 = vrot.slane %v3588_v4, %v3670_v17  ;;  %v2713_v3 = vrot.slane %v3744_v8, %v3369_v12  ;;  %v1989_v4 = vpop.permute.xlu0 %1988 }
 0x9f6   : > { %v1522_v16 = vrot.slane %v1521_v43, 1  ;;  %v1534_v50 = vrot.slane %v1533_v44, 2  ;;  %v1546_v52 = vrot.slane %v1545_v2, 4  ;;  %v1567_v22 = vsel %vm623_vm4, %v1516_v58, %v1509_v46 }
 0x9f7   : > { %v2741_v48 = vrot.slane %v3744_v8, %v3680_v37  ;;  %v2755_v12 = vrot.slane %v3744_v8, %v3665_v20 }
 0x9f8   : > { %v1523_v60 = vadd.f32 %v1522_v16, %v1521_v43  ;;  %v1535_v26 = vadd.f32 %v1534_v50, %v1533_v44  ;;  %v1547_v61 = vadd.f32 %v1546_v52, %v1545_v2 }
 0x9fa   : > { %v1568_v11 = vsel %vm625_vm5, %v1523_v60, %v1567_v22  ;;  %v1536_v7 = vrot.slane %v1535_v26, 1  ;;  %v1548_v9 = vrot.slane %v1547_v61, 2 }
 0x9fb   : > { %v1569_v23 = vsel %vm627_vm6, %v1530_v53, %v1568_v11 }
 0x9fc   : > { %v1537_v31 = vadd.f32 %v1536_v7, %v1535_v26  ;;  %v1549_v56 = vadd.f32 %v1548_v9, %v1547_v61 }
 0x9fe   : > { %v1550_v25 = vrot.slane %v1549_v56, 1  ;;  %v1570_v35 = vsel %vm629_vm7, %v1537_v31, %v1569_v23 }
 0x9ff   : > { %v1571_v30 = vsel %vm631_vm8, %v1544_v27, %v1570_v35 }
 0xa00   : > { %v1551_v28 = vadd.f32 %v1550_v25, %v1549_v56 }
 0xa02   : > { %v1572_v21 = vsel %vm633_vm9, %v1551_v28, %v1571_v30 }
 0xa03   : > { %v1573_v33 = vsel %vm635_vm10, %v1558_v29, %v1572_v21 }
 0xa04   : > { %1574 = vrot.lane.b32.xlu1 %v1573_v33, %s3176_s8 }
 0xa08   : > { %2071 = vrot.lane.b32.xlu1 %v3618_v15, %s3186_s22  ;;  %v2727_v15 = vrot.slane %v3744_v8, %v3650_v10  ;;  %v2082_v10 = vpop.permute.xlu0 %2081 }
 0xa09   : > { %v2132_v42 = vmul.f32 %v3712_v51, %v2082_v10 }
 0xa0b   : > { %v2140_v44 = vsel %vm538_vm1, %v2132_v42, 0.0 }
 0xa0c   : > { %2088 = vbcast.lane.b32.xlu1 %v2086_v36, 256  ;;  %v2096_v13 = vpop.permute.xlu0 %2095  ;;  %v2141_v46 = vrot.slane %v2140_v44, 4 }
 0xa0d   : > { %v2134_v43 = vmul.f32 %v3708_v49, %v2096_v13 }
 0xa0e   : > { %v2142_v58 = vadd.f32 %v2141_v46, %v2140_v44 }
 0xa0f   : > { %v2154_v20 = vsel %vm538_vm1, %v2134_v43, 0.0 }
 0xa10   : > { %2102 = vbcast.lane.b32.xlu1 %v2100_v38, 256  ;;  %v2110_v37 = vpop.permute.xlu0 %2109  ;;  %v2155_v52 = vrot.slane %v2154_v20, 4  ;;  %v2143_v22 = vrot.slane %v2142_v58, 2 }
 0xa11   : > { %v2136_v2 = vmul.f32 %v3739_v1, %v2110_v37 }
 0xa12   : > { %v2156_v26 = vadd.f32 %v2155_v52, %v2154_v20  ;;  %v2144_v23 = vadd.f32 %v2143_v22, %v2142_v58 }
 0xa13   : > { %v2168_v59 = vsel %vm538_vm1, %v2136_v2, 0.0 }
 0xa14   : > { %2116 = vbcast.lane.b32.xlu1 %v2114_v39, 256  ;;  %v2124_v16 = vpop.permute.xlu0 %2123  ;;  %v2169_v61 = vrot.slane %v2168_v59, 4  ;;  %v2157_v34 = vrot.slane %v2156_v26, 2  ;;  %v2145_v38 = vrot.slane %v2144_v23, 1 }
 0xa15   : > { %v2138_v5 = vmul.f32 %v3728_v32, %v2124_v16 }
 0xa16   : > { %v2170_v31 = vadd.f32 %v2169_v61, %v2168_v59  ;;  %v2158_v30 = vadd.f32 %v2157_v34, %v2156_v26  ;;  %v2146_v13 = vadd.f32 %v2145_v38, %v2144_v23 }
 0xa17   : > { %v2182_v11 = vsel %vm538_vm1, %v2138_v5, 0.0 }
 0xa18   : > { %2130 = vbcast.lane.b32.xlu1 %v2128_v40, 256  ;;  %v2183_v56 = vrot.slane %v2182_v11, 4  ;;  %v2171_v21 = vrot.slane %v2170_v31, 2 }
 0xa1a   : > { %v2184_v33 = vadd.f32 %v2183_v56, %v2182_v11 }
 0xa1c   : > { %2715 = vbcast.lane.b32.xlu1 %v2713_v3, 256 }
 0xa20   : > { %2729 = vbcast.lane.b32.xlu1 %v2727_v15, 256 }
 0xa24   : > { %2743 = vbcast.lane.b32.xlu1 %v2741_v48, 256 }
 0xa35   : > { %v2620_v24 = vpop.f32.mrb[14].mxu0  ;;  %v3811_v55 = vpop.f32.mrb[14].mxu1 }
 0xa36   : > { %v3094_v41 = vpop.f32.mrb[15].mxu0  ;;  %v3099_v54 = vpop.f32.mrb[15].mxu1  ;;  %2625 = vrot.lane.b32.xlu1 %v2620_v24, %s3199_s7 }
 0xa37   : > { %v2159_v54 = vrot.slane %v2158_v30, 1 }
 0xa39   : > { %v2160_v16 = vadd.f32 %v2159_v54, %v2158_v30 }
 0xa3a   : > { %2757 = vbcast.lane.b32.xlu1 %v2755_v12, 256  ;;  %v2172_v12 = vadd.f32 %v2171_v21, %v2170_v31 }
 0xa76   : > { %v1575_v45 = vpop.permute.xlu1 %1574 }
 0xa77   : > { %1578 = vst.msk [vmem:[%s3455_s15] sm:$0xff] %vm1577_vm15, %v1575_v45 }
 0xa78   : > { %1992 = vst.msk [vmem:[%s3455_s15] sm:$0xff] %vm1991_vm0, %v1989_v4  ;;  %v2185_v4 = vrot.slane %v2184_v33, 2 }
 0xa7a   : > { %v2072_v50 = vpop.permute.xlu1 %2071  ;;  %v2186_v52 = vadd.f32 %v2185_v4, %v2184_v33 }
 0xa7b   : > { %2075 = vst.msk [vmem:[%s3455_s15] sm:$0xff] %vm2074_vm2, %v2072_v50  ;;  %v2173_v50 = vrot.slane %v2172_v12, 1 }
 0xa7c   : > { %v2187_v11 = vrot.slane %v2186_v52, 1 }
 0xa7d   : > { %v2174_v22 = vadd.f32 %v2173_v50, %v2172_v12 }
 0xa7e   : > { %v2089_v60 = vpop.permute.xlu1 %2088  ;;  %v2188_v56 = vadd.f32 %v2187_v11, %v2186_v52 }
 0xa7f   : > { %v2133_v63 = vmul.f32 %v3704_v47, %v2089_v60 }
 0xa81   : > { %v2147_v7 = vsel %vm538_vm1, %v2133_v63, 0.0 }
 0xa82   : > { %v2148_v9 = vrot.slane %v2147_v7, 4  ;;  %v2103_v53 = vpop.permute.xlu1 %2102 }
 0xa83   : > { %v2135_v19 = vmul.f32 %v3716_v57, %v2103_v53 }
 0xa84   : > { %v2149_v25 = vadd.f32 %v2148_v9, %v2147_v7 }
 0xa85   : > { %v2161_v35 = vsel %vm538_vm1, %v2135_v19, 0.0 }
 0xa86   : > { %v2150_v27 = vrot.slane %v2149_v25, 2  ;;  %v2162_v28 = vrot.slane %v2161_v35, 4  ;;  %v2117_v29 = vpop.permute.xlu1 %2116 }
 0xa87   : > { %v2137_v36 = vmul.f32 %v3724_v62, %v2117_v29  ;;  %v2762_v29 = vrot.slane %v3744_v8, %v3670_v17 }
 0xa88   : > { %v2151_v39 = vadd.f32 %v2150_v27, %v2149_v25  ;;  %v2163_v40 = vadd.f32 %v2162_v28, %v2161_v35  ;;  %v2720_v35 = vrot.slane %v3744_v8, %v3645_v14  ;;  %v2734_v27 = vrot.slane %v3744_v8, %v3655_v0 }
 0xa89   : > { %v2175_v3 = vsel %vm538_vm1, %v2137_v36, 0.0  ;;  %v2748_v28 = vrot.slane %v3744_v8, %v3660_v18 }
 0xa8a   : > { %v2152_v15 = vrot.slane %v2151_v39, 1  ;;  %v2164_v48 = vrot.slane %v2163_v40, 2  ;;  %v2176_v24 = vrot.slane %v2175_v3, 4  ;;  %v2131_v41 = vpop.permute.xlu1 %2130 }
 0xa8b   : > { %v2139_v10 = vmul.f32 %v3732_v6, %v2131_v41 }
 0xa8c   : > { %v2153_v42 = vadd.f32 %v2152_v15, %v2151_v39  ;;  %v2165_v37 = vadd.f32 %v2164_v48, %v2163_v40  ;;  %v2177_v43 = vadd.f32 %v2176_v24, %v2175_v3 }
 0xa8d   : > { %v2189_v44 = vsel %vm538_vm1, %v2139_v10, 0.0 }
 0xa8e   : > { %v2204_v45 = vsel %vm623_vm4, %v2153_v42, %v2146_v13  ;;  %v2166_v46 = vrot.slane %v2165_v37, 1  ;;  %v2178_v20 = vrot.slane %v2177_v43, 2  ;;  %v2190_v2 = vrot.slane %v2189_v44, 4  ;;  %v2716_v30 = vpop.permute.xlu1 %2715 }
 0xa8f   : > { %v2205_v60 = vsel %vm625_vm5, %v2160_v16, %v2204_v45  ;;  %v2766_v33 = vmul.f32 %v3712_v51, %v2716_v30 }
 0xa90   : > { %v2167_v58 = vadd.f32 %v2166_v46, %v2165_v37  ;;  %v2179_v59 = vadd.f32 %v2178_v20, %v2177_v43  ;;  %v2191_v5 = vadd.f32 %v2190_v2, %v2189_v44 }
 0xa91   : > { %v2774_v18 = vsel %vm538_vm1, %v2766_v33, 0.0 }
 0xa92   : > { %v2206_v26 = vsel %vm627_vm6, %v2167_v58, %v2205_v60  ;;  %v2180_v61 = vrot.slane %v2179_v59, 1  ;;  %v2192_v63 = vrot.slane %v2191_v5, 2  ;;  %v2730_v14 = vpop.permute.xlu1 %2729 }
 0xa93   : > { %v2207_v53 = vsel %vm629_vm7, %v2174_v22, %v2206_v26  ;;  %v2768_v36 = vmul.f32 %v3708_v49, %v2730_v14 }
 0xa94   : > { %v2181_v7 = vadd.f32 %v2180_v61, %v2179_v59  ;;  %v2193_v9 = vadd.f32 %v2192_v63, %v2191_v5 }
 0xa95   : > { %v2788_v39 = vsel %vm538_vm1, %v2768_v36, 0.0 }
 0xa96   : > { %v2194_v34 = vrot.slane %v2193_v9, 1  ;;  %v2208_v31 = vsel %vm631_vm8, %v2181_v7, %v2207_v53  ;;  %v2744_v21 = vpop.permute.xlu1 %2743  ;;  %v2789_v3 = vrot.slane %v2788_v39, 4 }
 0xa97   : > { %v2209_v23 = vsel %vm633_vm9, %v2188_v56, %v2208_v31  ;;  %v2770_v17 = vmul.f32 %v3739_v1, %v2744_v21 }
 0xa98   : > { %v2195_v19 = vadd.f32 %v2194_v34, %v2193_v9  ;;  %v2790_v12 = vadd.f32 %v2789_v3, %v2788_v39 }
 0xa99   : > { %v2802_v49 = vsel %vm538_vm1, %v2770_v17, 0.0 }
 0xa9a   : > { %v2210_v25 = vsel %vm635_vm10, %v2195_v19, %v2209_v23  ;;  %v2803_v4 = vrot.slane %v2802_v49, 4  ;;  %v2791_v45 = vrot.slane %v2790_v12, 2 }
 0xa9b   : > { %2211 = vrot.lane.b32.xlu0 %v2210_v25, %s3187_s23 }
 0xa9c   : > { %v2792_v60 = vadd.f32 %v2791_v45, %v2790_v12 }
 0xa9e   : > { %v2793_v34 = vrot.slane %v2792_v60, 1 }
 0xa9f   : > { %2722 = vbcast.lane.b32.xlu0 %v2720_v35, 256 }
 0xaa0   : > { %v2794_v14 = vadd.f32 %v2793_v34, %v2792_v60 }
 0xaa3   : > { %2736 = vbcast.lane.b32.xlu0 %v2734_v27, 256 }
 0xaa7   : > { %2750 = vbcast.lane.b32.xlu0 %v2748_v28, 256 }
 0xaa8   : > { %v2626_v0 = vpop.permute.xlu1 %2625 }
 0xaab   : > { %2705 = vrot.lane.b32.xlu0 %v3811_v55, %s3181_s27  ;;  %v2775_v55 = vrot.slane %v2774_v18, 4 }
 0xaac   : > { %v2758_v8 = vpop.permute.xlu1 %2757 }
 0xaad   : > { %v2776_v15 = vadd.f32 %v2775_v55, %v2774_v18  ;;  %v2772_v48 = vmul.f32 %v3728_v32, %v2758_v8  ;;  %v2804_v32 = vadd.f32 %v2803_v4, %v2802_v49 }
 0xaaf   : > { %2764 = vbcast.lane.b32.xlu0 %v2762_v29, 256  ;;  %v2777_v1 = vrot.slane %v2776_v15, 2  ;;  %v2816_v13 = vsel %vm538_vm1, %v2772_v48, 0.0  ;;  %v2805_v26 = vrot.slane %v2804_v32, 2 }
 0xab0   : > { %v2817_v46 = vrot.slane %v2816_v13, 4 }
 0xab1   : > { %v2778_v2 = vadd.f32 %v2777_v1, %v2776_v15  ;;  %v2806_v31 = vadd.f32 %v2805_v26, %v2804_v32 }
 0xab2   : > { %v2818_v61 = vadd.f32 %v2817_v46, %v2816_v13 }
 0xab3   : > { %v2779_v63 = vrot.slane %v2778_v2, 1  ;;  %v2807_v21 = vrot.slane %v2806_v31, 1 }
 0xab4   : > { %v2819_v56 = vrot.slane %v2818_v61, 2 }
 0xab5   : > { %v2780_v23 = vadd.f32 %v2779_v63, %v2778_v2  ;;  %v2808_v55 = vadd.f32 %v2807_v21, %v2806_v31 }
 0xab6   : > { %v2820_v33 = vadd.f32 %v2819_v56, %v2818_v61 }
 0xab8   : > { %v2821_v39 = vrot.slane %v2820_v33, 1 }
 0xb0d   : > { %v2212_v38 = vpop.permute.xlu0 %2211 }
 0xb0e   : > { %2215 = vst.msk [vmem:[%s3455_s15] sm:$0xff] %vm2214_vm3, %v2212_v38 }
 0xb0f   : > { %2629 = vst.msk [vmem:[%s3455_s15] sm:$0xff] %vm2628_vm11, %v2626_v0 }
 0xb11   : > { %v2723_v40 = vpop.permute.xlu0 %2722 }
 0xb12   : > { %v2767_v51 = vmul.f32 %v3704_v47, %v2723_v40 }
 0xb14   : > { %v2781_v24 = vsel %vm538_vm1, %v2767_v51, 0.0  ;;  %v2822_v51 = vadd.f32 %v2821_v39, %v2820_v33 }
 0xb15   : > { %v2782_v41 = vrot.slane %v2781_v24, 4  ;;  %v2737_v54 = vpop.permute.xlu0 %2736 }
 0xb16   : > { %v2769_v10 = vmul.f32 %v3716_v57, %v2737_v54 }
 0xb17   : > { %v2783_v42 = vadd.f32 %v2782_v41, %v2781_v24 }
 0xb18   : > { %v2795_v37 = vsel %vm538_vm1, %v2769_v10, 0.0 }
 0xb19   : > { %v2784_v47 = vrot.slane %v2783_v42, 2  ;;  %v2796_v43 = vrot.slane %v2795_v37, 4  ;;  %v2751_v44 = vpop.permute.xlu0 %2750 }
 0xb1a   : > { %v2771_v20 = vmul.f32 %v3724_v62, %v2751_v44 }
 0xb1b   : > { %v2785_v16 = vadd.f32 %v2784_v47, %v2783_v42  ;;  %v2797_v50 = vadd.f32 %v2796_v43, %v2795_v37 }
 0xb1c   : > { %v2809_v57 = vsel %vm538_vm1, %v2771_v20, 0.0 }
 0xb1d   : > { %v2786_v52 = vrot.slane %v2785_v16, 1  ;;  %v2798_v58 = vrot.slane %v2797_v50, 2  ;;  %v2810_v59 = vrot.slane %v2809_v57, 4  ;;  %v2706_v5 = vpop.permute.xlu0 %2705 }
 0xb1e   : > { %2709 = vst.msk [vmem:[%s3455_s15] sm:$0xff] %vm2708_vm12, %v2706_v5 }
 0xb1f   : > { %v2799_v22 = vadd.f32 %v2798_v58, %v2797_v50  ;;  %v2811_v11 = vadd.f32 %v2810_v59, %v2809_v57  ;;  %v2787_v7 = vadd.f32 %v2786_v52, %v2785_v16 }
 0xb21   : > { %v2800_v9 = vrot.slane %v2799_v22, 1  ;;  %v2812_v62 = vrot.slane %v2811_v11, 2  ;;  %v2765_v53 = vpop.permute.xlu0 %2764  ;;  %v2838_v27 = vsel %vm623_vm4, %v2787_v7, %v2780_v23 }
 0xb22   : > { %v2773_v19 = vmul.f32 %v3732_v6, %v2765_v53  ;;  %v2839_v36 = vsel %vm625_vm5, %v2794_v14, %v2838_v27 }
 0xb23   : > { %v2813_v25 = vadd.f32 %v2812_v62, %v2811_v11  ;;  %v2801_v28 = vadd.f32 %v2800_v9, %v2799_v22 }
 0xb24   : > { %v2823_v35 = vsel %vm538_vm1, %v2773_v19, 0.0 }
 0xb25   : > { %v2814_v29 = vrot.slane %v2813_v25, 1  ;;  %v2824_v30 = vrot.slane %v2823_v35, 4  ;;  %v2840_v18 = vsel %vm627_vm6, %v2801_v28, %v2839_v36 }
 0xb26   : > { %v2841_v8 = vsel %vm629_vm7, %v2808_v55, %v2840_v18 }
 0xb27   : > { %v2825_v0 = vadd.f32 %v2824_v30, %v2823_v35  ;;  %v2815_v38 = vadd.f32 %v2814_v29, %v2813_v25 }
 0xb29   : > { %v2826_v6 = vrot.slane %v2825_v0, 2  ;;  %v2842_v40 = vsel %vm631_vm8, %v2815_v38, %v2841_v8 }
 0xb2a   : > { %v2843_v49 = vsel %vm633_vm9, %v2822_v51, %v2842_v40 }
 0xb2b   : > { %v2827_v17 = vadd.f32 %v2826_v6, %v2825_v0 }
 0xb2d   : > { %v2828_v3 = vrot.slane %v2827_v17, 1 }
 0xb2f   : > { %v2829_v15 = vadd.f32 %v2828_v3, %v2827_v17 }
 0xb31   : > { %v2844_v48 = vsel %vm635_vm10, %v2829_v15, %v2843_v49 }
 0xb32   : > { %2846 = vst.msk [vmem:[%s3455_s15 + $0x8] sm:$0xff] %vm538_vm1, %v2844_v48 }
 0xb33 PF: > { %s16_s21 = sadd.s32 1, %s3171_s21  }
 0xb34   : > { %p13_p4 = scmp.ge.s32.totalorder %s16_s21, 4  }
 0xb36   :  { %15 = sbr.rel (!%p13_p4) target bundleno = 1 (0x1), region = 83 }

// kernel: encoder_forward.11
= control target key start
LH: loop header
LB: loop body
LE: loop exit
PB: predicated region body
PF: predicated region fallthrough
CT: control target
= control target key end

     0   :  { %v711_v3 = vmov 0.0|0.0   ;;  %vm79_vm0 = vcmask 261120   ;;  %s958_s0 = inlined_call_operand.vmem [shape: f32[16,32], index: 0, kind: input, shape index: {}]   ;;  %s959_s1 = inlined_call_operand.vmem [shape: f32[16,160], index: 1, kind: input, shape index: {}]   ;;  %s960_s2 = inlined_call_operand.vmem [shape: f32[160,32], index: 2, kind: input, shape index: {}]   ;;  %s961_s3 = inlined_call_operand.vmem [shape: f32[1,32], index: 3, kind: input, shape index: {}]   ;;  %s962_s4 = inlined_call_operand.vmem [shape: f32[1,32], index: 4, kind: input, shape index: {}]   ;;  %s963_s5 = inlined_call_operand.vmem [shape: f32[1,32], index: 5, kind: input, shape index: {}]   ;;  %s964_s6 = inlined_call_operand.vmem [shape: f32[32,32], index: 6, kind: input, shape index: {}]   ;;  %s965_s7 = inlined_call_operand.vmem [shape: f32[1,32], index: 7, kind: input, shape index: {}]   ;;  %s966_s8 = inlined_call_operand.vmem [shape: f32[32,32], index: 8, kind: input, shape index: {}]   ;;  %s967_s9 = inlined_call_operand.vmem [shape: f32[1,32], index: 9, kind: input, shape index: {}]   ;;  %s968_s10 = inlined_call_operand.vmem [shape: f32[32,32], index: 10, kind: input, shape index: {}]   ;;  %s969_s11 = inlined_call_operand.vmem [shape: f32[1,32], index: 11, kind: input, shape index: {}]   ;;  %s970_s12 = inlined_call_operand.vmem [shape: f32[1,32], index: 12, kind: input, shape index: {}]   ;;  %s971_s13 = inlined_call_operand.vmem [shape: f32[1,32], index: 13, kind: input, shape index: {}]   ;;  %s972_s14 = inlined_call_operand.hbm [shape: f32[16,32], index: 14, kind: output, shape index: {}]  }
   0x1   :  { %v52_v0 = vld [vmem:[%s960_s2] sm:$0xff]  ;;  %v53_v1 = vld [vmem:[%s960_s2 + $0x8] sm:$0xff]  ;;  %v54_v2 = vld [vmem:[%s960_s2 + $0x10] sm:$0xff]  ;;  %621 = vmatprep.subr.bf16.mxu0 %v711_v3 }
   0x2   :  { %v622_v4 = vpack.c.bf16 %v53_v1, %v52_v0  ;;  %v55_v5 = vld [vmem:[%s960_s2 + $0x18] sm:$0xff]  ;;  %v56_v7 = vld [vmem:[%s960_s2 + $0x20] sm:$0xff]  ;;  %v57_v8 = vld [vmem:[%s960_s2 + $0x28] sm:$0xff] }
   0x3   :  { %v625_v6 = vpack.c.bf16 %v55_v5, %v54_v2  ;;  %v49_v9 = vld [vmem:[%s959_s1 + $0x8] sm:$0xff]  ;;  %v628_v10 = vpack.c.bf16 %v57_v8, %v56_v7  ;;  %v58_v11 = vld [vmem:[%s960_s2 + $0x30] sm:$0xff]  ;;  %v59_v12 = vld [vmem:[%s960_s2 + $0x38] sm:$0xff] }
   0x4   :  { %623 = vmatpush1.bf16.msra.mxu0 %v622_v4  ;;  %555 = vmatprep.mubr.msk.f32.mxu0 %vm79_vm0, %v49_v9 }
   0x5   :  { %624 = vmatprep.subr.bf16.mxu0 %v711_v3 }
   0x8   :  { %626 = vmatpush1.bf16.msra.mxu0 %v625_v6 }
   0x9   :  { %627 = vmatprep.subr.bf16.mxu0 %v711_v3 }
   0xa   :  { %19 = vsyncpa [#allocation3], 0  ;;  %v631_v13 = vpack.c.bf16 %v59_v12, %v58_v11  ;;  %v60_v14 = vld [vmem:[%s960_s2 + $0x40] sm:$0xff]  ;;  %v61_v15 = vld [vmem:[%s960_s2 + $0x48] sm:$0xff]  ;;  %s712_s25 = smov [#allocation2]  }
   0xb   :  { %v634_v16 = vpack.c.bf16 %v61_v15, %v60_v14  ;;  %v62_v17 = vld [vmem:[%s960_s2 + $0x50] sm:$0xff]  ;;  %v63_v18 = vld [vmem:[%s960_s2 + $0x58] sm:$0xff]  ;;  %v64_v20 = vld [vmem:[%s960_s2 + $0x60] sm:$0xff]  ;;  %s543_s26 = sshll.u32 %s712_s25, 4  ;;  %s544_s26 = int_to_ptr.vmem [resolvable:$true] %s543_s26 }
   0xc   :  { %629 = vmatpush1.bf16.msra.mxu0 %v628_v10  ;;  %v637_v19 = vpack.c.bf16 %v63_v18, %v62_v17  ;;  %v65_v21 = vld [vmem:[%s960_s2 + $0x68] sm:$0xff]  ;;  %v66_v23 = vld [vmem:[%s960_s2 + $0x70] sm:$0xff]  ;;  %v67_v24 = vld [vmem:[%s960_s2 + $0x78] sm:$0xff]  ;;  %p692_p1 = scmp.lt.s32.totalorder %s544_s26, %s544_s26 }
   0xd   :  { %630 = vmatprep.subr.bf16.mxu0 %v711_v3  ;;  %v640_v22 = vpack.c.bf16 %v65_v21, %v64_v20  ;;  %v643_v25 = vpack.c.bf16 %v67_v24, %v66_v23  ;;  %v68_v26 = vld [vmem:[%s960_s2 + $0x80] sm:$0xff]  ;;  %v69_v27 = vld [vmem:[%s960_s2 + $0x88] sm:$0xff]  ;;  %v70_v29 = vld [vmem:[%s960_s2 + $0x90] sm:$0xff] }
   0xe   :  { %v646_v28 = vpack.c.bf16 %v69_v27, %v68_v26  ;;  %v71_v30 = vld [vmem:[%s960_s2 + $0x98] sm:$0xff]  ;;  %v48_v32 = vld [vmem:[%s959_s1] sm:$0xff]  ;;  %v50_v34 = vld [vmem:[%s959_s1 + $0x10] sm:$0xff] }
   0xf   :  { %v649_v31 = vpack.c.bf16 %v71_v30, %v70_v29  ;;  %v51_v33 = vld [vmem:[%s959_s1 + $0x18] sm:$0xff]  ;;  %v554_v35 = vld [vmem:[%s961_s3] ss:$0 sm:$0xff]  ;;  %v162_v42 = vld [vmem:[%s958_s0 + $0x8] sm:$0xff] }
  0x10   :  { %632 = vmatpush1.bf16.msra.mxu0 %v631_v13  ;;  %v161_v37 = vld [vmem:[%s958_s0] sm:$0xff]  ;;  %v211_v59 = vld [vmem:[%s964_s6 + $0x8] sm:$0xff]  ;;  %v212_v60 = vld [vmem:[%s964_s6 + $0x10] sm:$0xff] }
  0x11   :  { %633 = vmatprep.subr.bf16.mxu0 %v711_v3  ;;  %v210_v58 = vld [vmem:[%s964_s6] sm:$0xff]  ;;  %v213_v62 = vld [vmem:[%s964_s6 + $0x18] sm:$0xff]  ;;  %v305_v1 = vld [vmem:[%s966_s8 + $0x8] sm:$0xff]  ;;  %s687_s6 = scalar_lea.vmem %s544_s26, 256 }
  0x12   :  { %v651_v61 = vpack.c.bf16 %v211_v59, %v210_v58  ;;  %v655_v63 = vpack.c.bf16 %v213_v62, %v212_v60  ;;  %v304_v0 = vld [vmem:[%s966_s8] sm:$0xff]  ;;  %v307_v20 = vld [vmem:[%s966_s8 + $0x18] sm:$0xff]  ;;  %v399_v23 = vld [vmem:[%s968_s10 + $0x8] sm:$0xff]  ;;  %p688_p0 = scmp.ne.s32.totalorder %s544_s26, %s687_s6  ;;  %p693_p2 = scmp.lt.s32.totalorder %s687_s6, %s687_s6 }
  0x13   :  { %v659_v2 = vpack.c.bf16 %v305_v1, %v304_v0  ;;  %v557_v10 = vld [vmem:[%s962_s4] ss:$0 sm:$0xff] }
  0x14   :  { %635 = vmatpush1.bf16.msra.mxu0 %v634_v16  ;;  %652 = vmatprep.subr.bf16.mxu1 %v651_v61  ;;  %v558_v12 = vld [vmem:[%s963_s5] ss:$0 sm:$0xff]  ;;  %p694_p3 = por %p693_p2, %p692_p1 }
  0x15   :  { %636 = vmatprep.subr.bf16.mxu0 %v711_v3  ;;  %654 = vmatpush3.bf16.msra.mxu1 %v651_v61 }
  0x16   :  { %656 = vmatprep.subr.bf16.mxu1 %v655_v63  ;;  %p695_p4 = pnand %p694_p3, %p688_p0 }
  0x18   :  { %638 = vmatpush1.bf16.msra.mxu0 %v637_v19  ;;  %v306_v19 = vld [vmem:[%s966_s8 + $0x10] sm:$0xff] }
  0x19   :  { %639 = vmatprep.subr.bf16.mxu0 %v711_v3  ;;  %658 = vmatpush3.bf16.msra.mxu1 %v655_v63  ;;  %v663_v21 = vpack.c.bf16 %v307_v20, %v306_v19 }
  0x1a   :  { %660 = vmatprep.subr.bf16.mxu1 %v659_v2 }
  0x1c   :  { %641 = vmatpush1.bf16.msra.mxu0 %v640_v22  ;;  %v398_v22 = vld [vmem:[%s968_s10] sm:$0xff] }
  0x1d   :  { %642 = vmatprep.subr.bf16.mxu0 %v711_v3  ;;  %v667_v24 = vpack.c.bf16 %v399_v23, %v398_v22 }
  0x20   :  { %644 = vmatpush1.bf16.msra.mxu0 %v643_v25  ;;  %v559_v25 = vld [vmem:[%s965_s7] ss:$0 sm:$0xff] }
  0x21   :  { %645 = vmatprep.subr.bf16.mxu0 %v711_v3 }
  0x24   :  { %647 = vmatpush1.bf16.msra.mxu0 %v646_v28 }
  0x25   :  { %648 = vmatprep.subr.bf16.mxu0 %v711_v3 }
  0x28   :  { %650 = vmatpush1.bf16.msra.mxu0 %v649_v31 }
  0x2b   :  { %151 = vmatmul.mubr.f32.vlgmr.msra.gmra.mrb[0].mxu0 %v48_v32  ;;  %v400_v32 = vld [vmem:[%s968_s10 + $0x10] sm:$0xff] }
  0x2c   :  { %556 = vmatprep.mubr.msk.f32.mxu0 %vm79_vm0, %v51_v33  ;;  %v401_v33 = vld [vmem:[%s968_s10 + $0x18] sm:$0xff] }
  0x2f   :  { %156 = vmatmul.mubr.f32.gmra.mrb[2].mxu0 %v50_v34  ;;  %v671_v34 = vpack.c.bf16 %v401_v33, %v400_v32 }
  0xfe   :  { %v152_v36 = vpop.f32.mrb[0].mxu0 }
  0xff   :  { %v153_v38 = vadd.f32 %v554_v35, %v152_v36  ;;  %v154_v39 = vpop.f32.mrb[1].mxu0 }
 0x101   :  { %v163_v40 = vadd.f32 %v161_v37, %v153_v38 }
 0x102   :  { %v157_v41 = vpop.f32.mrb[2].mxu0 }
 0x103   :  { %v158_v43 = vadd.f32 %v554_v35, %v157_v41  ;;  %v159_v44 = vpop.f32.mrb[3].mxu0  ;;  %v167_v45 = vsel %vm79_vm0, %v163_v40, 0.0  ;;  %v562_v35 = vld [vmem:[%s967_s9] ss:$0 sm:$0xff] }
 0x104   :  { %168 = vadd.xlane.f32.xlu0 %v167_v45 }
 0x105   :  { %v164_v46 = vadd.f32 %v162_v42, %v158_v43  ;;  %v565_v42 = vld [vmem:[%s969_s11] ss:$0 sm:$0xff] }
 0x107   :  { %v170_v47 = vsel %vm79_vm0, %v164_v46, 0.0 }
 0x108   :  { %171 = vadd.xlane.f32.xlu0 %v170_v47 }
 0x191   :  { %v169_v48 = vpop.xlane.xlu0 %168 }
 0x192   :  { %v174_v49 = vmul.f32 0.03125, %v169_v48 }
 0x194   :  { %v176_v50 = vsub.f32 %v163_v40, %v174_v49 }
 0x195   :  { %v172_v51 = vpop.xlane.xlu0 %171 }
 0x196   :  { %v175_v52 = vmul.f32 0.03125, %v172_v51  ;;  %v178_v53 = vmul.f32 %v176_v50, %v176_v50 }
 0x198   :  { %v177_v54 = vsub.f32 %v164_v46, %v175_v52  ;;  %v180_v55 = vsel %vm79_vm0, %v178_v53, 0.0 }
 0x199   :  { %181 = vadd.xlane.f32.xlu1 %v180_v55 }
 0x19a   :  { %v179_v56 = vmul.f32 %v177_v54, %v177_v54 }
 0x19c   :  { %v183_v57 = vsel %vm79_vm0, %v179_v56, 0.0 }
 0x19d   :  { %184 = vadd.xlane.f32.xlu1 %v183_v57 }
 0x226   :  { %v182_v3 = vpop.xlane.xlu1 %181 }
 0x227   :  { %v186_v4 = vmul.f32 0.03125, %v182_v3 }
 0x229   :  { %v188_v5 = vadd.f32 1e-05, %v186_v4  ;;  %v568_v4 = vld [vmem:[%s970_s12] ss:$0 sm:$0xff] }
 0x22a   :  { %v185_v6 = vpop.xlane.xlu1 %184 }
 0x22b   :  { %679 = vrsqrt.f32 %v188_v5  ;;  %v187_v7 = vmul.f32 0.03125, %v185_v6 }
 0x22d   :  { %v189_v8 = vadd.f32 1e-05, %v187_v7 }
 0x22f   :  { %681 = vrsqrt.f32 %v189_v8  ;;  %v569_v8 = vld [vmem:[%s971_s13] ss:$0 sm:$0xff] }
 0x235   :  { %v680_v9 = vpop.eup %679 }
 0x236   :  { %v192_v11 = vmul.f32 %v680_v9, %v176_v50 }
 0x238   :  { %v200_v13 = vmul.f32 %v557_v10, %v192_v11 }
 0x239   :  { %v682_v14 = vpop.eup %681 }
 0x23a   :  { %v193_v15 = vmul.f32 %v682_v14, %v177_v54  ;;  %v208_v16 = vadd.f32 %v558_v12, %v200_v13 }
 0x23c   :  { %v201_v17 = vmul.f32 %v557_v10, %v193_v15  ;;  %596 = vmatprep.mubr.msk.f32.mxu1 %vm79_vm0, %v208_v16 }
 0x23e   :  { %v209_v18 = vadd.f32 %v558_v12, %v201_v17 }
 0x240   :  { %597 = vmatmul.mubr.msk.f32.vlgmr.msra.gmra.mrb[0].mxu1 %vm79_vm0, %v209_v18 }
 0x241   :  { %662 = vmatpush3.bf16.msra.mxu1 %v659_v2 }
 0x242   :  { %664 = vmatprep.subr.bf16.mxu1 %v663_v21 }
 0x245   :  { %666 = vmatpush3.bf16.msra.mxu1 %v663_v21 }
 0x246   :  { %668 = vmatprep.subr.bf16.mxu1 %v667_v24 }
 0x313   :  { %v598_v26 = vpop.f32.mrb[0].mxu1 }
 0x314   :  { %v299_v27 = vadd.f32 %v598_v26, %v559_v25  ;;  %v293_v28 = vpop.f32.mrb[1].mxu1 }
 0x315   :  { %v294_v29 = vadd.f32 %v559_v25, %v293_v28 }
 0x316   :  { %v303_v31 = vmax.f32 %v299_v27, 0.0 }
 0x317   :  { %v302_v30 = vmax.f32 %v294_v29, 0.0 }
 0x319   :  { %607 = vmatprep.mubr.msk.f32.mxu1 %vm79_vm0, %v302_v30 }
 0x31a   :  { %608 = vmatmul.mubr.msk.f32.vlgmr.msra.gmra.mrb[2].mxu1 %vm79_vm0, %v303_v31 }
 0x31b   :  { %670 = vmatpush3.bf16.msra.mxu1 %v667_v24 }
 0x31c   :  { %672 = vmatprep.subr.bf16.mxu1 %v671_v34 }
 0x31f   :  { %674 = vmatpush3.bf16.msra.mxu1 %v671_v34 }
 0x3ed   :  { %v609_v36 = vpop.f32.mrb[2].mxu1 }
 0x3ee   :  { %v393_v37 = vadd.f32 %v609_v36, %v562_v35  ;;  %v387_v38 = vpop.f32.mrb[3].mxu1 }
 0x3ef   :  { %v388_v39 = vadd.f32 %v562_v35, %v387_v38 }
 0x3f0   :  { %v397_v41 = vmax.f32 %v393_v37, 0.0 }
 0x3f1   :  { %v396_v40 = vmax.f32 %v388_v39, 0.0 }
 0x3f3   :  { %618 = vmatprep.mubr.msk.f32.mxu1 %vm79_vm0, %v396_v40 }
 0x3f4   :  { %619 = vmatmul.mubr.msk.f32.vlgmr.msra.gmra.mrb[4].mxu1 %vm79_vm0, %v397_v41 }
 0x4c7   :  { %v620_v43 = vpop.f32.mrb[4].mxu1 }
 0x4c8   :  { %v487_v44 = vadd.f32 %v620_v43, %v565_v42  ;;  %v481_v45 = vpop.f32.mrb[5].mxu1 }
 0x4c9   :  { %v482_v46 = vadd.f32 %v565_v42, %v481_v45 }
 0x4ca   :  { %v491_v47 = vadd.f32 %v487_v44, %v209_v18 }
 0x4cb   :  { %v490_v48 = vadd.f32 %v482_v46, %v208_v16 }
 0x4cc   :  { %v497_v49 = vsel %vm79_vm0, %v491_v47, 0.0 }
 0x4cd   :  { %498 = vadd.xlane.f32.xlu1 %v497_v49  ;;  %v494_v50 = vsel %vm79_vm0, %v490_v48, 0.0 }
 0x4ce   :  { %495 = vadd.xlane.f32.xlu0 %v494_v50 }
 0x55a   :  { %v499_v51 = vpop.xlane.xlu1 %498 }
 0x55b   :  { %v501_v52 = vmul.f32 0.03125, %v499_v51  ;;  %v496_v53 = vpop.xlane.xlu0 %495 }
 0x55c   :  { %v500_v54 = vmul.f32 0.03125, %v496_v53 }
 0x55d   :  { %v503_v55 = vsub.f32 %v491_v47, %v501_v52 }
 0x55e   :  { %v502_v56 = vsub.f32 %v490_v48, %v500_v54 }
 0x55f   :  { %v505_v57 = vmul.f32 %v503_v55, %v503_v55 }
 0x560   :  { %v504_v58 = vmul.f32 %v502_v56, %v502_v56 }
 0x561   :  { %v509_v59 = vsel %vm79_vm0, %v505_v57, 0.0 }
 0x562   :  { %510 = vadd.xlane.f32.xlu1 %v509_v59  ;;  %v506_v60 = vsel %vm79_vm0, %v504_v58, 0.0 }
 0x563   :  { %507 = vadd.xlane.f32.xlu0 %v506_v60 }
 0x5ef   :  { %v511_v61 = vpop.xlane.xlu1 %510 }
 0x5f0   :  { %v513_v62 = vmul.f32 0.03125, %v511_v61  ;;  %v508_v63 = vpop.xlane.xlu0 %507 }
 0x5f1   :  { %v512_v0 = vmul.f32 0.03125, %v508_v63 }
 0x5f2   :  { %v515_v1 = vadd.f32 1e-05, %v513_v62 }
 0x5f3   :  { %v514_v2 = vadd.f32 1e-05, %v512_v0 }
 0x5f4   :  { %683 = vrsqrt.f32 %v515_v1 }
 0x5f5   :  { %685 = vrsqrt.f32 %v514_v2 }
 0x5fe   :  { %v684_v3 = vpop.eup %683 }
 0x5ff   :  { %v686_v5 = vpop.eup %685  ;;  %v519_v6 = vmul.f32 %v684_v3, %v503_v55 }
 0x600   :  { %v518_v7 = vmul.f32 %v686_v5, %v502_v56 }
 0x601   :  { %v527_v9 = vmul.f32 %v568_v4, %v519_v6 }
 0x602   :  { %v526_v10 = vmul.f32 %v568_v4, %v518_v7 }
 0x603   :  { %v535_v11 = vadd.f32 %v569_v8, %v527_v9 }
 0x604   :  { %v534_v12 = vadd.f32 %v569_v8, %v526_v10 }
 0x605   :  { %537 = vst.msk [vmem:[#allocation2 + $0x8] sm:$0xff] %vm79_vm0, %v535_v11 }
 0x606   :  { %536 = vst.msk [vmem:[#allocation2] sm:$0xff] %vm79_vm0, %v534_v12 }
 0x607   :  { %698 = shalt.err (!%p695_p4)
}
 0x608   :  { %s699_s27 = scalar_lea.hbm %s972_s14, 256 }
 0x609   :  { %p700_p5 = scmp.ne.s32.totalorder %s972_s14, %s699_s27  ;;  %p703_p6 = scmp.lt.u32.totalorder %s699_s27, %s972_s14 }
 0x60b   :  { %p705_p7 = pnand %p703_p6, %p700_p5 }
 0x60d   :  { %708 = shalt.err (!%p705_p7)
}
 0x60e   :  { %s713_s4 = smov 128   ;;  %s714_s15 = smov 8  }
 0x60f   :  { %549 = dma.vmem_to_hbm [thread:$0]  %s544_s26, 256, %s972_s14, [#allocation3], %s713_s4, %s713_s4, %s714_s15  }
 0x610   :  { %709 = dma.done.wait [#allocation3], 256  }
 0x611   :  { %710 = vsyncadd [#allocation3], 4294967040 }
 0x612   :  { %553 = vsyncpa [#allocation3], 1 }

// kernel: encoder_forward.8
= control target key start
LH: loop header
LB: loop body
LE: loop exit
PB: predicated region body
PF: predicated region fallthrough
CT: control target
= control target key end

     0   :  { %v671_v0 = vmov 0.0|0.0   ;;  %vm78_vm0 = vcmask 261120   ;;  %s909_s2 = inlined_call_operand.vmem [shape: f32[160,32], index: 2, kind: input, shape index: {}]   ;;  %s910_s1 = inlined_call_operand.vmem [shape: f32[16,160], index: 1, kind: input, shape index: {}]   ;;  %s911_s3 = inlined_call_operand.vmem [shape: f32[1,32], index: 3, kind: input, shape index: {}]   ;;  %s912_s0 = inlined_call_operand.vmem [shape: f32[16,32], index: 0, kind: input, shape index: {}]   ;;  %s913_s6 = inlined_call_operand.vmem [shape: f32[32,32], index: 6, kind: input, shape index: {}]   ;;  %s914_s8 = inlined_call_operand.vmem [shape: f32[32,32], index: 8, kind: input, shape index: {}]   ;;  %s915_s4 = inlined_call_operand.vmem [shape: f32[1,32], index: 4, kind: input, shape index: {}]   ;;  %s916_s5 = inlined_call_operand.vmem [shape: f32[1,32], index: 5, kind: input, shape index: {}]   ;;  %s917_s10 = inlined_call_operand.vmem [shape: f32[32,32], index: 10, kind: input, shape index: {}]   ;;  %s918_s7 = inlined_call_operand.vmem [shape: f32[1,32], index: 7, kind: input, shape index: {}]   ;;  %s919_s9 = inlined_call_operand.vmem [shape: f32[1,32], index: 9, kind: input, shape index: {}]   ;;  %s920_s11 = inlined_call_operand.vmem [shape: f32[1,32], index: 11, kind: input, shape index: {}]   ;;  %s921_s12 = inlined_call_operand.vmem [shape: f32[1,32], index: 12, kind: input, shape index: {}]   ;;  %s922_s13 = inlined_call_operand.vmem [shape: f32[1,32], index: 13, kind: input, shape index: {}]   ;;  %s923_s14 = inlined_call_operand.vmem [shape: f32[16,32], index: 14, kind: output, shape index: {}]  }
   0x1   :  { %608 = vmatprep.subr.bf16.mxu0 %v671_v0  ;;  %v51_v1 = vld [vmem:[%s909_s2] sm:$0xff]  ;;  %v52_v2 = vld [vmem:[%s909_s2 + $0x8] sm:$0xff]  ;;  %v53_v3 = vld [vmem:[%s909_s2 + $0x10] sm:$0xff] }
   0x2   :  { %v609_v4 = vpack.c.bf16 %v52_v2, %v51_v1  ;;  %v54_v5 = vld [vmem:[%s909_s2 + $0x18] sm:$0xff]  ;;  %v55_v7 = vld [vmem:[%s909_s2 + $0x20] sm:$0xff]  ;;  %v56_v8 = vld [vmem:[%s909_s2 + $0x28] sm:$0xff] }
   0x3   :  { %v612_v6 = vpack.c.bf16 %v54_v5, %v53_v3  ;;  %v48_v9 = vld [vmem:[%s910_s1 + $0x8] sm:$0xff]  ;;  %v615_v10 = vpack.c.bf16 %v56_v8, %v55_v7  ;;  %v57_v11 = vld [vmem:[%s909_s2 + $0x30] sm:$0xff]  ;;  %v58_v12 = vld [vmem:[%s909_s2 + $0x38] sm:$0xff] }
   0x4   :  { %610 = vmatpush1.bf16.msra.mxu0 %v609_v4  ;;  %542 = vmatprep.mubr.msk.f32.mxu0 %vm78_vm0, %v48_v9  ;;  %v618_v13 = vpack.c.bf16 %v58_v12, %v57_v11  ;;  %v59_v14 = vld [vmem:[%s909_s2 + $0x40] sm:$0xff]  ;;  %v60_v15 = vld [vmem:[%s909_s2 + $0x48] sm:$0xff]  ;;  %v61_v17 = vld [vmem:[%s909_s2 + $0x50] sm:$0xff] }
   0x5   :  { %611 = vmatprep.subr.bf16.mxu0 %v671_v0  ;;  %v621_v16 = vpack.c.bf16 %v60_v15, %v59_v14  ;;  %v62_v18 = vld [vmem:[%s909_s2 + $0x58] sm:$0xff]  ;;  %v63_v20 = vld [vmem:[%s909_s2 + $0x60] sm:$0xff]  ;;  %v64_v21 = vld [vmem:[%s909_s2 + $0x68] sm:$0xff] }
   0x6   :  { %v624_v19 = vpack.c.bf16 %v62_v18, %v61_v17  ;;  %v627_v22 = vpack.c.bf16 %v64_v21, %v63_v20  ;;  %v65_v23 = vld [vmem:[%s909_s2 + $0x70] sm:$0xff]  ;;  %v66_v24 = vld [vmem:[%s909_s2 + $0x78] sm:$0xff]  ;;  %v67_v26 = vld [vmem:[%s909_s2 + $0x80] sm:$0xff] }
   0x7   :  { %v630_v25 = vpack.c.bf16 %v66_v24, %v65_v23  ;;  %v68_v27 = vld [vmem:[%s909_s2 + $0x88] sm:$0xff]  ;;  %v69_v29 = vld [vmem:[%s909_s2 + $0x90] sm:$0xff]  ;;  %v70_v30 = vld [vmem:[%s909_s2 + $0x98] sm:$0xff] }
   0x8   :  { %613 = vmatpush1.bf16.msra.mxu0 %v612_v6  ;;  %v633_v28 = vpack.c.bf16 %v68_v27, %v67_v26  ;;  %v636_v31 = vpack.c.bf16 %v70_v30, %v69_v29  ;;  %v47_v32 = vld [vmem:[%s910_s1] sm:$0xff]  ;;  %v50_v33 = vld [vmem:[%s910_s1 + $0x18] sm:$0xff]  ;;  %v49_v34 = vld [vmem:[%s910_s1 + $0x10] sm:$0xff] }
   0x9   :  { %614 = vmatprep.subr.bf16.mxu0 %v671_v0  ;;  %v541_v35 = vld [vmem:[%s911_s3] ss:$0 sm:$0xff]  ;;  %v161_v42 = vld [vmem:[%s912_s0 + $0x8] sm:$0xff]  ;;  %v211_v60 = vld [vmem:[%s913_s6 + $0x10] sm:$0xff] }
   0xa   :  { %v160_v37 = vld [vmem:[%s912_s0] sm:$0xff]  ;;  %v210_v59 = vld [vmem:[%s913_s6 + $0x8] sm:$0xff]  ;;  %v212_v62 = vld [vmem:[%s913_s6 + $0x18] sm:$0xff] }
   0xb   :  { %v209_v58 = vld [vmem:[%s913_s6] sm:$0xff]  ;;  %v642_v63 = vpack.c.bf16 %v212_v62, %v211_v60  ;;  %v304_v1 = vld [vmem:[%s914_s8 + $0x8] sm:$0xff]  ;;  %v306_v20 = vld [vmem:[%s914_s8 + $0x18] sm:$0xff] }
   0xc   :  { %616 = vmatpush1.bf16.msra.mxu0 %v615_v10  ;;  %v638_v61 = vpack.c.bf16 %v210_v59, %v209_v58  ;;  %v544_v10 = vld [vmem:[%s915_s4] ss:$0 sm:$0xff]  ;;  %v398_v23 = vld [vmem:[%s917_s10 + $0x8] sm:$0xff] }
   0xd   :  { %617 = vmatprep.subr.bf16.mxu0 %v671_v0  ;;  %v545_v12 = vld [vmem:[%s916_s5] ss:$0 sm:$0xff] }
   0xe   :  { %639 = vmatprep.subr.bf16.mxu1 %v638_v61 }
   0xf   :  { %641 = vmatpush3.bf16.msra.mxu1 %v638_v61 }
  0x10   :  { %619 = vmatpush1.bf16.msra.mxu0 %v618_v13  ;;  %643 = vmatprep.subr.bf16.mxu1 %v642_v63 }
  0x11   :  { %620 = vmatprep.subr.bf16.mxu0 %v671_v0 }
  0x13   :  { %645 = vmatpush3.bf16.msra.mxu1 %v642_v63 }
  0x14   :  { %622 = vmatpush1.bf16.msra.mxu0 %v621_v16 }
  0x15   :  { %623 = vmatprep.subr.bf16.mxu0 %v671_v0 }
  0x18   :  { %625 = vmatpush1.bf16.msra.mxu0 %v624_v19  ;;  %v305_v19 = vld [vmem:[%s914_s8 + $0x10] sm:$0xff] }
  0x19   :  { %626 = vmatprep.subr.bf16.mxu0 %v671_v0  ;;  %v650_v21 = vpack.c.bf16 %v306_v20, %v305_v19 }
  0x1c   :  { %628 = vmatpush1.bf16.msra.mxu0 %v627_v22  ;;  %v397_v22 = vld [vmem:[%s917_s10] sm:$0xff] }
  0x1d   :  { %629 = vmatprep.subr.bf16.mxu0 %v671_v0  ;;  %v654_v24 = vpack.c.bf16 %v398_v23, %v397_v22 }
  0x20   :  { %631 = vmatpush1.bf16.msra.mxu0 %v630_v25  ;;  %v546_v25 = vld [vmem:[%s918_s7] ss:$0 sm:$0xff] }
  0x21   :  { %632 = vmatprep.subr.bf16.mxu0 %v671_v0 }
  0x24   :  { %634 = vmatpush1.bf16.msra.mxu0 %v633_v28 }
  0x25   :  { %635 = vmatprep.subr.bf16.mxu0 %v671_v0  ;;  %v303_v0 = vld [vmem:[%s914_s8] sm:$0xff] }
  0x26   :  { %v646_v2 = vpack.c.bf16 %v304_v1, %v303_v0 }
  0x28   :  { %637 = vmatpush1.bf16.msra.mxu0 %v636_v31  ;;  %647 = vmatprep.subr.bf16.mxu1 %v646_v2 }
  0x2b   :  { %150 = vmatmul.mubr.f32.vlgmr.msra.gmra.mrb[0].mxu0 %v47_v32  ;;  %v399_v32 = vld [vmem:[%s917_s10 + $0x10] sm:$0xff] }
  0x2c   :  { %543 = vmatprep.mubr.msk.f32.mxu0 %vm78_vm0, %v50_v33  ;;  %v400_v33 = vld [vmem:[%s917_s10 + $0x18] sm:$0xff] }
  0x2f   :  { %155 = vmatmul.mubr.f32.gmra.mrb[2].mxu0 %v49_v34  ;;  %v658_v34 = vpack.c.bf16 %v400_v33, %v399_v32 }
  0xfe   :  { %v151_v36 = vpop.f32.mrb[0].mxu0 }
  0xff   :  { %v152_v38 = vadd.f32 %v541_v35, %v151_v36  ;;  %v153_v39 = vpop.f32.mrb[1].mxu0 }
 0x101   :  { %v162_v40 = vadd.f32 %v160_v37, %v152_v38 }
 0x102   :  { %v156_v41 = vpop.f32.mrb[2].mxu0 }
 0x103   :  { %v157_v43 = vadd.f32 %v541_v35, %v156_v41  ;;  %v158_v44 = vpop.f32.mrb[3].mxu0  ;;  %v166_v45 = vsel %vm78_vm0, %v162_v40, 0.0  ;;  %v549_v35 = vld [vmem:[%s919_s9] ss:$0 sm:$0xff] }
 0x104   :  { %167 = vadd.xlane.f32.xlu0 %v166_v45 }
 0x105   :  { %v163_v46 = vadd.f32 %v161_v42, %v157_v43  ;;  %v552_v42 = vld [vmem:[%s920_s11] ss:$0 sm:$0xff] }
 0x107   :  { %v169_v47 = vsel %vm78_vm0, %v163_v46, 0.0 }
 0x108   :  { %170 = vadd.xlane.f32.xlu0 %v169_v47 }
 0x191   :  { %v168_v48 = vpop.xlane.xlu0 %167 }
 0x192   :  { %v173_v49 = vmul.f32 0.03125, %v168_v48 }
 0x194   :  { %v175_v50 = vsub.f32 %v162_v40, %v173_v49 }
 0x195   :  { %v171_v51 = vpop.xlane.xlu0 %170 }
 0x196   :  { %v174_v52 = vmul.f32 0.03125, %v171_v51  ;;  %v177_v53 = vmul.f32 %v175_v50, %v175_v50 }
 0x198   :  { %v176_v54 = vsub.f32 %v163_v46, %v174_v52  ;;  %v179_v55 = vsel %vm78_vm0, %v177_v53, 0.0 }
 0x199   :  { %180 = vadd.xlane.f32.xlu1 %v179_v55 }
 0x19a   :  { %v178_v56 = vmul.f32 %v176_v54, %v176_v54 }
 0x19c   :  { %v182_v57 = vsel %vm78_vm0, %v178_v56, 0.0 }
 0x19d   :  { %183 = vadd.xlane.f32.xlu1 %v182_v57 }
 0x226   :  { %v181_v3 = vpop.xlane.xlu1 %180 }
 0x227   :  { %v185_v4 = vmul.f32 0.03125, %v181_v3 }
 0x229   :  { %v187_v5 = vadd.f32 1e-05, %v185_v4  ;;  %v555_v4 = vld [vmem:[%s921_s12] ss:$0 sm:$0xff] }
 0x22a   :  { %v184_v6 = vpop.xlane.xlu1 %183 }
 0x22b   :  { %663 = vrsqrt.f32 %v187_v5  ;;  %v186_v7 = vmul.f32 0.03125, %v184_v6 }
 0x22d   :  { %v188_v8 = vadd.f32 1e-05, %v186_v7  ;;  %v556_v7 = vld [vmem:[%s922_s13] ss:$0 sm:$0xff] }
 0x22f   :  { %665 = vrsqrt.f32 %v188_v8 }
 0x235   :  { %v664_v9 = vpop.eup %663 }
 0x236   :  { %v191_v11 = vmul.f32 %v664_v9, %v175_v50 }
 0x238   :  { %v199_v13 = vmul.f32 %v544_v10, %v191_v11 }
 0x239   :  { %v666_v14 = vpop.eup %665 }
 0x23a   :  { %v192_v15 = vmul.f32 %v666_v14, %v176_v54  ;;  %v207_v16 = vadd.f32 %v545_v12, %v199_v13 }
 0x23c   :  { %v200_v17 = vmul.f32 %v544_v10, %v192_v15  ;;  %583 = vmatprep.mubr.msk.f32.mxu1 %vm78_vm0, %v207_v16 }
 0x23e   :  { %v208_v18 = vadd.f32 %v545_v12, %v200_v17 }
 0x240   :  { %584 = vmatmul.mubr.msk.f32.vlgmr.msra.gmra.mrb[0].mxu1 %vm78_vm0, %v208_v18 }
 0x241   :  { %649 = vmatpush3.bf16.msra.mxu1 %v646_v2 }
 0x242   :  { %651 = vmatprep.subr.bf16.mxu1 %v650_v21 }
 0x245   :  { %653 = vmatpush3.bf16.msra.mxu1 %v650_v21 }
 0x246   :  { %655 = vmatprep.subr.bf16.mxu1 %v654_v24 }
 0x313   :  { %v585_v26 = vpop.f32.mrb[0].mxu1 }
 0x314   :  { %v298_v27 = vadd.f32 %v585_v26, %v546_v25  ;;  %v292_v28 = vpop.f32.mrb[1].mxu1 }
 0x315   :  { %v293_v29 = vadd.f32 %v546_v25, %v292_v28 }
 0x316   :  { %v302_v31 = vmax.f32 %v298_v27, 0.0 }
 0x317   :  { %v301_v30 = vmax.f32 %v293_v29, 0.0 }
 0x319   :  { %594 = vmatprep.mubr.msk.f32.mxu1 %vm78_vm0, %v301_v30 }
 0x31a   :  { %595 = vmatmul.mubr.msk.f32.vlgmr.msra.gmra.mrb[2].mxu1 %vm78_vm0, %v302_v31 }
 0x31b   :  { %657 = vmatpush3.bf16.msra.mxu1 %v654_v24 }
 0x31c   :  { %659 = vmatprep.subr.bf16.mxu1 %v658_v34 }
 0x31f   :  { %661 = vmatpush3.bf16.msra.mxu1 %v658_v34 }
 0x3ed   :  { %v596_v36 = vpop.f32.mrb[2].mxu1 }
 0x3ee   :  { %v392_v37 = vadd.f32 %v596_v36, %v549_v35  ;;  %v386_v38 = vpop.f32.mrb[3].mxu1 }
 0x3ef   :  { %v387_v39 = vadd.f32 %v549_v35, %v386_v38 }
 0x3f0   :  { %v396_v41 = vmax.f32 %v392_v37, 0.0 }
 0x3f1   :  { %v395_v40 = vmax.f32 %v387_v39, 0.0 }
 0x3f3   :  { %605 = vmatprep.mubr.msk.f32.mxu1 %vm78_vm0, %v395_v40 }
 0x3f4   :  { %606 = vmatmul.mubr.msk.f32.vlgmr.msra.gmra.mrb[4].mxu1 %vm78_vm0, %v396_v41 }
 0x4c7   :  { %v607_v43 = vpop.f32.mrb[4].mxu1 }
 0x4c8   :  { %v486_v44 = vadd.f32 %v607_v43, %v552_v42  ;;  %v480_v45 = vpop.f32.mrb[5].mxu1 }
 0x4c9   :  { %v481_v46 = vadd.f32 %v552_v42, %v480_v45 }
 0x4ca   :  { %v490_v47 = vadd.f32 %v486_v44, %v208_v18 }
 0x4cb   :  { %v489_v48 = vadd.f32 %v481_v46, %v207_v16 }
 0x4cc   :  { %v496_v49 = vsel %vm78_vm0, %v490_v47, 0.0 }
 0x4cd   :  { %497 = vadd.xlane.f32.xlu1 %v496_v49  ;;  %v493_v50 = vsel %vm78_vm0, %v489_v48, 0.0 }
 0x4ce   :  { %494 = vadd.xlane.f32.xlu0 %v493_v50 }
 0x55a   :  { %v498_v51 = vpop.xlane.xlu1 %497 }
 0x55b   :  { %v500_v52 = vmul.f32 0.03125, %v498_v51  ;;  %v495_v53 = vpop.xlane.xlu0 %494 }
 0x55c   :  { %v499_v54 = vmul.f32 0.03125, %v495_v53 }
 0x55d   :  { %v502_v55 = vsub.f32 %v490_v47, %v500_v52 }
 0x55e   :  { %v501_v56 = vsub.f32 %v489_v48, %v499_v54 }
 0x55f   :  { %v504_v57 = vmul.f32 %v502_v55, %v502_v55 }
 0x560   :  { %v503_v58 = vmul.f32 %v501_v56, %v501_v56 }
 0x561   :  { %v508_v59 = vsel %vm78_vm0, %v504_v57, 0.0 }
 0x562   :  { %509 = vadd.xlane.f32.xlu1 %v508_v59  ;;  %v505_v60 = vsel %vm78_vm0, %v503_v58, 0.0 }
 0x563   :  { %506 = vadd.xlane.f32.xlu0 %v505_v60 }
 0x5ef   :  { %v510_v61 = vpop.xlane.xlu1 %509 }
 0x5f0   :  { %v512_v62 = vmul.f32 0.03125, %v510_v61  ;;  %v507_v63 = vpop.xlane.xlu0 %506 }
 0x5f1   :  { %v511_v0 = vmul.f32 0.03125, %v507_v63 }
 0x5f2   :  { %v514_v1 = vadd.f32 1e-05, %v512_v62 }
 0x5f3   :  { %v513_v2 = vadd.f32 1e-05, %v511_v0 }
 0x5f4   :  { %667 = vrsqrt.f32 %v514_v1 }
 0x5f5   :  { %669 = vrsqrt.f32 %v513_v2 }
 0x5fe   :  { %v668_v3 = vpop.eup %667 }
 0x5ff   :  { %v670_v5 = vpop.eup %669  ;;  %v518_v6 = vmul.f32 %v668_v3, %v502_v55 }
 0x600   :  { %v517_v8 = vmul.f32 %v670_v5, %v501_v56 }
 0x601   :  { %v526_v9 = vmul.f32 %v555_v4, %v518_v6 }
 0x602   :  { %v525_v10 = vmul.f32 %v555_v4, %v517_v8 }
 0x603   :  { %v534_v11 = vadd.f32 %v556_v7, %v526_v9 }
 0x604   :  { %v533_v12 = vadd.f32 %v556_v7, %v525_v10 }
 0x605   :  { %536 = vst.msk [vmem:[%s923_s14 + $0x8] sm:$0xff] %vm78_vm0, %v534_v11 }
 0x606   :  { %535 = vst.msk [vmem:[%s923_s14] sm:$0xff] %vm78_vm0, %v533_v12 }

</bundles_post_ra>
